<compile_context>
chip_gen: v7x
topology: tpu7x:2x2x1
jax: 0.10.0
libtpu: 0.0.40
codegen_flags: <defaults>
</compile_context>

<pallas_src>
import functools

import jax
import jax.numpy as jnp
from jax import lax
from jax.experimental import pallas as pl
from jax.experimental.pallas import tpu as pltpu


def _dilconv_kernel(x_ref, dw_ref, pw_ref, y_ref, stats_ref, *,
                    ksize_h, ksize_w, stride, dilation,
                    h_out, w_out, c_in, c_out):
    # x_ref block: (1, Hp, Wp, C_in) zero-padded NHWC image.
    x = jnp.maximum(x_ref[0].astype(jnp.float32), 0.0)            # ReLU (once)
    dw = dw_ref[...].astype(jnp.float32)                          # (KH*KW, C_in)

    # Depthwise dilated conv: accumulate shifted taps * per-channel weight (VPU).
    acc = jnp.zeros((h_out, w_out, c_in), jnp.float32)
    for i in range(ksize_h):
        for j in range(ksize_w):
            h0 = i * dilation
            w0 = j * dilation
            tap = lax.slice(
                x, (h0, w0, 0),
                (h0 + h_out * stride, w0 + w_out * stride, c_in))
            if stride > 1:
                # Subsample without strided slices: split the stride into its
                # own axis and take index 0 (outer / sublane axes only).
                tap = tap.reshape(h_out, stride, w_out * stride, c_in)[:, 0]
                tap = tap.reshape(h_out, w_out, stride, c_in)[:, :, 0]
            acc = acc + tap * dw[i * ksize_w + j]

    # Pointwise 1x1 conv: (H_out*W_out, C_in) @ (C_in, C_out) on the MXU.
    z = jnp.dot(acc.reshape(h_out * w_out, c_in),
                pw_ref[...].astype(jnp.float32),
                preferred_element_type=jnp.float32,
                precision=lax.Precision.HIGHEST)

    y_ref[0] = z.reshape(h_out, w_out, c_out).astype(y_ref.dtype)

    # Per-image partial BatchNorm statistics (reduced across N in the wrapper).
    s = jnp.sum(z, axis=0, keepdims=True)           # (1, C_out)
    sq = jnp.sum(z * z, axis=0, keepdims=True)      # (1, C_out)
    stats_ref[0] = jnp.concatenate([s, sq], axis=0)


def _bn_apply_kernel(y_ref, scale_ref, shift_ref, o_ref):
    o_ref[0] = (y_ref[0].astype(jnp.float32) * scale_ref[0]
                + shift_ref[0]).astype(o_ref.dtype)


def dil_conv_forward(x, dw_weight, pw_weight, gamma, beta, *,
                     stride, padding, dilation, eps=1e-5):
    """DilConv forward for NCHW input x (PyTorch semantics, batch-stats BN)."""
    n, c_in, h, w = x.shape
    c_out = pw_weight.shape[0]
    kh, kw = dw_weight.shape[2], dw_weight.shape[3]

    h_out = (h + 2 * padding - dilation * (kh - 1) - 1) // stride + 1
    w_out = (w + 2 * padding - dilation * (kw - 1) - 1) // stride + 1

    # Pad so every kernel tap can take a contiguous h_out*stride / w_out*stride
    # slab (any extra bottom/right rows land only in discarded stride slots).
    hp = (kh - 1) * dilation + h_out * stride
    wp = (kw - 1) * dilation + w_out * stride

    x_nhwc = jnp.transpose(x, (0, 2, 3, 1)).astype(jnp.float32)
    x_pad = jnp.pad(
        x_nhwc,
        ((0, 0), (padding, hp - h - padding), (padding, wp - w - padding), (0, 0)))

    # Depthwise weight (C_in, 1, KH, KW) -> (KH*KW, C_in); pointwise
    # (C_out, C_in, 1, 1) -> (C_in, C_out).
    dw = jnp.transpose(dw_weight[:, 0, :, :], (1, 2, 0)).reshape(kh * kw, c_in)
    dw = dw.astype(jnp.float32)
    pw = jnp.transpose(pw_weight[:, :, 0, 0], (1, 0)).astype(jnp.float32)

    conv_kernel = functools.partial(
        _dilconv_kernel, ksize_h=kh, ksize_w=kw, stride=stride,
        dilation=dilation, h_out=h_out, w_out=w_out, c_in=c_in, c_out=c_out)

    y, stats = pl.pallas_call(
        conv_kernel,
        out_shape=(
            jax.ShapeDtypeStruct((n, h_out, w_out, c_out), jnp.float32),
            jax.ShapeDtypeStruct((n, 2, c_out), jnp.float32),
        ),
        grid=(n,),
        in_specs=[
            pl.BlockSpec((1, hp, wp, c_in), lambda b: (b, 0, 0, 0)),
            pl.BlockSpec((kh * kw, c_in), lambda b: (0, 0)),
            pl.BlockSpec((c_in, c_out), lambda b: (0, 0)),
        ],
        out_specs=(
            pl.BlockSpec((1, h_out, w_out, c_out), lambda b: (b, 0, 0, 0)),
            pl.BlockSpec((1, 2, c_out), lambda b: (b, 0, 0)),
        ),
        compiler_params=pltpu.CompilerParams(
            dimension_semantics=("parallel",)),
    )(x_pad, dw, pw)

    # O(C_out) epilogue: fold batch statistics into a fused scale/shift.
    count = n * h_out * w_out
    total = jnp.sum(stats, axis=0)                       # (2, C_out)
    mean = total[0] / count
    var = jnp.maximum(total[1] / count - mean * mean, 0.0)   # biased var
    inv_std = lax.rsqrt(var + eps)
    g = gamma.astype(jnp.float32)
    scale = (g * inv_std).reshape(1, c_out)
    shift = (beta.astype(jnp.float32) - mean * g * inv_std).reshape(1, c_out)

    out_nhwc = pl.pallas_call(
        _bn_apply_kernel,
        out_shape=jax.ShapeDtypeStruct((n, h_out, w_out, c_out), jnp.float32),
        grid=(n,),
        in_specs=[
            pl.BlockSpec((1, h_out, w_out, c_out), lambda b: (b, 0, 0, 0)),
            pl.BlockSpec((1, c_out), lambda b: (0, 0)),
            pl.BlockSpec((1, c_out), lambda b: (0, 0)),
        ],
        out_specs=pl.BlockSpec((1, h_out, w_out, c_out), lambda b: (b, 0, 0, 0)),
        compiler_params=pltpu.CompilerParams(
            dimension_semantics=("parallel",)),
    )(y, scale, shift)

    return jnp.transpose(out_nhwc, (0, 3, 1, 2)).astype(x.dtype)


def _dil_conv_ref(x, dw_weight, pw_weight, gamma, beta, *,
                  stride, padding, dilation, eps=1e-5):
    """Pure-JAX reference (mirrors the PyTorch module in training mode)."""
    c_in = x.shape[1]
    y = jnp.maximum(x, 0.0)
    y = lax.conv_general_dilated(
        y, dw_weight, window_strides=(stride, stride),
        padding=((padding, padding), (padding, padding)),
        rhs_dilation=(dilation, dilation),
        dimension_numbers=("NCHW", "OIHW", "NCHW"),
        feature_group_count=c_in,
        precision=lax.Precision.HIGHEST)
    y = lax.conv_general_dilated(
        y, pw_weight, window_strides=(1, 1), padding="VALID",
        dimension_numbers=("NCHW", "OIHW", "NCHW"),
        precision=lax.Precision.HIGHEST)
    mean = jnp.mean(y, axis=(0, 2, 3), keepdims=True)
    var = jnp.mean((y - mean) ** 2, axis=(0, 2, 3), keepdims=True)
    g = gamma.reshape(1, -1, 1, 1)
    b = beta.reshape(1, -1, 1, 1)
    return (y - mean) * lax.rsqrt(var + eps) * g + b


if __name__ == "__main__":
    key = jax.random.PRNGKey(0)
    k_x, k_dw, k_pw, k_g, k_b = jax.random.split(key, 5)

    N, C_IN, C_OUT, H, W = 2, 4, 8, 16, 16
    KSIZE, STRIDE, PADDING, DILATION = 3, 1, 2, 2     # DARTS dil_conv_3x3

    x = jax.random.normal(k_x, (N, C_IN, H, W), dtype=jnp.float32)
    dw_weight = 0.3 * jax.random.normal(k_dw, (C_IN, 1, KSIZE, KSIZE),
                                        dtype=jnp.float32)
    pw_weight = 0.3 * jax.random.normal(k_pw, (C_OUT, C_IN, 1, 1),
                                        dtype=jnp.float32)
    gamma = 1.0 + 0.1 * jax.random.normal(k_g, (C_OUT,), dtype=jnp.float32)
    beta = 0.1 * jax.random.normal(k_b, (C_OUT,), dtype=jnp.float32)

    out = dil_conv_forward(x, dw_weight, pw_weight, gamma, beta,
                           stride=STRIDE, padding=PADDING, dilation=DILATION)
    jax.block_until_ready(out)

    assert out.shape == (N, C_OUT, H, W), out.shape
    assert out.dtype == x.dtype

    ref = _dil_conv_ref(x, dw_weight, pw_weight, gamma, beta,
                        stride=STRIDE, padding=PADDING, dilation=DILATION)
    max_err = float(jnp.max(jnp.abs(out - ref)))
    assert max_err < 2e-3, f"max abs error vs reference: {max_err}"

    print("KERNEL_OK")
</pallas_src>

<mosaic_0001>
module attributes {stable_mosaic.version = 11 : i64} {
  func.func @_dilconv_kernel(%arg0: i32, %arg1: memref<1x20x20x4xf32, #tpu.memory_space<vmem>>, %arg2: memref<9x4xf32, #tpu.memory_space<vmem>>, %arg3: memref<4x8xf32, #tpu.memory_space<vmem>>, %arg4: memref<1x16x16x8xf32, #tpu.memory_space<vmem>>, %arg5: memref<1x2x8xf32, #tpu.memory_space<vmem>>) attributes {dimension_semantics = [#tpu.dimension_semantics<parallel>], iteration_bounds = array<i64: 2>, scalar_prefetch = 0 : i64, scratch_operands = 0 : i64, tpu.core_type = #tpu.core_type<tc>, window_params = [{transform_indices = @transform_0, window_bounds = array<i64: 1, 20, 20, 4>}, {pipeline_mode = #tpu.pipeline_mode<synchronous>, transform_indices = @transform_1, window_bounds = array<i64: 9, 4>}, {pipeline_mode = #tpu.pipeline_mode<synchronous>, transform_indices = @transform_2, window_bounds = array<i64: 4, 8>}, {transform_indices = @transform_3, window_bounds = array<i64: 1, 16, 16, 8>}, {transform_indices = @transform_4, window_bounds = array<i64: 1, 2, 8>}]} {
    %c0 = arith.constant 0 : index
    %c0_0 = arith.constant 0 : index
    %c0_1 = arith.constant 0 : index
    %c0_2 = arith.constant 0 : index
    %0 = vector.load %arg1[%c0, %c0_0, %c0_1, %c0_2] : memref<1x20x20x4xf32, #tpu.memory_space<vmem>>, vector<1x20x20x4xf32>
    %1 = vector.shape_cast %0 : vector<1x20x20x4xf32> to vector<20x20x4xf32>
    %cst = arith.constant 0.000000e+00 : f32
    %2 = vector.broadcast %cst : f32 to vector<20x20x4xf32>
    %3 = arith.maximumf %1, %2 : vector<20x20x4xf32>
    %c0_3 = arith.constant 0 : index
    %c0_4 = arith.constant 0 : index
    %4 = vector.load %arg2[%c0_3, %c0_4] : memref<9x4xf32, #tpu.memory_space<vmem>>, vector<9x4xf32>
    %cst_5 = arith.constant 0.000000e+00 : f32
    %5 = vector.broadcast %cst_5 : f32 to vector<16x16x4xf32>
    %6 = vector.extract_strided_slice %3 {offsets = [0, 0, 0], sizes = [16, 16, 4], strides = [1, 1, 1]} : vector<20x20x4xf32> to vector<16x16x4xf32>
    %7 = vector.extract_strided_slice %4 {offsets = [0, 0], sizes = [1, 4], strides = [1, 1]} : vector<9x4xf32> to vector<1x4xf32>
    %8 = vector.shape_cast %7 : vector<1x4xf32> to vector<4xf32>
    %9 = vector.shape_cast %8 : vector<4xf32> to vector<1x1x4xf32>
    %10 = vector.broadcast %9 : vector<1x1x4xf32> to vector<16x16x4xf32>
    %11 = arith.mulf %6, %10 : vector<16x16x4xf32>
    %12 = arith.addf %5, %11 : vector<16x16x4xf32>
    %13 = vector.extract_strided_slice %3 {offsets = [0, 2, 0], sizes = [16, 16, 4], strides = [1, 1, 1]} : vector<20x20x4xf32> to vector<16x16x4xf32>
    %14 = vector.extract_strided_slice %4 {offsets = [1, 0], sizes = [1, 4], strides = [1, 1]} : vector<9x4xf32> to vector<1x4xf32>
    %15 = vector.shape_cast %14 : vector<1x4xf32> to vector<4xf32>
    %16 = vector.shape_cast %15 : vector<4xf32> to vector<1x1x4xf32>
    %17 = vector.broadcast %16 : vector<1x1x4xf32> to vector<16x16x4xf32>
    %18 = arith.mulf %13, %17 : vector<16x16x4xf32>
    %19 = arith.addf %12, %18 : vector<16x16x4xf32>
    %20 = vector.extract_strided_slice %3 {offsets = [0, 4, 0], sizes = [16, 16, 4], strides = [1, 1, 1]} : vector<20x20x4xf32> to vector<16x16x4xf32>
    %21 = vector.extract_strided_slice %4 {offsets = [2, 0], sizes = [1, 4], strides = [1, 1]} : vector<9x4xf32> to vector<1x4xf32>
    %22 = vector.shape_cast %21 : vector<1x4xf32> to vector<4xf32>
    %23 = vector.shape_cast %22 : vector<4xf32> to vector<1x1x4xf32>
    %24 = vector.broadcast %23 : vector<1x1x4xf32> to vector<16x16x4xf32>
    %25 = arith.mulf %20, %24 : vector<16x16x4xf32>
    %26 = arith.addf %19, %25 : vector<16x16x4xf32>
    %27 = vector.extract_strided_slice %3 {offsets = [2, 0, 0], sizes = [16, 16, 4], strides = [1, 1, 1]} : vector<20x20x4xf32> to vector<16x16x4xf32>
    %28 = vector.extract_strided_slice %4 {offsets = [3, 0], sizes = [1, 4], strides = [1, 1]} : vector<9x4xf32> to vector<1x4xf32>
    %29 = vector.shape_cast %28 : vector<1x4xf32> to vector<4xf32>
    %30 = vector.shape_cast %29 : vector<4xf32> to vector<1x1x4xf32>
    %31 = vector.broadcast %30 : vector<1x1x4xf32> to vector<16x16x4xf32>
    %32 = arith.mulf %27, %31 : vector<16x16x4xf32>
    %33 = arith.addf %26, %32 : vector<16x16x4xf32>
    %34 = vector.extract_strided_slice %3 {offsets = [2, 2, 0], sizes = [16, 16, 4], strides = [1, 1, 1]} : vector<20x20x4xf32> to vector<16x16x4xf32>
    %35 = vector.extract_strided_slice %4 {offsets = [4, 0], sizes = [1, 4], strides = [1, 1]} : vector<9x4xf32> to vector<1x4xf32>
    %36 = vector.shape_cast %35 : vector<1x4xf32> to vector<4xf32>
    %37 = vector.shape_cast %36 : vector<4xf32> to vector<1x1x4xf32>
    %38 = vector.broadcast %37 : vector<1x1x4xf32> to vector<16x16x4xf32>
    %39 = arith.mulf %34, %38 : vector<16x16x4xf32>
    %40 = arith.addf %33, %39 : vector<16x16x4xf32>
    %41 = vector.extract_strided_slice %3 {offsets = [2, 4, 0], sizes = [16, 16, 4], strides = [1, 1, 1]} : vector<20x20x4xf32> to vector<16x16x4xf32>
    %42 = vector.extract_strided_slice %4 {offsets = [5, 0], sizes = [1, 4], strides = [1, 1]} : vector<9x4xf32> to vector<1x4xf32>
    %43 = vector.shape_cast %42 : vector<1x4xf32> to vector<4xf32>
    %44 = vector.shape_cast %43 : vector<4xf32> to vector<1x1x4xf32>
    %45 = vector.broadcast %44 : vector<1x1x4xf32> to vector<16x16x4xf32>
    %46 = arith.mulf %41, %45 : vector<16x16x4xf32>
    %47 = arith.addf %40, %46 : vector<16x16x4xf32>
    %48 = vector.extract_strided_slice %3 {offsets = [4, 0, 0], sizes = [16, 16, 4], strides = [1, 1, 1]} : vector<20x20x4xf32> to vector<16x16x4xf32>
    %49 = vector.extract_strided_slice %4 {offsets = [6, 0], sizes = [1, 4], strides = [1, 1]} : vector<9x4xf32> to vector<1x4xf32>
    %50 = vector.shape_cast %49 : vector<1x4xf32> to vector<4xf32>
    %51 = vector.shape_cast %50 : vector<4xf32> to vector<1x1x4xf32>
    %52 = vector.broadcast %51 : vector<1x1x4xf32> to vector<16x16x4xf32>
    %53 = arith.mulf %48, %52 : vector<16x16x4xf32>
    %54 = arith.addf %47, %53 : vector<16x16x4xf32>
    %55 = vector.extract_strided_slice %3 {offsets = [4, 2, 0], sizes = [16, 16, 4], strides = [1, 1, 1]} : vector<20x20x4xf32> to vector<16x16x4xf32>
    %56 = vector.extract_strided_slice %4 {offsets = [7, 0], sizes = [1, 4], strides = [1, 1]} : vector<9x4xf32> to vector<1x4xf32>
    %57 = vector.shape_cast %56 : vector<1x4xf32> to vector<4xf32>
    %58 = vector.shape_cast %57 : vector<4xf32> to vector<1x1x4xf32>
    %59 = vector.broadcast %58 : vector<1x1x4xf32> to vector<16x16x4xf32>
    %60 = arith.mulf %55, %59 : vector<16x16x4xf32>
    %61 = arith.addf %54, %60 : vector<16x16x4xf32>
    %62 = vector.extract_strided_slice %3 {offsets = [4, 4, 0], sizes = [16, 16, 4], strides = [1, 1, 1]} : vector<20x20x4xf32> to vector<16x16x4xf32>
    %63 = vector.extract_strided_slice %4 {offsets = [8, 0], sizes = [1, 4], strides = [1, 1]} : vector<9x4xf32> to vector<1x4xf32>
    %64 = vector.shape_cast %63 : vector<1x4xf32> to vector<4xf32>
    %65 = vector.shape_cast %64 : vector<4xf32> to vector<1x1x4xf32>
    %66 = vector.broadcast %65 : vector<1x1x4xf32> to vector<16x16x4xf32>
    %67 = arith.mulf %62, %66 : vector<16x16x4xf32>
    %68 = arith.addf %61, %67 : vector<16x16x4xf32>
    %69 = vector.shape_cast %68 : vector<16x16x4xf32> to vector<256x4xf32>
    %c0_6 = arith.constant 0 : index
    %c0_7 = arith.constant 0 : index
    %70 = vector.load %arg3[%c0_6, %c0_7] : memref<4x8xf32, #tpu.memory_space<vmem>>, vector<4x8xf32>
    %cst_8 = arith.constant dense<0.000000e+00> : vector<256x8xf32>
    %71 = tpu.matmul %69, %70, %cst_8 {dimension_numbers = #tpu.dot_dimension_numbers<[1], [0], [0], [1], [0, 0, 1, 1], [], []>, precision = #tpu.contract_precision<fp32>} : vector<256x4xf32>, vector<4x8xf32>, vector<256x8xf32> -> vector<256x8xf32>
    %72 = vector.shape_cast %71 : vector<256x8xf32> to vector<16x16x8xf32>
    %c0_9 = arith.constant 0 : index
    %c0_10 = arith.constant 0 : index
    %c0_11 = arith.constant 0 : index
    %c0_12 = arith.constant 0 : index
    %73 = vector.load %arg4[%c0_9, %c0_10, %c0_11, %c0_12] : memref<1x16x16x8xf32, #tpu.memory_space<vmem>>, vector<1x16x16x8xf32>
    %74 = vector.shape_cast %73 : vector<1x16x16x8xf32> to vector<16x16x8xf32>
    %75 = vector.shape_cast %72 : vector<16x16x8xf32> to vector<1x16x16x8xf32>
    tpu.vector_store %arg4[%c0_9, %c0_10, %c0_11, %c0_12], %75 {strides = array<i32>} : memref<1x16x16x8xf32, #tpu.memory_space<vmem>>, vector<1x16x16x8xf32>,
    %cst_13 = arith.constant dense<0.000000e+00> : vector<8xf32>
    %76 = vector.multi_reduction <add>, %71, %cst_13 [0] : vector<256x8xf32> to vector<8xf32>
    %77 = vector.shape_cast %76 : vector<8xf32> to vector<1x8xf32>
    %78 = arith.mulf %71, %71 : vector<256x8xf32>
    %cst_14 = arith.constant dense<0.000000e+00> : vector<8xf32>
    %79 = vector.multi_reduction <add>, %78, %cst_14 [0] : vector<256x8xf32> to vector<8xf32>
    %80 = vector.shape_cast %79 : vector<8xf32> to vector<1x8xf32>
    %81 = tpu.concatenate %77, %80 in 0 : vector<1x8xf32>, vector<1x8xf32> -> vector<2x8xf32>
    %c0_15 = arith.constant 0 : index
    %c0_16 = arith.constant 0 : index
    %c0_17 = arith.constant 0 : index
    %82 = vector.load %arg5[%c0_15, %c0_16, %c0_17] : memref<1x2x8xf32, #tpu.memory_space<vmem>>, vector<1x2x8xf32>
    %83 = vector.shape_cast %82 : vector<1x2x8xf32> to vector<2x8xf32>
    %84 = vector.shape_cast %81 : vector<2x8xf32> to vector<1x2x8xf32>
    tpu.vector_store %arg5[%c0_15, %c0_16, %c0_17], %84 {strides = array<i32>} : memref<1x2x8xf32, #tpu.memory_space<vmem>>, vector<1x2x8xf32>,
    return
  }
  func.func @transform_0(%arg0: i32) -> (i32, i32, i32, i32) {
    %c0_i32 = arith.constant 0 : i32
    %c0_i32_0 = arith.constant 0 : i32
    %c0_i32_1 = arith.constant 0 : i32
    %c0_i32_2 = arith.constant 0 : i32
    return %arg0, %c0_i32, %c0_i32_0, %c0_i32_1 : i32, i32, i32, i32
  }
  func.func @transform_1(%arg0: i32) -> (i32, i32) {
    %c0_i32 = arith.constant 0 : i32
    %c0_i32_0 = arith.constant 0 : i32
    %c0_i32_1 = arith.constant 0 : i32
    return %c0_i32, %c0_i32_0 : i32, i32
  }
  func.func @transform_2(%arg0: i32) -> (i32, i32) {
    %c0_i32 = arith.constant 0 : i32
    %c0_i32_0 = arith.constant 0 : i32
    %c0_i32_1 = arith.constant 0 : i32
    return %c0_i32, %c0_i32_0 : i32, i32
  }
  func.func @transform_3(%arg0: i32) -> (i32, i32, i32, i32) {
    %c0_i32 = arith.constant 0 : i32
    %c0_i32_0 = arith.constant 0 : i32
    %c0_i32_1 = arith.constant 0 : i32
    %c0_i32_2 = arith.constant 0 : i32
    return %arg0, %c0_i32, %c0_i32_0, %c0_i32_1 : i32, i32, i32, i32
  }
  func.func @transform_4(%arg0: i32) -> (i32, i32, i32) {
    %c0_i32 = arith.constant 0 : i32
    %c0_i32_0 = arith.constant 0 : i32
    %c0_i32_1 = arith.constant 0 : i32
    return %arg0, %c0_i32, %c0_i32_0 : i32, i32, i32
  }
}

</mosaic_0001>

<bundles_post_ra>
// kernel: tpu_custom_call.1
= control target key start
LH: loop header
LB: loop body
LE: loop exit
PB: predicated region body
PF: predicated region fallthrough
CT: control target
= control target key end

     0   :  { %10 = vsyncpa [#allocation3], 0  ;;  %s6933_s0 = inlined_call_operand.vmem [shape: f32[2,20,20,4], index: 0, kind: input, shape index: {}]   ;;  %s6934_s1 = inlined_call_operand.vmem [shape: f32[9,4], index: 1, kind: input, shape index: {}]   ;;  %s6935_s2 = inlined_call_operand.vmem [shape: f32[4,8], index: 2, kind: input, shape index: {}]   ;;  %s6936_s3 = inlined_call_operand.vmem [shape: f32[2,16,16,8], index: 3, kind: output, shape index: {0}]   ;;  %s6937_s4 = inlined_call_operand.hbm [shape: f32[2,2,8], index: 4, kind: output, shape index: {1}]  }
   0x1   :  { %12 = vsyncpa [#allocation3 + $0x1], 0  ;;  %s4998_s15 = smov 0   ;;  %s5000_s16 = smov 0  }
   0x2   :  { %s5002_s17 = smov 0   ;;  %s5004_s18 = smov 0  }
   0x3 LB: > { %s5019_s19 = sadd.s32 4294967295, %s4970_s18   ;;  %s4194_s20 = sadd.s32 4294967294, %s4970_s18   ;;  %s4970_s18 = sphi %s5004_s18, %s7085_s18   ;;  %s4966_s17 = sphi %s5002_s17, %s7084_s17   ;;  %s4962_s16 = sphi %s5000_s16, %s7083_s16   ;;  %s4958_s15 = sphi %s4998_s15, %s7082_s15  }
   0x4   : > { %s5023_s21 = sadd.s32 1, %s4970_s18   ;;  %s119_s22 = sadd.s32 1, %s4966_s17 }
   0x5   : > { %s116_s23 = ssub.s32 %s4970_s18, %s5023_s21  ;;  %p129_p0 = scmp.ne.s32.totalorder %s4966_s17, %s4962_s16 }
   0x6   : > { %p117_p1 = scmp.eq.s32.totalorder %s116_s23, 0  ;;  %p130_p2 = scmp.eq.s32.totalorder %s5019_s19, 1 }
   0x7   : > { %p135_p3 = scmp.ne.s32.totalorder %s4962_s16, %s4958_s15  ;;  %p136_p4 = scmp.eq.s32.totalorder %s4194_s20, 1 }
   0x8   : > { %s5034_s24 = scalar_select %p117_p1, %s4966_s17, %s119_s22  }
   0x9   : > { %p5036_p5 = por %p130_p2, %p129_p0  ;;  %p5040_p6 = por %p136_p4, %p135_p3 }
   0xa   : > { %p4197_p7 = scmp.ge.s32.totalorder %s4970_s18, 1  ;;  %p168_p8 = scmp.lt.s32.totalorder %s4970_s18, 3 }
   0xc   : > { %p169_p9 = pnand %p4197_p7, %p168_p8 }
   0xe   : > { %172 = sbr.rel (%p169_p9) target bundleno = 769 (0x301), region = 32 }
  0x15   : > { %vm744_vm0 = vcmask 1043456   ;;  %v2001_v0 = vld [vmem:[%s6935_s2] sm:$0xf]  ;;  %p199_p10 = scmp.lt.s32.totalorder %s5019_s19, 1  ;;  %v331_v1 = vlaneseq  ;;  %vm499_vm1 = vcmask 1045504   ;;  %vm2002_vm2 = vcmask 31744  }
  0x16   : > { %v2100_v2 = vsel %vm744_vm0, %v2001_v0, 0  ;;  %v329_v5 = vld [vmem:[%s6934_s1] sm:$0xff]  ;;  %v5118_v47 = vld [vmem:[%s6934_s1 + $0x8] ss:$0 sm:$0xff]  ;;  %vm3881_vm3 = vcmask 64512   ;;  %s4204_s5 = sshll.u32 %s5019_s19, 5 }
  0x17   : > { %v5051_v3 = vand.u32 4294901760, %v2100_v2  ;;  %s5054_s29 = scalar_select %p199_p10, %s5019_s19, 1  ;;  %v332_v4 = vshrl.u32 %v331_v1, 7  ;;  %vm4084_vm4 = vcmask 1040384   ;;  %vm4086_vm5 = vcmask 58368  }
  0x18   : > { %s6891_s10 = scalar_lea.hbm %s6937_s4, %s4204_s5  ;;  %s4972_s12 = smov [#allocation2]  }
  0x19   : > { %4556 = vmatprep.subr.mxu0 %v5051_v3  ;;  %s4866_s6 = smul.u32 480, %s5054_s29  ;;  %v333_v6 = vsub.s32 0, %v332_v4  ;;  %v401_v7 = vsub.s32 1, %v332_v4  ;;  %v646_v8 = vsub.s32 2, %v332_v4  ;;  %v891_v9 = vsub.s32 3, %v332_v4  ;;  %4406 = vmatprep.subr.mxu1 %v5051_v3  ;;  %s4207_s22 = sshll.u32 %s5054_s29, 8 }
  0x1a   : > { %4557 = vmatpush3.msra.mxu0 %v5051_v3  ;;  %v959_v10 = vsub.s32 4, %v332_v4  ;;  %v1203_v11 = vsub.s32 5, %v332_v4  ;;  %v1447_v12 = vsub.s32 6, %v332_v4  ;;  %v1515_v13 = vsub.s32 7, %v332_v4  ;;  %4407 = vmatpush3.msra.mxu1 %v5051_v3  ;;  %s6756_s28 = scalar_lea.vmem %s6936_s3, %s4207_s22  ;;  %s196_s29 = sand.u32 1, %s4962_s16  }
  0x1b   : > { %s5067_s9 = scalar_lea.vmem %s6933_s0, %s4866_s6  ;;  %v5069_v14 = vrot.slane %v329_v5, %v333_v6  ;;  %v5071_v15 = vrot.slane %v329_v5, %v401_v7  ;;  %v5073_v16 = vrot.slane %v329_v5, %v646_v8  ;;  %v5078_v20 = vrot.slane %v329_v5, %v891_v9  ;;  %s4198_s30 = sshll.u32 %s196_s29, 1 }
  0x1c   : > { %v209_v17 = vld [vmem:[%s5067_s9] sm:$0xff]  ;;  %v210_v18 = vld [vmem:[%s5067_s9 + $0x8] sm:$0xff]  ;;  %v215_v19 = vld [vmem:[%s5067_s9 + $0x30] sm:$0xff]  ;;  %v5080_v21 = vrot.slane %v329_v5, %v959_v10  ;;  %v5082_v22 = vrot.slane %v329_v5, %v1203_v11  ;;  %v5084_v23 = vrot.slane %v329_v5, %v1447_v12  ;;  %v5091_v30 = vrot.slane %v329_v5, %v1515_v13  ;;  %s198_s6 = scalar_lea.vmem [#allocation2], %s4198_s30  ;;  %s4094_s11 = scalar_lea.sflag [#allocation3], %s196_s29 }
  0x1d   : > { %v216_v24 = vld [vmem:[%s5067_s9 + $0x38] sm:$0xff]  ;;  %v221_v25 = vld [vmem:[%s5067_s9 + $0x60] sm:$0xff]  ;;  %v222_v26 = vld [vmem:[%s5067_s9 + $0x68] sm:$0xff]  ;;  %v269_v27 = vmax.f32 %v209_v17, 0.0  ;;  %v270_v28 = vmax.f32 %v210_v18, 0.0  ;;  %v5089_v29 = vmax.f32 %v215_v19, 0.0  ;;  %v5100_v34 = vsub.f32 %v2100_v2, %v5051_v3 }
  0x1e   : > { %v5093_v31 = vmax.f32 %v216_v24, 0.0  ;;  %v5095_v32 = vmax.f32 %v221_v25, 0.0  ;;  %v5097_v33 = vmax.f32 %v222_v26, 0.0  ;;  %v211_v56 = vld [vmem:[%s5067_s9 + $0x10] sm:$0xf]  ;;  %s4110_s7 = sshll.u32 %s198_s6, 4  ;;  %s6893_s7 = int_to_ptr.vmem [resolvable:$true] %s4110_s7 }
  0x1f   : > { %v335_v35 = vmul.f32 %v5069_v14, %v269_v27  ;;  %v403_v36 = vmul.f32 %v5071_v15, %v269_v27  ;;  %v404_v37 = vmul.f32 %v5071_v15, %v270_v28  ;;  %v648_v38 = vmul.f32 %v5073_v16, %v269_v27  ;;  %v217_v57 = vld [vmem:[%s5067_s9 + $0x40] sm:$0xf]  ;;  %v223_v62 = vld [vmem:[%s5067_s9 + $0x70] sm:$0xf]  ;;  %s4908_s19 = scalar_lea.vmem %s6893_s7, 32  ;;  %s4912_s13 = sshll.u32 %s4972_s12, 4  ;;  %s4913_s13 = int_to_ptr.vmem [resolvable:$false] %s4912_s13 }
  0x20   : > { %v649_v39 = vmul.f32 %v5073_v16, %v270_v28  ;;  %v893_v40 = vmul.f32 %v5078_v20, %v5089_v29  ;;  %v961_v41 = vmul.f32 %v5080_v21, %v5089_v29  ;;  %v962_v42 = vmul.f32 %v5080_v21, %v5093_v31  ;;  %p4909_p11 = scmp.ne.s32.totalorder %s6893_s7, %s4908_s19  ;;  %s4914_s14 = scalar_lea.vmem %s4913_s13, 64 }
  0x21   : > { %v500_v43 = vrot.slane %v403_v36, 2  ;;  %v501_v44 = vrot.slane %v404_v37, 2  ;;  %v745_v45 = vrot.slane %v648_v38, 4  ;;  %v1205_v46 = vmul.f32 %v5082_v22, %v5089_v29  ;;  %p4915_p0 = scmp.lt.s32.totalorder %s6893_s7, %s4913_s13  ;;  %p4916_p1 = scmp.lt.s32.totalorder %s4914_s14, %s4908_s19 }
  0x22   : > { %v746_v48 = vrot.slane %v649_v39, 4  ;;  %v1057_v49 = vrot.slane %v961_v41, 2  ;;  %v1058_v50 = vrot.slane %v962_v42, 2  ;;  %v1206_v51 = vmul.f32 %v5082_v22, %v5093_v31  ;;  %v212_v41 = vld [vmem:[%s5067_s9 + $0x18] sm:$0xff]  ;;  %p4910_p12 = pnand %p4909_p11, %p5036_p5 }
  0x23   : > { %v502_v52 = vsel %vm499_vm1, %v500_v43, %v501_v44  ;;  %v1301_v53 = vrot.slane %v1205_v46, 4  ;;  %v1449_v54 = vmul.f32 %v5084_v23, %v5095_v32  ;;  %v1517_v55 = vmul.f32 %v5091_v30, %v5095_v32  ;;  %p4917_p2 = por %p4916_p1, %p4915_p0 }
  0x24   : > { %v612_v58 = vadd.f32 %v502_v52, %v335_v35  ;;  %v747_v59 = vsel %vm744_vm0, %v745_v45, %v746_v48  ;;  %v1059_v60 = vsel %vm499_vm1, %v1057_v49, %v1058_v50  ;;  %v1302_v61 = vrot.slane %v1206_v51, 4  ;;  %v213_v49 = vld [vmem:[%s5067_s9 + $0x20] sm:$0xff]  ;;  %p4911_p13 = pneg %p4910_p12 }
  0x25   : > { %v1518_v63 = vmul.f32 %v5091_v30, %v5097_v33  ;;  %v1613_v0 = vrot.slane %v1517_v55, 2  ;;  %v1761_v1 = vmul.f32 %v5118_v47, %v5095_v32  ;;  %v1762_v2 = vmul.f32 %v5118_v47, %v5097_v33 }
  0x26   : > { %v857_v4 = vadd.f32 %v747_v59, %v612_v58  ;;  %v1303_v5 = vsel %vm744_vm0, %v1301_v53, %v1302_v61  ;;  %v271_v6 = vmax.f32 %v211_v56, 0.0  ;;  %v5139_v7 = vmax.f32 %v217_v57, 0.0  ;;  %v218_v56 = vld [vmem:[%s5067_s9 + $0x48] sm:$0xff]  ;;  %v219_v57 = vld [vmem:[%s5067_s9 + $0x50] sm:$0xff]  ;;  %p4918_p3 = pnand %p4917_p2, %p4911_p13 }
  0x27   : > { %v1614_v8 = vrot.slane %v1518_v63, 2  ;;  %v1857_v9 = vrot.slane %v1761_v1, 4  ;;  %v1858_v10 = vrot.slane %v1762_v2, 4  ;;  %v5141_v11 = vmax.f32 %v223_v62, 0.0  ;;  %v224_v62 = vld [vmem:[%s5067_s9 + $0x78] sm:$0xff]  ;;  %v225_v63 = vld [vmem:[%s5067_s9 + $0x80] sm:$0xff] }
  0x28   : > { %v925_v12 = vadd.f32 %v893_v40, %v857_v4  ;;  %v336_v13 = vmul.f32 %v5069_v14, %v270_v28  ;;  %v405_v17 = vmul.f32 %v5071_v15, %v271_v6  ;;  %v650_v18 = vmul.f32 %v5073_v16, %v271_v6 }
  0x29   : > { %v1615_v19 = vsel %vm499_vm1, %v1613_v0, %v1614_v8  ;;  %v1859_v24 = vsel %vm744_vm0, %v1857_v9, %v1858_v10  ;;  %v894_v25 = vmul.f32 %v5078_v20, %v5093_v31  ;;  %v963_v26 = vmul.f32 %v5080_v21, %v5139_v7 }
  0x2a   : > { %v1169_v27 = vadd.f32 %v1059_v60, %v925_v12  ;;  %v503_v35 = vrot.slane %v405_v17, 2  ;;  %v748_v28 = vrot.slane %v650_v18, 4  ;;  %v1207_v36 = vmul.f32 %v5082_v22, %v5139_v7 }
  0x2b   : > { %v1060_v37 = vrot.slane %v963_v26, 2  ;;  %v1450_v38 = vmul.f32 %v5084_v23, %v5097_v33  ;;  %v1519_v39 = vmul.f32 %v5091_v30, %v5141_v11  ;;  %v1763_v40 = vmul.f32 %v5118_v47, %v5141_v11 }
  0x2c   : > { %v1413_v42 = vadd.f32 %v1303_v5, %v1169_v27  ;;  %v504_v43 = vsel %vm499_vm1, %v501_v44, %v503_v35  ;;  %v749_v45 = vsel %vm744_vm0, %v746_v48, %v748_v28  ;;  %v1304_v46 = vrot.slane %v1207_v36, 4 }
  0x2d   : > { %v613_v51 = vadd.f32 %v504_v43, %v336_v13  ;;  %v1061_v52 = vsel %vm499_vm1, %v1058_v50, %v1060_v37  ;;  %v1616_v53 = vrot.slane %v1519_v39, 2  ;;  %v1860_v55 = vrot.slane %v1763_v40, 4 }
  0x2e   : > { %v1481_v58 = vadd.f32 %v1449_v54, %v1413_v42  ;;  %v1305_v59 = vsel %vm744_vm0, %v1302_v61, %v1304_v46  ;;  %v5169_v60 = vand.u32 4294901760, %v5100_v34  ;;  %v272_v44 = vmax.f32 %v212_v41, 0.0 }
  0x2f   : > { %v858_v0 = vadd.f32 %v749_v45, %v613_v51  ;;  %v1617_v48 = vsel %vm499_vm1, %v1614_v8, %v1616_v53  ;;  %v1861_v1 = vsel %vm744_vm0, %v1858_v10, %v1860_v55  ;;  %v5175_v2 = vmax.f32 %v213_v49, 0.0 }
  0x30   : > { %v1725_v50 = vadd.f32 %v1615_v19, %v1481_v58  ;;  %v2492_v4 = vsub.f32 %v5100_v34, %v5169_v60  ;;  %v5179_v54 = vmax.f32 %v218_v56, 0.0  ;;  %v5181_v61 = vmax.f32 %v219_v57, 0.0  ;;  %4606 = vmatprep.subr.mxu0 %v5169_v60 }
  0x31   : > { %v926_v5 = vadd.f32 %v894_v25, %v858_v0  ;;  %v5184_v6 = vmax.f32 %v224_v62, 0.0  ;;  %v5186_v9 = vmax.f32 %v225_v63, 0.0  ;;  %v337_v8 = vmul.f32 %v5069_v14, %v272_v44 }
  0x32   : > { %v1969_v10 = vadd.f32 %v1859_v24, %v1725_v50  ;;  %v5189_v12 = vand.u32 4294901760, %v2492_v4  ;;  %v406_v13 = vmul.f32 %v5071_v15, %v272_v44  ;;  %v5194_v17 = vmul.f32 %v5071_v15, %v5175_v2  ;;  %v214_v4 = vld [vmem:[%s5067_s9 + $0x28] sm:$0xf] }
  0x33   : > { %v1170_v18 = vadd.f32 %v1061_v52, %v926_v5  ;;  %v651_v19 = vmul.f32 %v5073_v16, %v272_v44  ;;  %v5199_v25 = vmul.f32 %v5073_v16, %v5175_v2  ;;  %v895_v26 = vmul.f32 %v5078_v20, %v5179_v54 }
  0x34   : > { %v2004_v24 = vsel %vm2002_vm2, %v1969_v10, 0  ;;  %4456 = vmatprep.subr.mxu1 %v5189_v12  ;;  %v505_v27 = vrot.slane %v406_v13, 2  ;;  %v506_v35 = vrot.slane %v5194_v17, 2  ;;  %v964_v28 = vmul.f32 %v5080_v21, %v5179_v54  ;;  %v220_v13 = vld [vmem:[%s5067_s9 + $0x58] sm:$0xf] }
  0x35   : > { %v5208_v36 = vand.u32 4294901760, %v2004_v24  ;;  %v1414_v37 = vadd.f32 %v1305_v59, %v1170_v18  ;;  %v750_v39 = vrot.slane %v651_v19, 4  ;;  %v751_v40 = vrot.slane %v5199_v25, 4 }
  0x36   : > { %v507_v41 = vsel %vm499_vm1, %v505_v27, %v506_v35  ;;  %v5216_v42 = vmul.f32 %v5080_v21, %v5181_v61  ;;  %v1062_v43 = vrot.slane %v964_v28, 2  ;;  %v1208_v45 = vmul.f32 %v5082_v22, %v5179_v54  ;;  %v226_v28 = vld [vmem:[%s5067_s9 + $0x88] sm:$0xf] }
  0x37   : > { %v5221_v46 = vsub.f32 %v2004_v24, %v5208_v36  ;;  %v1482_v49 = vadd.f32 %v1450_v38, %v1414_v37  ;;  %v614_v51 = vadd.f32 %v507_v41, %v337_v8  ;;  %v752_v52 = vsel %vm744_vm0, %v750_v39, %v751_v40 }
  0x38   : > { %v1063_v53 = vrot.slane %v5216_v42, 2  ;;  %v5229_v55 = vmul.f32 %v5082_v22, %v5181_v61  ;;  %v1306_v56 = vrot.slane %v1208_v45, 4  ;;  %v1451_v57 = vmul.f32 %v5084_v23, %v5184_v6 }
  0x39   : > { %6998 = vst [vmem:[#allocation5_spill] sm:$0xff] %v5221_v46  ;;  %v2170_v58 = vand.u32 4294901760, %v5221_v46  ;;  %v1726_v59 = vadd.f32 %v1617_v48, %v1482_v49  ;;  %v859_v38 = vadd.f32 %v752_v52, %v614_v51  ;;  %v1520_v62 = vmul.f32 %v5091_v30, %v5184_v6 }
  0x3a   : > { %v1064_v63 = vsel %vm499_vm1, %v1062_v43, %v1063_v53  ;;  %v1307_v44 = vrot.slane %v5229_v55, 4  ;;  %v1521_v0 = vmul.f32 %v5091_v30, %v5186_v9  ;;  %v1764_v50 = vmul.f32 %v5118_v47, %v5184_v6 }
  0x3b   : > { %4558 = vmatprep.mubr.f32.mxu0 %v2170_v58  ;;  %v1970_v5 = vadd.f32 %v1861_v1, %v1726_v59  ;;  %v2171_v48 = vsub.f32 %v5221_v46, %v2170_v58  ;;  %v927_v8 = vadd.f32 %v895_v26, %v859_v38  ;;  %v1618_v10 = vrot.slane %v1520_v62, 2 }
  0x3c   : > { %v1308_v18 = vsel %vm744_vm0, %v1306_v56, %v1307_v44  ;;  %v1619_v19 = vrot.slane %v1521_v0, 2  ;;  %v1765_v24 = vmul.f32 %v5118_v47, %v5186_v9  ;;  %v1862_v27 = vrot.slane %v1764_v50, 4 }
  0x3d   : > { %v2007_v37 = vsel %vm2002_vm2, %v1970_v5, 0  ;;  %v2172_v39 = vand.u32 4294901760, %v2171_v48  ;;  %v1171_v41 = vadd.f32 %v1064_v63, %v927_v8  ;;  %v274_v42 = vmax.f32 %v214_v4, 0.0 }
  0x3e   : > { %v5250_v43 = vand.u32 4294901760, %v2007_v37  ;;  %v1620_v1 = vsel %vm499_vm1, %v1618_v10, %v1619_v19  ;;  %v1863_v26 = vrot.slane %v1765_v24, 4  ;;  %v5253_v45 = vmax.f32 %v220_v13, 0.0 }
  0x3f   : > { %4408 = vmatprep.mubr.f32.mxu1 %v2172_v39  ;;  %v1415_v49 = vadd.f32 %v1308_v18, %v1171_v41  ;;  %v5255_v51 = vmax.f32 %v226_v28, 0.0  ;;  %v338_v52 = vmul.f32 %v5069_v14, %v5175_v2  ;;  %v408_v55 = vmul.f32 %v5071_v15, %v274_v42  ;;  %v227_v18 = vld [vmem:[%s5067_s9 + $0x90] sm:$0xff]  ;;  %v228_v39 = vld [vmem:[%s5067_s9 + $0x98] sm:$0xff] }
  0x40   : > { %v5261_v56 = vsub.f32 %v2007_v37, %v5250_v43  ;;  %v1864_v58 = vsel %vm744_vm0, %v1862_v27, %v1863_v26  ;;  %v653_v59 = vmul.f32 %v5073_v16, %v274_v42  ;;  %v896_v38 = vmul.f32 %v5078_v20, %v5181_v61 }
  0x41   : > { %v1483_v62 = vadd.f32 %v1451_v57, %v1415_v49  ;;  %v508_v63 = vrot.slane %v408_v55, 2  ;;  %v966_v0 = vmul.f32 %v5080_v21, %v5253_v45  ;;  %v1210_v2 = vmul.f32 %v5082_v22, %v5253_v45 }
  0x42   : > { %6999 = vst [vmem:[#allocation6_spill] sm:$0xff] %v5261_v56  ;;  %v2180_v50 = vand.u32 4294901760, %v5261_v56  ;;  %v753_v4 = vrot.slane %v653_v59, 4  ;;  %v1452_v5 = vmul.f32 %v5084_v23, %v5186_v9  ;;  %v1522_v48 = vmul.f32 %v5091_v30, %v5255_v51 }
  0x43   : > { %v1727_v8 = vadd.f32 %v1620_v1, %v1483_v62  ;;  %v509_v57 = vsel %vm499_vm1, %v506_v35, %v508_v63  ;;  %v1065_v10 = vrot.slane %v966_v0, 2  ;;  %v1309_v13 = vrot.slane %v1210_v2, 4 }
  0x44   : > { %4559 = vmatmul.mubr.f32.vlgmr.msra.gmra.mrb[0].mxu0 %v2180_v50  ;;  %v2181_v24 = vsub.f32 %v5261_v56, %v2180_v50  ;;  %v615_v27 = vadd.f32 %v509_v57, %v338_v52  ;;  %v754_v28 = vsel %vm744_vm0, %v751_v40, %v753_v4  ;;  %v1621_v37 = vrot.slane %v1522_v48, 2 }
  0x45   : > { %v1971_v41 = vadd.f32 %v1864_v58, %v1727_v8  ;;  %v1066_v42 = vsel %vm499_vm1, %v1063_v53, %v1065_v10  ;;  %v1310_v17 = vsel %vm744_vm0, %v1307_v44, %v1309_v13  ;;  %v1766_v35 = vmul.f32 %v5118_v47, %v5255_v51  ;;  %4607 = vmatpush3.msra.mxu0 %v5169_v60 }
  0x46   : > { %v2182_v1 = vand.u32 4294901760, %v2181_v24  ;;  %v860_v49 = vadd.f32 %v754_v28, %v615_v27  ;;  %v1622_v52 = vsel %vm499_vm1, %v1619_v19, %v1621_v37  ;;  %v5291_v55 = vmax.f32 %v227_v18, 0.0  ;;  %4656 = vmatprep.subr.mxu0 %v5051_v3 }
  0x47   : > { %v2010_v25 = vsel %vm2002_vm2, %v1971_v41, 0  ;;  %v1865_v40 = vrot.slane %v1766_v35, 4  ;;  %v5295_v58 = vmax.f32 %v228_v39, 0.0  ;;  %v339_v53 = vmul.f32 %v5069_v14, %v5089_v29 }
  0x48   : > { %v5299_v44 = vand.u32 4294901760, %v2010_v25  ;;  %4409 = vmatmul.mubr.f32.vlgmr.msra.gmra.mrb[0].mxu1 %v2182_v1  ;;  %v928_v60 = vadd.f32 %v896_v38, %v860_v49  ;;  %v409_v59 = vmul.f32 %v5071_v15, %v5089_v29  ;;  %v5305_v19 = vmul.f32 %v5071_v15, %v5093_v31 }
  0x49   : > { %4457 = vmatpush3.msra.mxu1 %v5189_v12  ;;  %v1866_v62 = vsel %vm744_vm0, %v1863_v26, %v1865_v40  ;;  %v654_v63 = vmul.f32 %v5073_v16, %v5089_v29  ;;  %v5313_v0 = vmul.f32 %v5073_v16, %v5093_v31  ;;  %v897_v38 = vmul.f32 %v5078_v20, %v5095_v32  ;;  %v229_v40 = vld [vmem:[%s5067_s9 + $0xa0] sm:$0xf] }
  0x4a   : > { %v5318_v2 = vsub.f32 %v2010_v25, %v5299_v44  ;;  %v1172_v50 = vadd.f32 %v1066_v42, %v928_v60  ;;  %v510_v4 = vrot.slane %v409_v59, 2  ;;  %v511_v48 = vrot.slane %v5305_v19, 2  ;;  %4506 = vmatprep.subr.mxu1 %v5100_v34 }
  0x4b   : > { %v755_v12 = vrot.slane %v654_v63, 4  ;;  %v756_v26 = vrot.slane %v5313_v0, 4  ;;  %v967_v29 = vmul.f32 %v5080_v21, %v5095_v32  ;;  %v5327_v8 = vmul.f32 %v5080_v21, %v5097_v33 }
  0x4c   : > { %7000 = vst [vmem:[#allocation7_spill] sm:$0xff] %v5318_v2  ;;  %v2190_v57 = vand.u32 4294901760, %v5318_v2  ;;  %v1416_v10 = vadd.f32 %v1310_v17, %v1172_v50  ;;  %v512_v13 = vsel %vm499_vm1, %v510_v4, %v511_v48  ;;  %v1211_v18 = vmul.f32 %v5082_v22, %v5095_v32 }
  0x4d   : > { %v616_v24 = vadd.f32 %v512_v13, %v339_v53  ;;  %v757_v27 = vsel %vm744_vm0, %v755_v12, %v756_v26  ;;  %v1067_v28 = vrot.slane %v967_v29, 2  ;;  %v1068_v37 = vrot.slane %v5327_v8, 2 }
  0x4e   : > { %4561 = vmatprep.mubr.f32.mxu0 %v2190_v57  ;;  %v1484_v39 = vadd.f32 %v1452_v5, %v1416_v10  ;;  %v2191_v41 = vsub.f32 %v5318_v2, %v2190_v57  ;;  %v1212_v42 = vmul.f32 %v5082_v22, %v5097_v33  ;;  %v1311_v17 = vrot.slane %v1211_v18, 4 }
  0x4f   : > { %v861_v35 = vadd.f32 %v757_v27, %v616_v24  ;;  %v1069_v1 = vsel %vm499_vm1, %v1067_v28, %v1068_v37  ;;  %v1453_v49 = vmul.f32 %v5084_v23, %v5291_v55  ;;  %v1523_v25 = vmul.f32 %v5091_v30, %v5291_v55 }
  0x50   : > { %v1728_v53 = vadd.f32 %v1622_v52, %v1484_v39  ;;  %v2192_v60 = vand.u32 4294901760, %v2191_v41  ;;  %v1312_v59 = vrot.slane %v1212_v42, 4  ;;  %v1524_v5 = vmul.f32 %v5091_v30, %v5295_v58 }
  0x51   : > { %v929_v19 = vadd.f32 %v897_v38, %v861_v35  ;;  %v1623_v63 = vrot.slane %v1523_v25, 2  ;;  %v1767_v0 = vmul.f32 %v5118_v47, %v5291_v55  ;;  %v1768_v50 = vmul.f32 %v5118_v47, %v5295_v58 }
  0x52   : > { %v1972_v4 = vadd.f32 %v1866_v62, %v1728_v53  ;;  %4411 = vmatprep.mubr.f32.mxu1 %v2192_v60  ;;  %v1313_v12 = vsel %vm744_vm0, %v1311_v17, %v1312_v59  ;;  %v1624_v29 = vrot.slane %v1524_v5, 2  ;;  %v5351_v8 = vmax.f32 %v229_v40, 0.0  ;;  %v230_v53 = vld [vmem:[%s5067_s9 + $0xa8] sm:$0xff] }
  0x53   : > { %v1173_v52 = vadd.f32 %v1069_v1, %v929_v19  ;;  %v1867_v57 = vrot.slane %v1767_v0, 4  ;;  %v1868_v10 = vrot.slane %v1768_v50, 4  ;;  %v340_v38 = vmul.f32 %v5069_v14, %v5093_v31 }
  0x54   : > { %v2013_v13 = vsel %vm2002_vm2, %v1972_v4, 0  ;;  %v1625_v18 = vsel %vm499_vm1, %v1623_v63, %v1624_v29  ;;  %v411_v62 = vmul.f32 %v5071_v15, %v5139_v7  ;;  %v656_v24 = vmul.f32 %v5073_v16, %v5139_v7 }
  0x55   : > { %v5361_v27 = vand.u32 4294901760, %v2013_v13  ;;  %v1417_v28 = vadd.f32 %v1313_v12, %v1173_v52  ;;  %v1869_v39 = vsel %vm744_vm0, %v1867_v57, %v1868_v10  ;;  %v898_v41 = vmul.f32 %v5078_v20, %v5097_v33  ;;  %v231_v52 = vld [vmem:[%s5067_s9 + $0xb0] sm:$0xff] }
  0x56   : > { %v513_v31 = vrot.slane %v411_v62, 2  ;;  %v758_v42 = vrot.slane %v656_v24, 4  ;;  %v969_v17 = vmul.f32 %v5080_v21, %v5141_v11  ;;  %v1213_v35 = vmul.f32 %v5082_v22, %v5141_v11 }
  0x57   : > { %v5371_v1 = vsub.f32 %v2013_v13, %v5361_v27  ;;  %v1485_v7 = vadd.f32 %v1453_v49, %v1417_v28  ;;  %v1454_v25 = vmul.f32 %v5084_v23, %v5295_v58  ;;  %v1525_v40 = vmul.f32 %v5091_v30, %v5351_v8 }
  0x58   : > { %v514_v60 = vsel %vm499_vm1, %v511_v48, %v513_v31  ;;  %v759_v5 = vsel %vm744_vm0, %v756_v26, %v758_v42  ;;  %v1070_v19 = vrot.slane %v969_v17, 2  ;;  %v1314_v63 = vrot.slane %v1213_v35, 4 }
  0x59   : > { %7001 = vst [vmem:[#allocation8_spill] sm:$0xff] %v5371_v1  ;;  %v2200_v0 = vand.u32 4294901760, %v5371_v1  ;;  %v1729_v50 = vadd.f32 %v1625_v18, %v1485_v7  ;;  %v617_v4 = vadd.f32 %v514_v60, %v340_v38  ;;  %v1626_v12 = vrot.slane %v1525_v40, 2 }
  0x5a   : > { %v1071_v49 = vsel %vm499_vm1, %v1068_v37, %v1070_v19  ;;  %v1315_v57 = vsel %vm744_vm0, %v1312_v59, %v1314_v63  ;;  %v1769_v13 = vmul.f32 %v5118_v47, %v5351_v8  ;;  %v5386_v62 = vmax.f32 %v230_v53, 0.0 }
  0x5b   : > { %4562 = vmatmul.mubr.f32.gmra.mrb[2].mxu0 %v2200_v0  ;;  %v1973_v48 = vadd.f32 %v1869_v39, %v1729_v50  ;;  %v2201_v26 = vsub.f32 %v5371_v1, %v2200_v0  ;;  %v862_v24 = vadd.f32 %v759_v5, %v617_v4  ;;  %v1627_v28 = vsel %vm499_vm1, %v1624_v29, %v1626_v12 }
  0x5c   : > { %v1870_v18 = vrot.slane %v1769_v13, 4  ;;  %v5390_v38 = vmax.f32 %v231_v52, 0.0  ;;  %v341_v37 = vmul.f32 %v5069_v14, %v5179_v54  ;;  %v412_v59 = vmul.f32 %v5071_v15, %v5179_v54 }
  0x5d   : > { %v2016_v31 = vsel %vm2002_vm2, %v1973_v48, 0  ;;  %v2202_v42 = vand.u32 4294901760, %v2201_v26  ;;  %v930_v17 = vadd.f32 %v898_v41, %v862_v24  ;;  %v5399_v39 = vmul.f32 %v5071_v15, %v5181_v61 }
  0x5e   : > { %v5401_v35 = vand.u32 4294901760, %v2016_v31  ;;  %v1871_v29 = vsel %vm744_vm0, %v1868_v10, %v1870_v18  ;;  %v515_v7 = vrot.slane %v412_v59, 2  ;;  %v657_v40 = vmul.f32 %v5073_v16, %v5179_v54 }
  0x5f   : > { %4412 = vmatmul.mubr.f32.gmra.mrb[2].mxu1 %v2202_v42  ;;  %v1174_v53 = vadd.f32 %v1071_v49, %v930_v17  ;;  %v516_v60 = vrot.slane %v5399_v39, 2  ;;  %v5409_v5 = vmul.f32 %v5073_v16, %v5181_v61  ;;  %v899_v41 = vmul.f32 %v5078_v20, %v5184_v6 }
  0x60   : > { %v5414_v19 = vsub.f32 %v2016_v31, %v5401_v35  ;;  %v760_v63 = vrot.slane %v657_v40, 4  ;;  %v970_v10 = vmul.f32 %v5080_v21, %v5184_v6  ;;  %v5420_v54 = vmul.f32 %v5080_v21, %v5186_v9  ;;  %v232_v40 = vld [vmem:[%s5067_s9 + $0xb8] sm:$0xf] }
  0x61   : > { %v1418_v0 = vadd.f32 %v1315_v57, %v1174_v53  ;;  %v517_v50 = vsel %vm499_vm1, %v515_v7, %v516_v60  ;;  %v761_v4 = vrot.slane %v5409_v5, 4  ;;  %v1214_v12 = vmul.f32 %v5082_v22, %v5184_v6 }
  0x62   : > { %7002 = vst [vmem:[#allocation9_spill] sm:$0xff] %v5414_v19  ;;  %v2210_v52 = vand.u32 4294901760, %v5414_v19  ;;  %v618_v49 = vadd.f32 %v517_v50, %v341_v37  ;;  %v1072_v13 = vrot.slane %v970_v10, 2  ;;  %v1073_v48 = vrot.slane %v5420_v54, 2 }
  0x63   : > { %v1486_v26 = vadd.f32 %v1454_v25, %v1418_v0  ;;  %v762_v24 = vsel %vm744_vm0, %v760_v63, %v761_v4  ;;  %v1215_v57 = vmul.f32 %v5082_v22, %v5186_v9  ;;  %v1316_v18 = vrot.slane %v1214_v12, 4 }
  0x64   : > { %4564 = vmatprep.mubr.f32.mxu0 %v2210_v52  ;;  %v2211_v59 = vsub.f32 %v5414_v19, %v2210_v52  ;;  %v863_v31 = vadd.f32 %v762_v24, %v618_v49  ;;  %v1074_v42 = vsel %vm499_vm1, %v1072_v13, %v1073_v48  ;;  %v1455_v37 = vmul.f32 %v5084_v23, %v5386_v62 }
  0x65   : > { %v1730_v17 = vadd.f32 %v1627_v28, %v1486_v26  ;;  %v1317_v39 = vrot.slane %v1215_v57, 4  ;;  %v1526_v25 = vmul.f32 %v5091_v30, %v5386_v62  ;;  %v1527_v7 = vmul.f32 %v5091_v30, %v5390_v38 }
  0x66   : > { %v2212_v53 = vand.u32 4294901760, %v2211_v59  ;;  %v931_v5 = vadd.f32 %v899_v41, %v863_v31  ;;  %v1770_v63 = vmul.f32 %v5118_v47, %v5386_v62  ;;  %v1771_v10 = vmul.f32 %v5118_v47, %v5390_v38 }
  0x67   : > { %v1974_v54 = vadd.f32 %v1871_v29, %v1730_v17  ;;  %v1318_v0 = vsel %vm744_vm0, %v1316_v18, %v1317_v39  ;;  %v1628_v28 = vrot.slane %v1526_v25, 2  ;;  %v1629_v50 = vrot.slane %v1527_v7, 2 }
  0x68   : > { %4414 = vmatprep.mubr.f32.mxu1 %v2212_v53  ;;  %v1175_v12 = vadd.f32 %v1074_v42, %v931_v5  ;;  %v1872_v52 = vrot.slane %v1770_v63, 4  ;;  %v1873_v49 = vrot.slane %v1771_v10, 4  ;;  %v5445_v13 = vmax.f32 %v232_v40, 0.0 }
  0x69   : > { %v2019_v26 = vsel %vm2002_vm2, %v1974_v54, 0  ;;  %v1630_v41 = vsel %vm499_vm1, %v1628_v28, %v1629_v50  ;;  %v342_v24 = vmul.f32 %v5069_v14, %v5181_v61  ;;  %v414_v29 = vmul.f32 %v5071_v15, %v5253_v45 }
  0x6a   : > { %v5453_v57 = vand.u32 4294901760, %v2019_v26  ;;  %v1419_v18 = vadd.f32 %v1318_v0, %v1175_v12  ;;  %v1874_v59 = vsel %vm744_vm0, %v1872_v52, %v1873_v49  ;;  %v659_v31 = vmul.f32 %v5073_v16, %v5253_v45  ;;  %v233_v0 = vld [vmem:[%s5067_s9 + $0xc0] sm:$0xff] }
  0x6b   : > { %v518_v42 = vrot.slane %v414_v29, 2  ;;  %v900_v17 = vmul.f32 %v5078_v20, %v5186_v9  ;;  %v972_v61 = vmul.f32 %v5080_v21, %v5255_v51  ;;  %v1216_v25 = vmul.f32 %v5082_v22, %v5255_v51  ;;  %v234_v29 = vld [vmem:[%s5067_s9 + $0xc8] sm:$0xff] }
  0x6c   : > { %v5465_v7 = vsub.f32 %v2019_v26, %v5453_v57  ;;  %v1487_v40 = vadd.f32 %v1455_v37, %v1419_v18  ;;  %v763_v53 = vrot.slane %v659_v31, 4  ;;  %v1456_v5 = vmul.f32 %v5084_v23, %v5390_v38 }
  0x6d   : > { %v519_v45 = vsel %vm499_vm1, %v516_v60, %v518_v42  ;;  %v1075_v63 = vrot.slane %v972_v61, 2  ;;  %v1319_v10 = vrot.slane %v1216_v25, 4  ;;  %v1528_v54 = vmul.f32 %v5091_v30, %v5445_v13 }
  0x6e   : > { %7003 = vst [vmem:[#allocation10_spill] sm:$0xff] %v5465_v7  ;;  %v2220_v28 = vand.u32 4294901760, %v5465_v7  ;;  %v1731_v12 = vadd.f32 %v1630_v41, %v1487_v40  ;;  %v619_v52 = vadd.f32 %v519_v45, %v342_v24  ;;  %v764_v26 = vsel %vm744_vm0, %v761_v4, %v763_v53 }
  0x6f   : > { %v1076_v37 = vsel %vm499_vm1, %v1073_v48, %v1075_v63  ;;  %v1320_v18 = vsel %vm744_vm0, %v1317_v39, %v1319_v10  ;;  %v1631_v31 = vrot.slane %v1528_v54, 2  ;;  %v1772_v60 = vmul.f32 %v5118_v47, %v5445_v13 }
  0x70   : > { %4565 = vmatmul.mubr.f32.gmra.mrb[4].mxu0 %v2220_v28  ;;  %v1975_v42 = vadd.f32 %v1874_v59, %v1731_v12  ;;  %v2221_v61 = vsub.f32 %v5465_v7, %v2220_v28  ;;  %v864_v25 = vadd.f32 %v764_v26, %v619_v52  ;;  %v5481_v19 = vmax.f32 %v233_v0, 0.0 }
  0x71   : > { %v1632_v41 = vsel %vm499_vm1, %v1629_v50, %v1631_v31  ;;  %v1875_v24 = vrot.slane %v1772_v60, 4  ;;  %v5484_v4 = vmax.f32 %v234_v29, 0.0  ;;  %v343_v48 = vmul.f32 %v5069_v14, %v5095_v32 }
  0x72   : > { %v2022_v39 = vsel %vm2002_vm2, %v1975_v42, 0  ;;  %v2222_v40 = vand.u32 4294901760, %v2221_v61  ;;  %v932_v53 = vadd.f32 %v900_v17, %v864_v25  ;;  %v415_v59 = vmul.f32 %v5071_v15, %v5095_v32 }
  0x73   : > { %v5491_v45 = vand.u32 4294901760, %v2022_v39  ;;  %v1876_v63 = vsel %vm744_vm0, %v1873_v49, %v1875_v24  ;;  %v5496_v50 = vmul.f32 %v5071_v15, %v5097_v33  ;;  %v660_v10 = vmul.f32 %v5073_v16, %v5095_v32 }
  0x74   : > { %4415 = vmatmul.mubr.f32.gmra.mrb[4].mxu1 %v2222_v40  ;;  %v1176_v54 = vadd.f32 %v1076_v37, %v932_v53  ;;  %v520_v0 = vrot.slane %v415_v59, 2  ;;  %v5502_v17 = vmul.f32 %v5073_v16, %v5097_v33  ;;  %v901_v28 = vmul.f32 %v5078_v20, %v5291_v55 }
  0x75   : > { %v5507_v12 = vsub.f32 %v2022_v39, %v5491_v45  ;;  %v521_v49 = vrot.slane %v5496_v50, 2  ;;  %v765_v52 = vrot.slane %v660_v10, 4  ;;  %v973_v26 = vmul.f32 %v5080_v21, %v5291_v55 }
  0x76   : > { %v1420_v32 = vadd.f32 %v1320_v18, %v1176_v54  ;;  %v766_v29 = vrot.slane %v5502_v17, 4  ;;  %v974_v37 = vmul.f32 %v5080_v21, %v5295_v58  ;;  %v1217_v31 = vmul.f32 %v5082_v22, %v5291_v55 }
  0x77   : > { %7004 = vst [vmem:[#allocation11_spill] sm:$0xff] %v5507_v12  ;;  %v2230_v60 = vand.u32 4294901760, %v5507_v12  ;;  %v522_v42 = vsel %vm499_vm1, %v520_v0, %v521_v49  ;;  %v1077_v61 = vrot.slane %v973_v26, 2  ;;  %v5521_v25 = vmul.f32 %v5082_v22, %v5295_v58 }
  0x78   : > { %v1488_v24 = vadd.f32 %v1456_v5, %v1420_v32  ;;  %v620_v18 = vadd.f32 %v522_v42, %v343_v48  ;;  %v767_v39 = vsel %vm744_vm0, %v765_v52, %v766_v29  ;;  %v1078_v40 = vrot.slane %v974_v37, 2  ;;  %v235_v48 = vld [vmem:[%s5067_s9 + $0xd0] sm:$0xf] }
  0x79   : > { %4567 = vmatprep.mubr.f32.mxu0 %v2230_v60  ;;  %v2231_v53 = vsub.f32 %v5507_v12, %v2230_v60  ;;  %v1321_v59 = vrot.slane %v1217_v31, 4  ;;  %v1322_v50 = vrot.slane %v5521_v25, 4  ;;  %v1457_v10 = vmul.f32 %v5084_v23, %v5481_v19  ;;  %v237_v12 = vld [vmem:[%s5067_s9 + $0xe0] sm:$0xff] }
  0x7a   : > { %v1732_v54 = vadd.f32 %v1632_v41, %v1488_v24  ;;  %v865_v0 = vadd.f32 %v767_v39, %v620_v18  ;;  %v1079_v17 = vsel %vm499_vm1, %v1077_v61, %v1078_v40  ;;  %v1529_v5 = vmul.f32 %v5091_v30, %v5481_v19 }
  0x7b   : > { %v2232_v26 = vand.u32 4294901760, %v2231_v53  ;;  %v1323_v52 = vsel %vm744_vm0, %v1321_v59, %v1322_v50  ;;  %v1530_v32 = vmul.f32 %v5091_v30, %v5484_v4  ;;  %v1773_v37 = vmul.f32 %v5118_v47, %v5481_v19 }
  0x7c   : > { %v1976_v31 = vadd.f32 %v1876_v63, %v1732_v54  ;;  %v933_v60 = vadd.f32 %v901_v28, %v865_v0  ;;  %v1633_v42 = vrot.slane %v1529_v5, 2  ;;  %v1774_v41 = vmul.f32 %v5118_v47, %v5484_v4 }
  0x7d   : > { %4417 = vmatprep.mubr.f32.mxu1 %v2232_v26  ;;  %v1634_v61 = vrot.slane %v1530_v32, 2  ;;  %v1877_v25 = vrot.slane %v1773_v37, 4  ;;  %v5539_v24 = vmax.f32 %v235_v48, 0.0  ;;  %v344_v18 = vmul.f32 %v5069_v14, %v5097_v33 }
  0x7e   : > { %v2025_v39 = vsel %vm2002_vm2, %v1976_v31, 0  ;;  %v1177_v53 = vadd.f32 %v1079_v17, %v933_v60  ;;  %v1878_v59 = vrot.slane %v1774_v41, 4  ;;  %v417_v63 = vmul.f32 %v5071_v15, %v5141_v11 }
  0x7f   : > { %v5546_v28 = vand.u32 4294901760, %v2025_v39  ;;  %v1635_v54 = vsel %vm499_vm1, %v1633_v42, %v1634_v61  ;;  %v662_v0 = vmul.f32 %v5073_v16, %v5141_v11  ;;  %v902_v5 = vmul.f32 %v5078_v20, %v5295_v58 }
  0x80   : > { %v1421_v48 = vadd.f32 %v1323_v52, %v1177_v53  ;;  %v1879_v33 = vsel %vm744_vm0, %v1877_v25, %v1878_v59  ;;  %v523_v17 = vrot.slane %v417_v63, 2  ;;  %v975_v26 = vmul.f32 %v5080_v21, %v5351_v8  ;;  %v236_v25 = vld [vmem:[%s5067_s9 + $0xd8] sm:$0xff] }
  0x81   : > { %v5557_v32 = vsub.f32 %v2025_v39, %v5546_v28  ;;  %v768_v37 = vrot.slane %v662_v0, 4  ;;  %v1219_v31 = vmul.f32 %v5082_v22, %v5351_v8  ;;  %v1458_v11 = vmul.f32 %v5084_v23, %v5484_v4 }
  0x82   : > { %v1489_v60 = vadd.f32 %v1457_v10, %v1421_v48  ;;  %v524_v52 = vsel %vm499_vm1, %v521_v49, %v523_v17  ;;  %v1080_v42 = vrot.slane %v975_v26, 2  ;;  %v1531_v41 = vmul.f32 %v5091_v30, %v5539_v24 }
  0x83   : > { %7005 = vst [vmem:[#allocation12_spill] sm:$0xff] %v5557_v32  ;;  %v2240_v53 = vand.u32 4294901760, %v5557_v32  ;;  %v621_v63 = vadd.f32 %v524_v52, %v344_v18  ;;  %v769_v39 = vsel %vm744_vm0, %v766_v29, %v768_v37  ;;  %v1324_v0 = vrot.slane %v1219_v31, 4 }
  0x84   : > { %v1733_v7 = vadd.f32 %v1635_v54, %v1489_v60  ;;  %v1081_v1 = vsel %vm499_vm1, %v1078_v40, %v1080_v42  ;;  %v1636_v2 = vrot.slane %v1531_v41, 2  ;;  %v1775_v10 = vmul.f32 %v5118_v47, %v5539_v24 }
  0x85   : > { %4568 = vmatmul.mubr.f32.gmra.mrb[6].mxu0 %v2240_v53  ;;  %v2241_v49 = vsub.f32 %v5557_v32, %v2240_v53  ;;  %v866_v48 = vadd.f32 %v769_v39, %v621_v63  ;;  %v1325_v17 = vsel %vm744_vm0, %v1322_v50, %v1324_v0  ;;  %v5575_v26 = vmax.f32 %v236_v25, 0.0 }
  0x86   : > { %v1977_v18 = vadd.f32 %v1879_v33, %v1733_v7  ;;  %v1637_v29 = vsel %vm499_vm1, %v1634_v61, %v1636_v2  ;;  %v1880_v37 = vrot.slane %v1775_v10, 4  ;;  %v5578_v31 = vmax.f32 %v237_v12, 0.0 }
  0x87   : > { %v2242_v54 = vand.u32 4294901760, %v2241_v49  ;;  %v934_v40 = vadd.f32 %v902_v5, %v866_v48  ;;  %v345_v60 = vmul.f32 %v5069_v14, %v5184_v6  ;;  %v418_v52 = vmul.f32 %v5071_v15, %v5184_v6 }
  0x88   : > { %v2028_v42 = vsel %vm2002_vm2, %v1977_v18, 0  ;;  %v1881_v50 = vsel %vm744_vm0, %v1878_v59, %v1880_v37  ;;  %v5588_v7 = vmul.f32 %v5071_v15, %v5186_v9  ;;  %v663_v2 = vmul.f32 %v5073_v16, %v5184_v6 }
  0x89   : > { %v5592_v12 = vand.u32 4294901760, %v2028_v42  ;;  %4418 = vmatmul.mubr.f32.gmra.mrb[6].mxu1 %v2242_v54  ;;  %v1178_v61 = vadd.f32 %v1081_v1, %v934_v40  ;;  %v525_v5 = vrot.slane %v418_v52, 2  ;;  %v5596_v33 = vmul.f32 %v5073_v16, %v5186_v9 }
  0x8a   : > { %v526_v41 = vrot.slane %v5588_v7, 2  ;;  %v770_v25 = vrot.slane %v663_v2, 4  ;;  %v903_v59 = vmul.f32 %v5078_v20, %v5386_v62  ;;  %v976_v53 = vmul.f32 %v5080_v21, %v5386_v62 }
  0x8b   : > { %v5604_v6 = vsub.f32 %v2028_v42, %v5592_v12  ;;  %v1422_v63 = vadd.f32 %v1325_v17, %v1178_v61  ;;  %v771_v1 = vrot.slane %v5596_v33, 4  ;;  %v977_v39 = vmul.f32 %v5080_v21, %v5390_v38 }
  0x8c   : > { %v527_v0 = vsel %vm499_vm1, %v525_v5, %v526_v41  ;;  %v1082_v10 = vrot.slane %v976_v53, 2  ;;  %v1220_v49 = vmul.f32 %v5082_v22, %v5386_v62  ;;  %v5614_v48 = vmul.f32 %v5082_v22, %v5390_v38  ;;  %v238_v53 = vld [vmem:[%s5067_s9 + $0xe8] sm:$0xf] }
  0x8d   : > { %7006 = vst [vmem:[#allocation13_spill] sm:$0xff] %v5604_v6  ;;  %v2250_v18 = vand.u32 4294901760, %v5604_v6  ;;  %v1490_v37 = vadd.f32 %v1458_v11, %v1422_v63  ;;  %v622_v17 = vadd.f32 %v527_v0, %v345_v60  ;;  %v772_v54 = vsel %vm744_vm0, %v770_v25, %v771_v1 }
  0x8e   : > { %v1083_v40 = vrot.slane %v977_v39, 2  ;;  %v1326_v52 = vrot.slane %v1220_v49, 4  ;;  %v1327_v42 = vrot.slane %v5614_v48, 4  ;;  %v1459_v7 = vmul.f32 %v5084_v23, %v5575_v26 }
  0x8f   : > { %4570 = vmatprep.mubr.f32.mxu0 %v2250_v18  ;;  %v1734_v2 = vadd.f32 %v1637_v29, %v1490_v37  ;;  %v2251_v61 = vsub.f32 %v5604_v6, %v2250_v18  ;;  %v867_v5 = vadd.f32 %v772_v54, %v622_v17  ;;  %v1532_v33 = vmul.f32 %v5091_v30, %v5575_v26  ;;  %v240_v6 = vld [vmem:[%s5067_s9 + $0xf8] sm:$0xff] }
  0x90   : > { %v1084_v11 = vsel %vm499_vm1, %v1082_v10, %v1083_v40  ;;  %v1328_v60 = vsel %vm744_vm0, %v1326_v52, %v1327_v42  ;;  %v1533_v25 = vmul.f32 %v5091_v30, %v5578_v31  ;;  %v1776_v63 = vmul.f32 %v5118_v47, %v5575_v26 }
  0x91   : > { %v1978_v39 = vadd.f32 %v1881_v50, %v1734_v2  ;;  %v2252_v0 = vand.u32 4294901760, %v2251_v61  ;;  %v935_v29 = vadd.f32 %v903_v59, %v867_v5  ;;  %v1638_v49 = vrot.slane %v1532_v33, 2 }
  0x92   : > { %v1639_v48 = vrot.slane %v1533_v25, 2  ;;  %v1777_v18 = vmul.f32 %v5118_v47, %v5578_v31  ;;  %v1882_v37 = vrot.slane %v1776_v63, 4  ;;  %v5633_v17 = vmax.f32 %v238_v53, 0.0 }
  0x93   : > { %v2031_v10 = vsel %vm2002_vm2, %v1978_v39, 0  ;;  %4420 = vmatprep.mubr.f32.mxu1 %v2252_v0  ;;  %v1179_v54 = vadd.f32 %v1084_v11, %v935_v29  ;;  %v346_v52 = vmul.f32 %v5069_v14, %v5186_v9  ;;  %v420_v50 = vmul.f32 %v5071_v15, %v5255_v51 }
  0x94   : > { %v5640_v2 = vand.u32 4294901760, %v2031_v10  ;;  %v1640_v59 = vsel %vm499_vm1, %v1638_v49, %v1639_v48  ;;  %v1883_v61 = vrot.slane %v1777_v18, 4  ;;  %v665_v47 = vmul.f32 %v5073_v16, %v5255_v51  ;;  %v239_v49 = vld [vmem:[%s5067_s9 + $0xf0] sm:$0xff] }
  0x95   : > { %v1423_v5 = vadd.f32 %v1328_v60, %v1179_v54  ;;  %v528_v33 = vrot.slane %v420_v50, 2  ;;  %v904_v53 = vmul.f32 %v5078_v20, %v5390_v38  ;;  %v978_v9 = vmul.f32 %v5080_v21, %v5445_v13 }
  0x96   : > { %7007 = vst [vmem:[#allocation14_spill] sm:$0xff] %v5640_v2  ;;  %v5650_v11 = vsub.f32 %v2031_v10, %v5640_v2  ;;  %v1884_v25 = vsel %vm744_vm0, %v1882_v37, %v1883_v61  ;;  %v773_v63 = vrot.slane %v665_v47, 4  ;;  %v1222_v39 = vmul.f32 %v5082_v22, %v5445_v13 }
  0x97   : > { %v1491_v0 = vadd.f32 %v1459_v7, %v1423_v5  ;;  %v529_v51 = vsel %vm499_vm1, %v526_v41, %v528_v33  ;;  %v1085_v60 = vrot.slane %v978_v9, 2  ;;  %v1460_v29 = vmul.f32 %v5084_v23, %v5578_v31  ;;  %v5668_v41 = vld [vmem:[%s6934_s1 + $0x8] ss:$0 sm:$0xff] }
  0x98   : > { %7008 = vst [vmem:[#allocation15_spill] sm:$0xff] %v5650_v11  ;;  %v2260_v18 = vand.u32 4294901760, %v5650_v11  ;;  %v623_v54 = vadd.f32 %v529_v51, %v346_v52  ;;  %v774_v10 = vsel %vm744_vm0, %v771_v1, %v773_v63  ;;  %v1329_v50 = vrot.slane %v1222_v39, 4 }
  0x99   : > { %v1735_v37 = vadd.f32 %v1640_v59, %v1491_v0  ;;  %v1086_v47 = vsel %vm499_vm1, %v1083_v40, %v1085_v60  ;;  %v1534_v7 = vmul.f32 %v5091_v30, %v5633_v17  ;;  %v1778_v5 = vmul.f32 %v5668_v41, %v5633_v17 }
  0x9a   : > { %4571 = vmatmul.mubr.f32.gmra.mrb[8].mxu0 %v2260_v18  ;;  %v2261_v52 = vsub.f32 %v5650_v11, %v2260_v18  ;;  %v868_v1 = vadd.f32 %v774_v10, %v623_v54  ;;  %v1330_v33 = vsel %vm744_vm0, %v1327_v42, %v1329_v50  ;;  %v5674_v59 = vmax.f32 %v239_v49, 0.0 }
  0x9b   : > { %v1979_v40 = vadd.f32 %v1884_v25, %v1735_v37  ;;  %v1641_v9 = vrot.slane %v1534_v7, 2  ;;  %v1885_v63 = vrot.slane %v1778_v5, 4  ;;  %v5676_v39 = vmax.f32 %v240_v6, 0.0 }
  0x9c   : > { %v2262_v0 = vand.u32 4294901760, %v2261_v52  ;;  %v936_v51 = vadd.f32 %v904_v53, %v868_v1  ;;  %v347_v60 = vmul.f32 %v5069_v14, %v5291_v55  ;;  %v421_v32 = vmul.f32 %v5071_v15, %v5291_v55 }
  0x9d   : > { %v2034_v18 = vsel %vm2002_vm2, %v1979_v40, 0  ;;  %v1642_v54 = vsel %vm499_vm1, %v1639_v48, %v1641_v9  ;;  %v1886_v42 = vsel %vm744_vm0, %v1883_v61, %v1885_v63  ;;  %v5687_v25 = vmul.f32 %v5071_v15, %v5295_v58 }
  0x9e   : > { %v5689_v6 = vand.u32 4294901760, %v2034_v18  ;;  %4421 = vmatmul.mubr.f32.gmra.mrb[8].mxu1 %v2262_v0  ;;  %v1180_v53 = vadd.f32 %v1086_v47, %v936_v51  ;;  %v530_v49 = vrot.slane %v421_v32, 2  ;;  %v666_v10 = vmul.f32 %v5073_v16, %v5291_v55 }
  0x9f   : > { %v531_v50 = vrot.slane %v5687_v25, 2  ;;  %v5696_v37 = vmul.f32 %v5073_v16, %v5295_v58  ;;  %v905_v48 = vmul.f32 %v5078_v20, %v5481_v19  ;;  %v979_v61 = vmul.f32 %v5080_v21, %v5481_v19 }
  0xa0   : > { %7009 = vst [vmem:[#allocation16_spill] sm:$0xff] %v5689_v6  ;;  %v5703_v7 = vsub.f32 %v2034_v18, %v5689_v6  ;;  %v1424_v47 = vadd.f32 %v1330_v33, %v1180_v53  ;;  %v775_v32 = vrot.slane %v666_v10, 4  ;;  %v5707_v55 = vmul.f32 %v5080_v21, %v5484_v4 }
  0xa1   : > { %v532_v5 = vsel %vm499_vm1, %v530_v49, %v531_v50  ;;  %v776_v52 = vrot.slane %v5696_v37, 4  ;;  %v1087_v1 = vrot.slane %v979_v61, 2  ;;  %v1223_v40 = vmul.f32 %v5082_v22, %v5481_v19 }
  0xa2   : > { %7010 = vst [vmem:[#allocation17_spill] sm:$0xff] %v5703_v7  ;;  %v2270_v9 = vand.u32 4294901760, %v5703_v7  ;;  %v1492_v63 = vadd.f32 %v1460_v29, %v1424_v47  ;;  %v624_v0 = vadd.f32 %v532_v5, %v347_v60  ;;  %v1088_v33 = vrot.slane %v5707_v55, 2  ;;  %v241_v55 = vld [vmem:[%s5067_s9 + $0x100] sm:$0xf] }
  0xa3   : > { %v777_v51 = vsel %vm744_vm0, %v775_v32, %v776_v52  ;;  %v1224_v18 = vmul.f32 %v5082_v22, %v5484_v4  ;;  %v1331_v25 = vrot.slane %v1223_v40, 4  ;;  %v1461_v53 = vmul.f32 %v5084_v23, %v5674_v59 }
  0xa4   : > { %4573 = vmatprep.mubr.f32.mxu0 %v2270_v9  ;;  %v1736_v49 = vadd.f32 %v1642_v54, %v1492_v63  ;;  %v2271_v10 = vsub.f32 %v5703_v7, %v2270_v9  ;;  %v869_v37 = vadd.f32 %v777_v51, %v624_v0  ;;  %v1089_v29 = vsel %vm499_vm1, %v1087_v1, %v1088_v33 }
  0xa5   : > { %v1332_v61 = vrot.slane %v1224_v18, 4  ;;  %v1535_v60 = vmul.f32 %v5091_v30, %v5674_v59  ;;  %v1536_v47 = vmul.f32 %v5091_v30, %v5676_v39  ;;  %v1779_v32 = vmul.f32 %v5668_v41, %v5674_v59 }
  0xa6   : > { %v1980_v5 = vadd.f32 %v1886_v42, %v1736_v49  ;;  %v2272_v40 = vand.u32 4294901760, %v2271_v10  ;;  %v937_v11 = vadd.f32 %v905_v48, %v869_v37  ;;  %v1780_v54 = vmul.f32 %v5668_v41, %v5676_v39 }
  0xa7   : > { %v1333_v9 = vsel %vm744_vm0, %v1331_v25, %v1332_v61  ;;  %v1643_v1 = vrot.slane %v1535_v60, 2  ;;  %v1644_v63 = vrot.slane %v1536_v47, 2  ;;  %v1887_v0 = vrot.slane %v1779_v32, 4 }
  0xa8   : > { %v2037_v51 = vsel %vm2002_vm2, %v1980_v5, 0  ;;  %4423 = vmatprep.mubr.f32.mxu1 %v2272_v40  ;;  %v1181_v18 = vadd.f32 %v1089_v29, %v937_v11  ;;  %v1888_v7 = vrot.slane %v1780_v54, 4  ;;  %v5733_v56 = vmax.f32 %v241_v55, 0.0 }
  0xa9   : > { %v5735_v46 = vand.u32 4294901760, %v2037_v51  ;;  %v1645_v42 = vsel %vm499_vm1, %v1643_v1, %v1644_v63  ;;  %v348_v48 = vmul.f32 %v5069_v14, %v5295_v58  ;;  %v423_v25 = vmul.f32 %v5071_v15, %v5351_v8 }
  0xaa   : > { %v1425_v49 = vadd.f32 %v1333_v9, %v1181_v18  ;;  %v1889_v10 = vsel %vm744_vm0, %v1887_v0, %v1888_v7  ;;  %v668_v11 = vmul.f32 %v5073_v16, %v5351_v8  ;;  %v906_v37 = vmul.f32 %v5078_v20, %v5484_v4  ;;  %v242_v0 = vld [vmem:[%s5067_s9 + $0x108] sm:$0xff] }
  0xab   : > { %7011 = vst [vmem:[#allocation18_spill] sm:$0xff] %v5735_v46  ;;  %v5748_v29 = vsub.f32 %v2037_v51, %v5735_v46  ;;  %v533_v60 = vrot.slane %v423_v25, 2  ;;  %v981_v58 = vmul.f32 %v5080_v21, %v5539_v24  ;;  %v1225_v47 = vmul.f32 %v5082_v22, %v5539_v24 }
  0xac   : > { %v1493_v32 = vadd.f32 %v1461_v53, %v1425_v49  ;;  %v778_v55 = vrot.slane %v668_v11, 4  ;;  %v1462_v5 = vmul.f32 %v5084_v23, %v5676_v39  ;;  %v1537_v8 = vmul.f32 %v5091_v30, %v5733_v56  ;;  %v243_v53 = vld [vmem:[%s5067_s9 + $0x110] sm:$0xff] }
  0xad   : > { %7012 = vst [vmem:[#allocation19_spill] sm:$0xff] %v5748_v29  ;;  %v2280_v40 = vand.u32 4294901760, %v5748_v29  ;;  %v534_v54 = vsel %vm499_vm1, %v531_v50, %v533_v60  ;;  %v1090_v9 = vrot.slane %v981_v58, 2  ;;  %v1334_v1 = vrot.slane %v1225_v47, 4 }
  0xae   : > { %v1737_v51 = vadd.f32 %v1645_v42, %v1493_v32  ;;  %v625_v18 = vadd.f32 %v534_v54, %v348_v48  ;;  %v779_v25 = vsel %vm744_vm0, %v776_v52, %v778_v55  ;;  %v1646_v46 = vrot.slane %v1537_v8, 2 }
  0xaf   : > { %4574 = vmatmul.mubr.f32.gmra.mrb[10].mxu0 %v2280_v40  ;;  %v2281_v49 = vsub.f32 %v5748_v29, %v2280_v40  ;;  %v1091_v11 = vsel %vm499_vm1, %v1088_v33, %v1090_v9  ;;  %v1335_v6 = vsel %vm744_vm0, %v1332_v61, %v1334_v1  ;;  %v1781_v2 = vmul.f32 %v5668_v41, %v5733_v56  ;;  %v246_v29 = vld [vmem:[%s5067_s9 + $0x128] sm:$0xff] }
  0xb0   : > { %v1981_v50 = vadd.f32 %v1889_v10, %v1737_v51  ;;  %v870_v60 = vadd.f32 %v779_v25, %v625_v18  ;;  %v1647_v58 = vsel %vm499_vm1, %v1644_v63, %v1646_v46  ;;  %v5769_v42 = vmax.f32 %v242_v0, 0.0 }
  0xb1   : > { %v2282_v48 = vand.u32 4294901760, %v2281_v49  ;;  %v1890_v52 = vrot.slane %v1781_v2, 4  ;;  %v5771_v47 = vmax.f32 %v243_v53, 0.0  ;;  %v349_v32 = vmul.f32 %v5069_v14, %v5386_v62 }
  0xb2   : > { %v2040_v33 = vsel %vm2002_vm2, %v1981_v50, 0  ;;  %v938_v55 = vadd.f32 %v906_v37, %v870_v60  ;;  %v424_v61 = vmul.f32 %v5071_v15, %v5386_v62  ;;  %v5780_v10 = vmul.f32 %v5071_v15, %v5390_v38 }
  0xb3   : > { %v5782_v46 = vand.u32 4294901760, %v2040_v33  ;;  %4424 = vmatmul.mubr.f32.gmra.mrb[10].mxu1 %v2282_v48  ;;  %v1891_v2 = vsel %vm744_vm0, %v1888_v7, %v1890_v52  ;;  %v669_v63 = vmul.f32 %v5073_v16, %v5386_v62  ;;  %v5789_v8 = vmul.f32 %v5073_v16, %v5390_v38 }
  0xb4   : > { %v1182_v37 = vadd.f32 %v1091_v11, %v938_v55  ;;  %v535_v40 = vrot.slane %v424_v61, 2  ;;  %v536_v54 = vrot.slane %v5780_v10, 2  ;;  %v907_v9 = vmul.f32 %v5078_v20, %v5575_v26 }
  0xb5   : > { %7013 = vst [vmem:[#allocation20_spill] sm:$0xff] %v5782_v46  ;;  %v5795_v1 = vsub.f32 %v2040_v33, %v5782_v46  ;;  %v780_v0 = vrot.slane %v669_v63, 4  ;;  %v781_v7 = vrot.slane %v5789_v8, 4  ;;  %v982_v62 = vmul.f32 %v5080_v21, %v5575_v26 }
  0xb6   : > { %v1426_v51 = vadd.f32 %v1335_v6, %v1182_v37  ;;  %v537_v18 = vsel %vm499_vm1, %v535_v40, %v536_v54  ;;  %v983_v25 = vmul.f32 %v5080_v21, %v5578_v31  ;;  %v1226_v53 = vmul.f32 %v5082_v22, %v5575_v26  ;;  %v244_v40 = vld [vmem:[%s5067_s9 + $0x118] sm:$0xf] }
  0xb7   : > { %7014 = vst [vmem:[#allocation21_spill] sm:$0xff] %v5795_v1  ;;  %v2290_v49 = vand.u32 4294901760, %v5795_v1  ;;  %v626_v11 = vadd.f32 %v537_v18, %v349_v32  ;;  %v782_v50 = vsel %vm744_vm0, %v780_v0, %v781_v7  ;;  %v1092_v60 = vrot.slane %v982_v62, 2 }
  0xb8   : > { %v1494_v48 = vadd.f32 %v1462_v5, %v1426_v51  ;;  %v1093_v52 = vrot.slane %v983_v25, 2  ;;  %v1227_v6 = vmul.f32 %v5082_v22, %v5578_v31  ;;  %v1336_v33 = vrot.slane %v1226_v53, 4 }
  0xb9   : > { %4576 = vmatprep.mubr.f32.mxu0 %v2290_v49  ;;  %v2291_v55 = vsub.f32 %v5795_v1, %v2290_v49  ;;  %v871_v61 = vadd.f32 %v782_v50, %v626_v11  ;;  %v1463_v10 = vmul.f32 %v5084_v23, %v5769_v42  ;;  %v1538_v32 = vmul.f32 %v5091_v30, %v5769_v42 }
  0xba   : > { %v1738_v63 = vadd.f32 %v1647_v58, %v1494_v48  ;;  %v1094_v8 = vsel %vm499_vm1, %v1092_v60, %v1093_v52  ;;  %v1337_v37 = vrot.slane %v1227_v6, 4  ;;  %v1539_v5 = vmul.f32 %v5091_v30, %v5771_v47 }
  0xbb   : > { %v2292_v0 = vand.u32 4294901760, %v2291_v55  ;;  %v939_v62 = vadd.f32 %v907_v9, %v871_v61  ;;  %v1648_v51 = vrot.slane %v1538_v32, 2  ;;  %v1782_v18 = vmul.f32 %v5668_v41, %v5769_v42 }
  0xbc   : > { %v1982_v25 = vadd.f32 %v1891_v2, %v1738_v63  ;;  %v1338_v53 = vsel %vm744_vm0, %v1336_v33, %v1337_v37  ;;  %v1649_v49 = vrot.slane %v1539_v5, 2  ;;  %v1783_v58 = vmul.f32 %v5668_v41, %v5771_v47 }
  0xbd   : > { %4426 = vmatprep.mubr.f32.mxu1 %v2292_v0  ;;  %v1183_v11 = vadd.f32 %v1094_v8, %v939_v62  ;;  %v1892_v50 = vrot.slane %v1782_v18, 4  ;;  %v5823_v60 = vmax.f32 %v244_v40, 0.0  ;;  %v350_v48 = vmul.f32 %v5069_v14, %v5390_v38 }
  0xbe   : > { %v2043_v9 = vsel %vm2002_vm2, %v1982_v25, 0  ;;  %v1650_v6 = vsel %vm499_vm1, %v1648_v51, %v1649_v49  ;;  %v1893_v55 = vrot.slane %v1783_v58, 4  ;;  %v426_v2 = vmul.f32 %v5071_v15, %v5445_v13 }
  0xbf   : > { %v5831_v33 = vand.u32 4294901760, %v2043_v9  ;;  %v1427_v61 = vadd.f32 %v1338_v53, %v1183_v11  ;;  %v671_v32 = vmul.f32 %v5073_v16, %v5445_v13  ;;  %v908_v63 = vmul.f32 %v5078_v20, %v5578_v31  ;;  %v245_v11 = vld [vmem:[%s5067_s9 + $0x120] sm:$0xff] }
  0xc0   : > { %v1894_v38 = vsel %vm744_vm0, %v1892_v50, %v1893_v55  ;;  %v538_v8 = vrot.slane %v426_v2, 2  ;;  %v984_v5 = vmul.f32 %v5080_v21, %v5633_v17  ;;  %v1228_v40 = vmul.f32 %v5082_v22, %v5633_v17 }
  0xc1   : > { %7015 = vst [vmem:[#allocation22_spill] sm:$0xff] %v5831_v33  ;;  %v5843_v0 = vsub.f32 %v2043_v9, %v5831_v33  ;;  %v1495_v62 = vadd.f32 %v1463_v10, %v1427_v61  ;;  %v783_v51 = vrot.slane %v671_v32, 4  ;;  %v1464_v13 = vmul.f32 %v5084_v23, %v5771_v47 }
  0xc2   : > { %v539_v18 = vsel %vm499_vm1, %v536_v54, %v538_v8  ;;  %v1095_v25 = vrot.slane %v984_v5, 2  ;;  %v1339_v53 = vrot.slane %v1228_v40, 4  ;;  %v1540_v58 = vmul.f32 %v5091_v30, %v5823_v60 }
  0xc3   : > { %7016 = vst [vmem:[#allocation23_spill] sm:$0xff] %v5843_v0  ;;  %v2300_v50 = vand.u32 4294901760, %v5843_v0  ;;  %v1739_v2 = vadd.f32 %v1650_v6, %v1495_v62  ;;  %v627_v1 = vadd.f32 %v539_v18, %v350_v48  ;;  %v784_v9 = vsel %vm744_vm0, %v781_v7, %v783_v51 }
  0xc4   : > { %v1096_v10 = vsel %vm499_vm1, %v1093_v52, %v1095_v25  ;;  %v1340_v61 = vsel %vm744_vm0, %v1337_v37, %v1339_v53  ;;  %v1651_v32 = vrot.slane %v1540_v58, 2  ;;  %v1784_v54 = vmul.f32 %v5668_v41, %v5823_v60 }
  0xc5   : > { %4577 = vmatmul.mubr.f32.gmra.mrb[12].mxu0 %v2300_v50  ;;  %v1983_v8 = vadd.f32 %v1894_v38, %v1739_v2  ;;  %v2301_v5 = vsub.f32 %v5843_v0, %v2300_v50  ;;  %v872_v40 = vadd.f32 %v784_v9, %v627_v1  ;;  %v5859_v33 = vmax.f32 %v245_v11, 0.0 }
  0xc6   : > { %v1652_v48 = vsel %vm499_vm1, %v1649_v49, %v1651_v32  ;;  %v1895_v6 = vrot.slane %v1784_v54, 4  ;;  %v5862_v7 = vmax.f32 %v246_v29, 0.0  ;;  %v351_v52 = vmul.f32 %v5069_v14, %v5481_v19 }
  0xc7   : > { %v2046_v37 = vsel %vm2002_vm2, %v1983_v8, 0  ;;  %v2302_v62 = vand.u32 4294901760, %v2301_v5  ;;  %v940_v51 = vadd.f32 %v908_v63, %v872_v40  ;;  %v427_v38 = vmul.f32 %v5071_v15, %v5481_v19 }
  0xc8   : > { %v5869_v18 = vand.u32 4294901760, %v2046_v37  ;;  %v1896_v1 = vsel %vm744_vm0, %v1893_v55, %v1895_v6  ;;  %v5874_v49 = vmul.f32 %v5071_v15, %v5484_v4  ;;  %v672_v29 = vmul.f32 %v5073_v16, %v5481_v19 }
  0xc9   : > { %4427 = vmatmul.mubr.f32.gmra.mrb[12].mxu1 %v2302_v62  ;;  %v1184_v25 = vadd.f32 %v1096_v10, %v940_v51  ;;  %v540_v53 = vrot.slane %v427_v38, 2  ;;  %v5880_v63 = vmul.f32 %v5073_v16, %v5484_v4  ;;  %v909_v58 = vmul.f32 %v5078_v20, %v5674_v59 }
  0xca   : > { %7017 = vst [vmem:[#allocation24_spill] sm:$0xff] %v5869_v18  ;;  %v5885_v11 = vsub.f32 %v2046_v37, %v5869_v18  ;;  %v541_v55 = vrot.slane %v5874_v49, 2  ;;  %v785_v50 = vrot.slane %v672_v29, 4  ;;  %v985_v2 = vmul.f32 %v5080_v21, %v5674_v59 }
  0xcb   : > { %v1428_v19 = vadd.f32 %v1340_v61, %v1184_v25  ;;  %v786_v9 = vrot.slane %v5880_v63, 4  ;;  %v986_v10 = vmul.f32 %v5080_v21, %v5676_v39  ;;  %v1229_v32 = vmul.f32 %v5082_v22, %v5674_v59 }
  0xcc   : > { %7018 = vst [vmem:[#allocation25_spill] sm:$0xff] %v5885_v11  ;;  %v2310_v54 = vand.u32 4294901760, %v5885_v11  ;;  %v542_v8 = vsel %vm499_vm1, %v540_v53, %v541_v55  ;;  %v1097_v5 = vrot.slane %v985_v2, 2  ;;  %v5899_v40 = vmul.f32 %v5082_v22, %v5676_v39 }
  0xcd   : > { %v1496_v6 = vadd.f32 %v1464_v13, %v1428_v19  ;;  %v628_v61 = vadd.f32 %v542_v8, %v351_v52  ;;  %v787_v37 = vsel %vm744_vm0, %v785_v50, %v786_v9  ;;  %v1098_v62 = vrot.slane %v986_v10, 2  ;;  %v247_v52 = vld [vmem:[%s5067_s9 + $0x130] sm:$0xf] }
  0xce   : > { %4579 = vmatprep.mubr.f32.mxu0 %v2310_v54  ;;  %v2311_v51 = vsub.f32 %v5885_v11, %v2310_v54  ;;  %v1341_v38 = vrot.slane %v1229_v32, 4  ;;  %v1342_v49 = vrot.slane %v5899_v40, 4  ;;  %v1465_v29 = vmul.f32 %v5084_v23, %v5859_v33  ;;  %v249_v11 = vld [vmem:[%s5067_s9 + $0x140] sm:$0xff] }
  0xcf   : > { %v1740_v25 = vadd.f32 %v1652_v48, %v1496_v6  ;;  %v873_v53 = vadd.f32 %v787_v37, %v628_v61  ;;  %v1099_v63 = vsel %vm499_vm1, %v1097_v5, %v1098_v62  ;;  %v1541_v13 = vmul.f32 %v5091_v30, %v5859_v33 }
  0xd0   : > { %v2312_v2 = vand.u32 4294901760, %v2311_v51  ;;  %v1343_v50 = vsel %vm744_vm0, %v1341_v38, %v1342_v49  ;;  %v1542_v19 = vmul.f32 %v5091_v30, %v5862_v7  ;;  %v1785_v10 = vmul.f32 %v5668_v41, %v5859_v33 }
  0xd1   : > { %v1984_v32 = vadd.f32 %v1896_v1, %v1740_v25  ;;  %v941_v54 = vadd.f32 %v909_v58, %v873_v53  ;;  %v1653_v8 = vrot.slane %v1541_v13, 2  ;;  %v1786_v48 = vmul.f32 %v5668_v41, %v5862_v7 }
  0xd2   : > { %4429 = vmatprep.mubr.f32.mxu1 %v2312_v2  ;;  %v1654_v5 = vrot.slane %v1542_v19, 2  ;;  %v1897_v40 = vrot.slane %v1785_v10, 4  ;;  %v5917_v6 = vmax.f32 %v247_v52, 0.0  ;;  %v352_v61 = vmul.f32 %v5069_v14, %v5484_v4 }
  0xd3   : > { %v2049_v37 = vsel %vm2002_vm2, %v1984_v32, 0  ;;  %v1185_v51 = vadd.f32 %v1099_v63, %v941_v54  ;;  %v1898_v38 = vrot.slane %v1786_v48, 4  ;;  %v429_v1 = vmul.f32 %v5071_v15, %v5539_v24 }
  0xd4   : > { %v5924_v58 = vand.u32 4294901760, %v2049_v37  ;;  %v1655_v25 = vsel %vm499_vm1, %v1653_v8, %v1654_v5  ;;  %v674_v53 = vmul.f32 %v5073_v16, %v5539_v24  ;;  %v910_v13 = vmul.f32 %v5078_v20, %v5676_v39 }
  0xd5   : > { %v1429_v52 = vadd.f32 %v1343_v50, %v1185_v51  ;;  %v1899_v4 = vsel %vm744_vm0, %v1897_v40, %v1898_v38  ;;  %v543_v63 = vrot.slane %v429_v1, 2  ;;  %v987_v2 = vmul.f32 %v5080_v21, %v5733_v56  ;;  %v248_v40 = vld [vmem:[%s5067_s9 + $0x138] sm:$0xff] }
  0xd6   : > { %7019 = vst [vmem:[#allocation26_spill] sm:$0xff] %v5924_v58  ;;  %v5935_v19 = vsub.f32 %v2049_v37, %v5924_v58  ;;  %v788_v10 = vrot.slane %v674_v53, 4  ;;  %v1231_v32 = vmul.f32 %v5082_v22, %v5733_v56  ;;  %v1466_v24 = vmul.f32 %v5084_v23, %v5862_v7 }
  0xd7   : > { %v1497_v54 = vadd.f32 %v1465_v29, %v1429_v52  ;;  %v544_v50 = vsel %vm499_vm1, %v541_v55, %v543_v63  ;;  %v1100_v8 = vrot.slane %v987_v2, 2  ;;  %v1543_v48 = vmul.f32 %v5091_v30, %v5917_v6 }
  0xd8   : > { %7020 = vst [vmem:[#allocation27_spill] sm:$0xff] %v5935_v19  ;;  %v2320_v51 = vand.u32 4294901760, %v5935_v19  ;;  %v629_v1 = vadd.f32 %v544_v50, %v352_v61  ;;  %v789_v37 = vsel %vm744_vm0, %v786_v9, %v788_v10  ;;  %v1344_v53 = vrot.slane %v1231_v32, 4 }
  0xd9   : > { %v1741_v0 = vadd.f32 %v1655_v25, %v1497_v54  ;;  %v1101_v58 = vsel %vm499_vm1, %v1098_v62, %v1100_v8  ;;  %v1656_v18 = vrot.slane %v1543_v48, 2  ;;  %v1787_v29 = vmul.f32 %v5668_v41, %v5917_v6 }
  0xda   : > { %4580 = vmatmul.mubr.f32.gmra.mrb[14].mxu0 %v2320_v51  ;;  %v2321_v55 = vsub.f32 %v5935_v19, %v2320_v51  ;;  %v874_v52 = vadd.f32 %v789_v37, %v629_v1  ;;  %v1345_v63 = vsel %vm744_vm0, %v1342_v49, %v1344_v53  ;;  %v5953_v2 = vmax.f32 %v248_v40, 0.0  ;;  %v252_v19 = vld [vmem:[%s5067_s9 + $0x158] sm:$0xff] }
  0xdb   : > { %v1985_v61 = vadd.f32 %v1899_v4, %v1741_v0  ;;  %v1657_v9 = vsel %vm499_vm1, %v1654_v5, %v1656_v18  ;;  %v1900_v10 = vrot.slane %v1787_v29, 4  ;;  %v5956_v32 = vmax.f32 %v249_v11, 0.0 }
  0xdc   : > { %v2322_v25 = vand.u32 4294901760, %v2321_v55  ;;  %v942_v62 = vadd.f32 %v910_v13, %v874_v52  ;;  %v353_v54 = vmul.f32 %v5069_v14, %v5575_v26  ;;  %v430_v50 = vmul.f32 %v5071_v15, %v5575_v26 }
  0xdd   : > { %v2052_v8 = vsel %vm2002_vm2, %v1985_v61, 0  ;;  %v1901_v49 = vsel %vm744_vm0, %v1898_v38, %v1900_v10  ;;  %v5966_v0 = vmul.f32 %v5071_v15, %v5578_v31  ;;  %v675_v18 = vmul.f32 %v5073_v16, %v5575_v26 }
  0xde   : > { %v5970_v11 = vand.u32 4294901760, %v2052_v8  ;;  %4430 = vmatmul.mubr.f32.gmra.mrb[14].mxu1 %v2322_v25  ;;  %v1186_v5 = vadd.f32 %v1101_v58, %v942_v62  ;;  %v545_v13 = vrot.slane %v430_v50, 2  ;;  %v5974_v4 = vmul.f32 %v5073_v16, %v5578_v31 }
  0xdf   : > { %v546_v48 = vrot.slane %v5966_v0, 2  ;;  %v790_v40 = vrot.slane %v675_v18, 4  ;;  %v911_v38 = vmul.f32 %v5078_v20, %v5769_v42  ;;  %v988_v51 = vmul.f32 %v5080_v21, %v5769_v42 }
  0xe0   : > { %7021 = vst [vmem:[#allocation28_spill] sm:$0xff] %v5970_v11  ;;  %v5982_v26 = vsub.f32 %v2052_v8, %v5970_v11  ;;  %v1430_v1 = vadd.f32 %v1345_v63, %v1186_v5  ;;  %v791_v58 = vrot.slane %v5974_v4, 4  ;;  %v989_v37 = vmul.f32 %v5080_v21, %v5771_v47 }
  0xe1   : > { %v547_v53 = vsel %vm499_vm1, %v545_v13, %v546_v48  ;;  %v1102_v29 = vrot.slane %v988_v51, 2  ;;  %v1232_v55 = vmul.f32 %v5082_v22, %v5769_v42  ;;  %v5992_v52 = vmul.f32 %v5082_v22, %v5771_v47  ;;  %v250_v51 = vld [vmem:[%s5067_s9 + $0x148] sm:$0xf] }
  0xe2   : > { %7022 = vst [vmem:[#allocation29_spill] sm:$0xff] %v5982_v26  ;;  %v2330_v61 = vand.u32 4294901760, %v5982_v26  ;;  %v1498_v10 = vadd.f32 %v1466_v24, %v1430_v1  ;;  %v630_v63 = vadd.f32 %v547_v53, %v353_v54  ;;  %v792_v25 = vsel %vm744_vm0, %v790_v40, %v791_v58 }
  0xe3   : > { %v1103_v62 = vrot.slane %v989_v37, 2  ;;  %v1346_v50 = vrot.slane %v1232_v55, 4  ;;  %v1347_v8 = vrot.slane %v5992_v52, 4  ;;  %v1467_v0 = vmul.f32 %v5084_v23, %v5953_v2 }
  0xe4   : > { %4582 = vmatprep.mubr.f32.mxu0 %v2330_v61  ;;  %v1742_v18 = vadd.f32 %v1657_v9, %v1498_v10  ;;  %v2331_v5 = vsub.f32 %v5982_v26, %v2330_v61  ;;  %v875_v13 = vadd.f32 %v792_v25, %v630_v63  ;;  %v1544_v4 = vmul.f32 %v5091_v30, %v5953_v2 }
  0xe5   : > { %v1104_v24 = vsel %vm499_vm1, %v1102_v29, %v1103_v62  ;;  %v1348_v54 = vsel %vm744_vm0, %v1346_v50, %v1347_v8  ;;  %v1545_v40 = vmul.f32 %v5091_v30, %v5956_v32  ;;  %v1788_v1 = vmul.f32 %v5668_v41, %v5953_v2 }
  0xe6   : > { %v1986_v37 = vadd.f32 %v1901_v49, %v1742_v18  ;;  %v2332_v53 = vand.u32 4294901760, %v2331_v5  ;;  %v943_v9 = vadd.f32 %v911_v38, %v875_v13  ;;  %v1658_v55 = vrot.slane %v1544_v4, 2 }
  0xe7   : > { %v1659_v52 = vrot.slane %v1545_v40, 2  ;;  %v1789_v61 = vmul.f32 %v5668_v41, %v5956_v32  ;;  %v1902_v10 = vrot.slane %v1788_v1, 4  ;;  %v6011_v63 = vmax.f32 %v250_v51, 0.0 }
  0xe8   : > { %v2055_v29 = vsel %vm2002_vm2, %v1986_v37, 0  ;;  %4432 = vmatprep.mubr.f32.mxu1 %v2332_v53  ;;  %v1187_v25 = vadd.f32 %v1104_v24, %v943_v9  ;;  %v354_v50 = vmul.f32 %v5069_v14, %v5578_v31  ;;  %v432_v49 = vmul.f32 %v5071_v15, %v5633_v17 }
  0xe9   : > { %v6018_v18 = vand.u32 4294901760, %v2055_v29  ;;  %v1660_v38 = vsel %vm499_vm1, %v1658_v55, %v1659_v52  ;;  %v1903_v5 = vrot.slane %v1789_v61, 4  ;;  %v677_v13 = vmul.f32 %v5073_v16, %v5633_v17  ;;  %v251_v61 = vld [vmem:[%s5067_s9 + $0x150] sm:$0xff] }
  0xea   : > { %v1431_v4 = vadd.f32 %v1348_v54, %v1187_v25  ;;  %v548_v51 = vrot.slane %v432_v49, 2  ;;  %v912_v24 = vmul.f32 %v5078_v20, %v5771_v47  ;;  %v990_v31 = vmul.f32 %v5080_v21, %v5823_v60 }
  0xeb   : > { %7023 = vst [vmem:[#allocation30_spill] sm:$0xff] %v6018_v18  ;;  %v6028_v40 = vsub.f32 %v2055_v29, %v6018_v18  ;;  %v1904_v1 = vsel %vm744_vm0, %v1902_v10, %v1903_v5  ;;  %v793_v37 = vrot.slane %v677_v13, 4  ;;  %v1234_v53 = vmul.f32 %v5082_v22, %v5823_v60 }
  0xec   : > { %v1499_v9 = vadd.f32 %v1467_v0, %v1431_v4  ;;  %v549_v17 = vsel %vm499_vm1, %v546_v48, %v548_v51  ;;  %v1105_v54 = vrot.slane %v990_v31, 2  ;;  %v1468_v55 = vmul.f32 %v5084_v23, %v5956_v32 }
  0xed   : > { %7024 = vst [vmem:[#allocation31_spill] sm:$0xff] %v6028_v40  ;;  %v2340_v25 = vand.u32 4294901760, %v6028_v40  ;;  %v631_v49 = vadd.f32 %v549_v17, %v354_v50  ;;  %v794_v29 = vsel %vm744_vm0, %v791_v58, %v793_v37  ;;  %v1349_v26 = vrot.slane %v1234_v53, 4 }
  0xee   : > { %v1743_v10 = vadd.f32 %v1660_v38, %v1499_v9  ;;  %v1106_v13 = vsel %vm499_vm1, %v1103_v62, %v1105_v54  ;;  %v1546_v0 = vmul.f32 %v5091_v30, %v6011_v63  ;;  %v1790_v48 = vmul.f32 %v5668_v41, %v6011_v63 }
  0xef   : > { %4583 = vmatmul.mubr.f32.gmra.mrb[16].mxu0 %v2340_v25  ;;  %v2341_v4 = vsub.f32 %v6028_v40, %v2340_v25  ;;  %v876_v51 = vadd.f32 %v794_v29, %v631_v49  ;;  %v1350_v31 = vsel %vm744_vm0, %v1347_v8, %v1349_v26  ;;  %v6047_v50 = vmax.f32 %v251_v61, 0.0 }
  0xf0   : > { %v1987_v58 = vadd.f32 %v1904_v1, %v1743_v10  ;;  %v1661_v37 = vrot.slane %v1546_v0, 2  ;;  %v1905_v53 = vrot.slane %v1790_v48, 4  ;;  %v6049_v38 = vmax.f32 %v252_v19, 0.0 }
  0xf1   : > { %v2342_v62 = vand.u32 4294901760, %v2341_v4  ;;  %v944_v9 = vadd.f32 %v912_v24, %v876_v51  ;;  %v355_v17 = vmul.f32 %v5069_v14, %v5674_v59  ;;  %v433_v54 = vmul.f32 %v5071_v15, %v5674_v59 }
  0xf2   : > { %v2058_v25 = vsel %vm2002_vm2, %v1987_v58, 0  ;;  %v1662_v49 = vsel %vm499_vm1, %v1659_v52, %v1661_v37  ;;  %v1906_v26 = vsel %vm744_vm0, %v1903_v5, %v1905_v53  ;;  %v6060_v8 = vmul.f32 %v5071_v15, %v5676_v39 }
  0xf3   : > { %v6062_v19 = vand.u32 4294901760, %v2058_v25  ;;  %4433 = vmatmul.mubr.f32.gmra.mrb[16].mxu1 %v2342_v62  ;;  %v1188_v24 = vadd.f32 %v1106_v13, %v944_v9  ;;  %v550_v1 = vrot.slane %v433_v54, 2  ;;  %v678_v61 = vmul.f32 %v5073_v16, %v5674_v59 }
  0xf4   : > { %v551_v29 = vrot.slane %v6060_v8, 2  ;;  %v6069_v10 = vmul.f32 %v5073_v16, %v5676_v39  ;;  %v913_v52 = vmul.f32 %v5078_v20, %v5859_v33  ;;  %v991_v5 = vmul.f32 %v5080_v21, %v5859_v33 }
  0xf5   : > { %7025 = vst [vmem:[#allocation32_spill] sm:$0xff] %v6062_v19  ;;  %v6076_v0 = vsub.f32 %v2058_v25, %v6062_v19  ;;  %v1432_v13 = vadd.f32 %v1350_v31, %v1188_v24  ;;  %v795_v48 = vrot.slane %v678_v61, 4  ;;  %v6080_v59 = vmul.f32 %v5080_v21, %v5862_v7 }
  0xf6   : > { %v552_v4 = vsel %vm499_vm1, %v550_v1, %v551_v29  ;;  %v796_v51 = vrot.slane %v6069_v10, 4  ;;  %v1107_v58 = vrot.slane %v991_v5, 2  ;;  %v1235_v37 = vmul.f32 %v5082_v22, %v5859_v33 }
  0xf7   : > { %7026 = vst [vmem:[#allocation33_spill] sm:$0xff] %v6076_v0  ;;  %v2350_v53 = vand.u32 4294901760, %v6076_v0  ;;  %v1500_v62 = vadd.f32 %v1468_v55, %v1432_v13  ;;  %v632_v9 = vadd.f32 %v552_v4, %v355_v17  ;;  %v1108_v31 = vrot.slane %v6080_v59, 2  ;;  %v253_v59 = vld [vmem:[%s5067_s9 + $0x160] sm:$0xf] }
  0xf8   : > { %v797_v54 = vsel %vm744_vm0, %v795_v48, %v796_v51  ;;  %v1236_v25 = vmul.f32 %v5082_v22, %v5862_v7  ;;  %v1351_v8 = vrot.slane %v1235_v37, 4  ;;  %v1469_v24 = vmul.f32 %v5084_v23, %v6047_v50 }
  0xf9   : > { %4585 = vmatprep.mubr.f32.mxu0 %v2350_v53  ;;  %v1744_v1 = vadd.f32 %v1662_v49, %v1500_v62  ;;  %v2351_v61 = vsub.f32 %v6076_v0, %v2350_v53  ;;  %v877_v10 = vadd.f32 %v797_v54, %v632_v9  ;;  %v1109_v55 = vsel %vm499_vm1, %v1107_v58, %v1108_v31 }
  0xfa   : > { %v1352_v5 = vrot.slane %v1236_v25, 4  ;;  %v1547_v17 = vmul.f32 %v5091_v30, %v6047_v50  ;;  %v1548_v13 = vmul.f32 %v5091_v30, %v6049_v38  ;;  %v1791_v48 = vmul.f32 %v5668_v41, %v6047_v50 }
  0xfb   : > { %v1988_v4 = vadd.f32 %v1906_v26, %v1744_v1  ;;  %v2352_v37 = vand.u32 4294901760, %v2351_v61  ;;  %v945_v40 = vadd.f32 %v913_v52, %v877_v10  ;;  %v1792_v49 = vmul.f32 %v5668_v41, %v6049_v38 }
  0xfc   : > { %v1353_v53 = vsel %vm744_vm0, %v1351_v8, %v1352_v5  ;;  %v1663_v58 = vrot.slane %v1547_v17, 2  ;;  %v1664_v62 = vrot.slane %v1548_v13, 2  ;;  %v1907_v9 = vrot.slane %v1791_v48, 4 }
  0xfd   : > { %v2061_v54 = vsel %vm2002_vm2, %v1988_v4, 0  ;;  %4435 = vmatprep.mubr.f32.mxu1 %v2352_v37  ;;  %v1189_v25 = vadd.f32 %v1109_v55, %v945_v40  ;;  %v1908_v0 = vrot.slane %v1792_v49, 4  ;;  %v6106_v19 = vmax.f32 %v253_v59, 0.0 }
  0xfe   : > { %v6108_v18 = vand.u32 4294901760, %v2061_v54  ;;  %v1665_v26 = vsel %vm499_vm1, %v1663_v58, %v1664_v62  ;;  %v356_v52 = vmul.f32 %v5069_v14, %v5676_v39  ;;  %v435_v8 = vmul.f32 %v5071_v15, %v5733_v56 }
  0xff   : > { %v1433_v1 = vadd.f32 %v1353_v53, %v1189_v25  ;;  %v1909_v61 = vsel %vm744_vm0, %v1907_v9, %v1908_v0  ;;  %v680_v40 = vmul.f32 %v5073_v16, %v5733_v56  ;;  %v914_v10 = vmul.f32 %v5078_v20, %v5862_v7  ;;  %v254_v9 = vld [vmem:[%s5067_s9 + $0x168] sm:$0xff] }
 0x100   : > { %7027 = vst [vmem:[#allocation34_spill] sm:$0xff] %v6108_v18  ;;  %v6121_v55 = vsub.f32 %v2061_v54, %v6108_v18  ;;  %v553_v17 = vrot.slane %v435_v8, 2  ;;  %v993_v39 = vmul.f32 %v5080_v21, %v5917_v6  ;;  %v1237_v13 = vmul.f32 %v5082_v22, %v5917_v6 }
 0x101   : > { %v1501_v48 = vadd.f32 %v1469_v24, %v1433_v1  ;;  %v798_v59 = vrot.slane %v680_v40, 4  ;;  %v1470_v4 = vmul.f32 %v5084_v23, %v6049_v38  ;;  %v1549_v56 = vmul.f32 %v5091_v30, %v6106_v19  ;;  %v255_v24 = vld [vmem:[%s5067_s9 + $0x170] sm:$0xff] }
 0x102   : > { %7028 = vst [vmem:[#allocation35_spill] sm:$0xff] %v6121_v55  ;;  %v2360_v37 = vand.u32 4294901760, %v6121_v55  ;;  %v554_v49 = vsel %vm499_vm1, %v551_v29, %v553_v17  ;;  %v1110_v53 = vrot.slane %v993_v39, 2  ;;  %v1354_v58 = vrot.slane %v1237_v13, 4 }
 0x103   : > { %v1745_v54 = vadd.f32 %v1665_v26, %v1501_v48  ;;  %v633_v25 = vadd.f32 %v554_v49, %v356_v52  ;;  %v799_v8 = vsel %vm744_vm0, %v796_v51, %v798_v59  ;;  %v1666_v18 = vrot.slane %v1549_v56, 2 }
 0x104   : > { %4586 = vmatmul.mubr.f32.gmra.mrb[18].mxu0 %v2360_v37  ;;  %v2361_v1 = vsub.f32 %v6121_v55, %v2360_v37  ;;  %v1111_v40 = vsel %vm499_vm1, %v1108_v31, %v1110_v53  ;;  %v1355_v11 = vsel %vm744_vm0, %v1352_v5, %v1354_v58  ;;  %v1793_v46 = vmul.f32 %v5668_v41, %v6106_v19 }
 0x105   : > { %v1989_v29 = vadd.f32 %v1909_v61, %v1745_v54  ;;  %v878_v17 = vadd.f32 %v799_v8, %v633_v25  ;;  %v1667_v39 = vsel %vm499_vm1, %v1664_v62, %v1666_v18  ;;  %v6142_v26 = vmax.f32 %v254_v9, 0.0 }
 0x106   : > { %v2362_v52 = vand.u32 4294901760, %v2361_v1  ;;  %v1910_v51 = vrot.slane %v1793_v46, 4  ;;  %v6144_v13 = vmax.f32 %v255_v24, 0.0  ;;  %v357_v48 = vmul.f32 %v5069_v14, %v5769_v42 }
 0x107   : > { %v2064_v31 = vsel %vm2002_vm2, %v1989_v29, 0  ;;  %v946_v59 = vadd.f32 %v914_v10, %v878_v17  ;;  %v436_v5 = vmul.f32 %v5071_v15, %v5769_v42  ;;  %v6153_v41 = vmul.f32 %v5071_v15, %v5771_v47 }
 0x108   : > { %v6155_v18 = vand.u32 4294901760, %v2064_v31  ;;  %4436 = vmatmul.mubr.f32.gmra.mrb[18].mxu1 %v2362_v52  ;;  %v1911_v46 = vsel %vm744_vm0, %v1908_v0, %v1910_v51  ;;  %v681_v62 = vmul.f32 %v5073_v16, %v5769_v42  ;;  %v6162_v61 = vmul.f32 %v5073_v16, %v5771_v47 }
 0x109   : > { %v1190_v10 = vadd.f32 %v1111_v40, %v946_v59  ;;  %v555_v56 = vrot.slane %v436_v5, 2  ;;  %v556_v37 = vrot.slane %v6153_v41, 2  ;;  %v915_v49 = vmul.f32 %v5078_v20, %v5953_v2 }
 0x10a   : > { %v6168_v53 = vsub.f32 %v2064_v31, %v6155_v18  ;;  %v800_v58 = vrot.slane %v681_v62, 4  ;;  %v6979_v0 = vrot.slane %v6162_v61, 4  ;;  %v994_v42 = vmul.f32 %v5080_v21, %v5953_v2 }
 0x10b   : > { %v1434_v9 = vadd.f32 %v1355_v11, %v1190_v10  ;;  %v557_v54 = vsel %vm499_vm1, %v555_v56, %v556_v37  ;;  %v995_v25 = vmul.f32 %v5080_v21, %v5956_v32  ;;  %v1238_v8 = vmul.f32 %v5082_v22, %v5953_v2  ;;  %v256_v56 = vld [vmem:[%s5067_s9 + $0x178] sm:$0xf] }
 0x10c   : > { %7029 = vst [vmem:[#allocation36_spill] sm:$0xff] %v6168_v53  ;;  %v2370_v24 = vand.u32 4294901760, %v6168_v53  ;;  %v634_v1 = vadd.f32 %v557_v54, %v357_v48  ;;  %v802_v40 = vsel %vm744_vm0, %v800_v58, %v6979_v0  ;;  %v1112_v29 = vrot.slane %v994_v42, 2  ;;  %v6196_v54 = vld [vmem:[%s6934_s1 + $0x8] ss:$0 sm:$0xff] }
 0x10d   : > { %v1502_v17 = vadd.f32 %v1470_v4, %v1434_v9  ;;  %v1113_v52 = vrot.slane %v995_v25, 2  ;;  %v1239_v11 = vmul.f32 %v5082_v22, %v5956_v32  ;;  %v1356_v51 = vrot.slane %v1238_v8, 4 }
 0x10e   : > { %4588 = vmatprep.mubr.f32.mxu0 %v2370_v24  ;;  %v2371_v31 = vsub.f32 %v6168_v53, %v2370_v24  ;;  %v879_v59 = vadd.f32 %v802_v40, %v634_v1  ;;  %v1471_v5 = vmul.f32 %v5084_v23, %v6142_v26  ;;  %v1550_v48 = vmul.f32 %v5091_v30, %v6142_v26 }
 0x10f   : > { %v1746_v41 = vadd.f32 %v1667_v39, %v1502_v17  ;;  %v1114_v62 = vsel %vm499_vm1, %v1112_v29, %v1113_v52  ;;  %v1357_v10 = vrot.slane %v1239_v11, 4  ;;  %v1551_v4 = vmul.f32 %v5091_v30, %v6144_v13 }
 0x110   : > { %v2372_v58 = vand.u32 4294901760, %v2371_v31  ;;  %v947_v42 = vadd.f32 %v915_v49, %v879_v59  ;;  %v1668_v9 = vrot.slane %v1550_v48, 2  ;;  %v1794_v25 = vmul.f32 %v6196_v54, %v6142_v26 }
 0x111   : > { %v1990_v8 = vadd.f32 %v1911_v46, %v1746_v41  ;;  %v1358_v39 = vsel %vm744_vm0, %v1356_v51, %v1357_v10  ;;  %v1669_v24 = vrot.slane %v1551_v4, 2  ;;  %v1795_v1 = vmul.f32 %v6196_v54, %v6144_v13 }
 0x112   : > { %4438 = vmatprep.mubr.f32.mxu1 %v2372_v58  ;;  %v1191_v40 = vadd.f32 %v1114_v62, %v947_v42  ;;  %v1912_v29 = vrot.slane %v1794_v25, 4  ;;  %v6203_v49 = vmax.f32 %v256_v56, 0.0  ;;  %v358_v17 = vmul.f32 %v5069_v14, %v5771_v47 }
 0x113   : > { %v2067_v11 = vsel %vm2002_vm2, %v1990_v8, 0  ;;  %v1670_v31 = vsel %vm499_vm1, %v1668_v9, %v1669_v24  ;;  %v1913_v59 = vrot.slane %v1795_v1, 4  ;;  %v438_v46 = vmul.f32 %v5071_v15, %v5823_v60 }
 0x114   : > { %v6211_v51 = vand.u32 4294901760, %v2067_v11  ;;  %v1435_v48 = vadd.f32 %v1358_v39, %v1191_v40  ;;  %v683_v41 = vmul.f32 %v5073_v16, %v5823_v60  ;;  %v916_v62 = vmul.f32 %v5078_v20, %v5956_v32 }
 0x115   : > { %v1914_v47 = vsel %vm744_vm0, %v1912_v29, %v1913_v59  ;;  %v558_v4 = vrot.slane %v438_v46, 2  ;;  %v996_v56 = vmul.f32 %v5080_v21, %v6011_v63  ;;  %v1240_v58 = vmul.f32 %v5082_v22, %v6011_v63  ;;  %v257_v29 = vld [vmem:[%s5067_s9 + $0x180] sm:$0xff] }
 0x116   : > { %7030 = vst [vmem:[#allocation37_spill] sm:$0xff] %v6211_v51  ;;  %v6223_v42 = vsub.f32 %v2067_v11, %v6211_v51  ;;  %v1503_v9 = vadd.f32 %v1471_v5, %v1435_v48  ;;  %v803_v25 = vrot.slane %v683_v41, 4  ;;  %v1472_v60 = vmul.f32 %v5084_v23, %v6144_v13  ;;  %v258_v48 = vld [vmem:[%s5067_s9 + $0x188] sm:$0xff] }
 0x117   : > { %v559_v8 = vsel %vm499_vm1, %v556_v37, %v558_v4  ;;  %v1115_v39 = vrot.slane %v996_v56, 2  ;;  %v1359_v1 = vrot.slane %v1240_v58, 4  ;;  %v1552_v40 = vmul.f32 %v5091_v30, %v6203_v49 }
 0x118   : > { %7031 = vst [vmem:[#allocation38_spill] sm:$0xff] %v6223_v42  ;;  %v2380_v46 = vand.u32 4294901760, %v6223_v42  ;;  %v1747_v0 = vadd.f32 %v1670_v31, %v1503_v9  ;;  %v635_v53 = vadd.f32 %v559_v8, %v358_v17  ;;  %v7032_v11 = vrot.slane %v6162_v61, 4 }
 0x119   : > { %v1116_v41 = vsel %vm499_vm1, %v1113_v52, %v1115_v39  ;;  %v1360_v55 = vsel %vm744_vm0, %v1357_v10, %v1359_v1  ;;  %v1671_v37 = vrot.slane %v1552_v40, 2  ;;  %v1796_v4 = vmul.f32 %v6196_v54, %v6203_v49 }
 0x11a   : > { %v804_v5 = vsel %vm744_vm0, %v7032_v11, %v803_v25  ;;  %4589 = vmatmul.mubr.f32.gmra.mrb[20].mxu0 %v2380_v46  ;;  %v1991_v56 = vadd.f32 %v1914_v47, %v1747_v0  ;;  %v2381_v58 = vsub.f32 %v6223_v42, %v2380_v46  ;;  %v6241_v31 = vmax.f32 %v257_v29, 0.0 }
 0x11b   : > { %v880_v51 = vadd.f32 %v804_v5, %v635_v53  ;;  %v1672_v61 = vsel %vm499_vm1, %v1669_v24, %v1671_v37  ;;  %v1915_v17 = vrot.slane %v1796_v4, 4  ;;  %v6244_v9 = vmax.f32 %v258_v48, 0.0 }
 0x11c   : > { %v359_v52 = vmul.f32 %v5069_v14, %v5859_v33  ;;  %v2070_v10 = vsel %vm2002_vm2, %v1991_v56, 0  ;;  %v2382_v25 = vand.u32 4294901760, %v2381_v58  ;;  %v439_v0 = vmul.f32 %v5071_v15, %v5859_v33 }
 0x11d   : > { %v948_v8 = vadd.f32 %v916_v62, %v880_v51  ;;  %v6251_v47 = vand.u32 4294901760, %v2070_v10  ;;  %v1916_v53 = vsel %vm744_vm0, %v1913_v59, %v1915_v17  ;;  %v6256_v24 = vmul.f32 %v5071_v15, %v5862_v7 }
 0x11e   : > { %v684_v39 = vmul.f32 %v5073_v16, %v5859_v33  ;;  %4439 = vmatmul.mubr.f32.gmra.mrb[20].mxu1 %v2382_v25  ;;  %v560_v40 = vrot.slane %v439_v0, 2  ;;  %v6262_v51 = vmul.f32 %v5073_v16, %v5862_v7  ;;  %v917_v62 = vmul.f32 %v5078_v20, %v6047_v50 }
 0x11f   : > { %7033 = vst [vmem:[#allocation39_spill] sm:$0xff] %v6251_v47  ;;  %v1192_v1 = vadd.f32 %v1116_v41, %v948_v8  ;;  %v6267_v29 = vsub.f32 %v2070_v10, %v6251_v47  ;;  %v561_v59 = vrot.slane %v6256_v24, 2  ;;  %v997_v11 = vmul.f32 %v5080_v21, %v6047_v50 }
 0x120   : > { %v805_v46 = vrot.slane %v684_v39, 4  ;;  %v806_v5 = vrot.slane %v6262_v51, 4  ;;  %v998_v48 = vmul.f32 %v5080_v21, %v6049_v38  ;;  %v1241_v41 = vmul.f32 %v5082_v22, %v6047_v50 }
 0x121   : > { %7034 = vst [vmem:[#allocation40_spill] sm:$0xff] %v6267_v29  ;;  %v1436_v33 = vadd.f32 %v1360_v55, %v1192_v1  ;;  %v2390_v37 = vand.u32 4294901760, %v6267_v29  ;;  %v562_v4 = vsel %vm499_vm1, %v560_v40, %v561_v59  ;;  %v1117_v56 = vrot.slane %v997_v11, 2 }
 0x122   : > { %v6281_v58 = vmul.f32 %v5082_v22, %v6049_v38  ;;  %v636_v55 = vadd.f32 %v562_v4, %v359_v52  ;;  %v807_v10 = vsel %vm744_vm0, %v805_v46, %v806_v5  ;;  %v1118_v25 = vrot.slane %v998_v48, 2  ;;  %v259_v52 = vld [vmem:[%s5067_s9 + $0x190] sm:$0xf] }
 0x123   : > { %v1504_v17 = vadd.f32 %v1472_v60, %v1436_v33  ;;  %4591 = vmatprep.mubr.f32.mxu0 %v2390_v37  ;;  %v2391_v8 = vsub.f32 %v6267_v29, %v2390_v37  ;;  %v1361_v0 = vrot.slane %v1241_v41, 4  ;;  %v1473_v39 = vmul.f32 %v5084_v23, %v6241_v31  ;;  %v261_v29 = vld [vmem:[%s5067_s9 + $0x1a0] sm:$0xff] }
 0x124   : > { %v1362_v24 = vrot.slane %v6281_v58, 4  ;;  %v881_v40 = vadd.f32 %v807_v10, %v636_v55  ;;  %v1119_v51 = vsel %vm499_vm1, %v1117_v56, %v1118_v25  ;;  %v1553_v60 = vmul.f32 %v5091_v30, %v6241_v31 }
 0x125   : > { %v1748_v1 = vadd.f32 %v1672_v61, %v1504_v17  ;;  %v2392_v11 = vand.u32 4294901760, %v2391_v8  ;;  %v1554_v33 = vmul.f32 %v5091_v30, %v6244_v9  ;;  %v1797_v48 = vmul.f32 %v6196_v54, %v6241_v31 }
 0x126   : > { %v1363_v46 = vsel %vm744_vm0, %v1361_v0, %v1362_v24  ;;  %v949_v37 = vadd.f32 %v917_v62, %v881_v40  ;;  %v1673_v4 = vrot.slane %v1553_v60, 2  ;;  %v1798_v61 = vmul.f32 %v6196_v54, %v6244_v9 }
 0x127   : > { %v1992_v41 = vadd.f32 %v1916_v53, %v1748_v1  ;;  %4441 = vmatprep.mubr.f32.mxu1 %v2392_v11  ;;  %v1674_v56 = vrot.slane %v1554_v33, 2  ;;  %v1917_v58 = vrot.slane %v1797_v48, 4  ;;  %v6299_v17 = vmax.f32 %v259_v52, 0.0 }
 0x128   : > { %v360_v55 = vmul.f32 %v5069_v14, %v5862_v7  ;;  %v1193_v8 = vadd.f32 %v1119_v51, %v949_v37  ;;  %v1918_v0 = vrot.slane %v1798_v61, 4  ;;  %v441_v53 = vmul.f32 %v5071_v15, %v5917_v6 }
 0x129   : > { %v2073_v10 = vsel %vm2002_vm2, %v1992_v41, 0  ;;  %v1675_v1 = vsel %vm499_vm1, %v1673_v4, %v1674_v56  ;;  %v686_v40 = vmul.f32 %v5073_v16, %v5917_v6  ;;  %v918_v60 = vmul.f32 %v5078_v20, %v6049_v38 }
 0x12a   : > { %v6306_v62 = vand.u32 4294901760, %v2073_v10  ;;  %v1437_v52 = vadd.f32 %v1363_v46, %v1193_v8  ;;  %v1919_v7 = vsel %vm744_vm0, %v1917_v58, %v1918_v0  ;;  %v563_v51 = vrot.slane %v441_v53, 2  ;;  %v260_v58 = vld [vmem:[%s5067_s9 + $0x198] sm:$0xff] }
 0x12b   : > { %v999_v11 = vmul.f32 %v5080_v21, %v6106_v19  ;;  %v808_v48 = vrot.slane %v686_v40, 4  ;;  %v1243_v41 = vmul.f32 %v5082_v22, %v6106_v19  ;;  %v1474_v6 = vmul.f32 %v5084_v23, %v6244_v9 }
 0x12c   : > { %7035 = vst [vmem:[#allocation41_spill] sm:$0xff] %v6306_v62  ;;  %v6317_v33 = vsub.f32 %v2073_v10, %v6306_v62  ;;  %v1505_v37 = vadd.f32 %v1473_v39, %v1437_v52  ;;  %v564_v46 = vsel %vm499_vm1, %v561_v59, %v563_v51  ;;  %v1555_v61 = vmul.f32 %v5091_v30, %v6299_v17 }
 0x12d   : > { %v1120_v4 = vrot.slane %v999_v11, 2  ;;  %v637_v53 = vadd.f32 %v564_v46, %v360_v55  ;;  %v809_v10 = vsel %vm744_vm0, %v806_v5, %v808_v48  ;;  %v1364_v40 = vrot.slane %v1243_v41, 4 }
 0x12e   : > { %7036 = vst [vmem:[#allocation42_spill] sm:$0xff] %v6317_v33  ;;  %v2400_v8 = vand.u32 4294901760, %v6317_v33  ;;  %v1749_v42 = vadd.f32 %v1675_v1, %v1505_v37  ;;  %v1676_v47 = vrot.slane %v1555_v61, 2  ;;  %v1799_v39 = vmul.f32 %v6196_v54, %v6299_v17 }
 0x12f   : > { %v1121_v62 = vsel %vm499_vm1, %v1118_v25, %v1120_v4  ;;  %v882_v52 = vadd.f32 %v809_v10, %v637_v53  ;;  %v1365_v51 = vsel %vm744_vm0, %v1362_v24, %v1364_v40  ;;  %v6335_v11 = vmax.f32 %v260_v58, 0.0 }
 0x130   : > { %4592 = vmatmul.mubr.f32.gmra.mrb[22].mxu0 %v2400_v8  ;;  %v2401_v59 = vsub.f32 %v6317_v33, %v2400_v8  ;;  %v1993_v55 = vadd.f32 %v1919_v7, %v1749_v42  ;;  %v1677_v5 = vsel %vm499_vm1, %v1674_v56, %v1676_v47  ;;  %v1920_v48 = vrot.slane %v1799_v39, 4  ;;  %v264_v33 = vld [vmem:[%s5067_s9 + $0x1b8] sm:$0xff] }
 0x131   : > { %v6338_v41 = vmax.f32 %v261_v29, 0.0  ;;  %v950_v25 = vadd.f32 %v918_v60, %v882_v52  ;;  %v361_v37 = vmul.f32 %v5069_v14, %v5953_v2  ;;  %v442_v46 = vmul.f32 %v5071_v15, %v5953_v2 }
 0x132   : > { %v2402_v1 = vand.u32 4294901760, %v2401_v59  ;;  %v2076_v4 = vsel %vm2002_vm2, %v1993_v55, 0  ;;  %v1921_v24 = vsel %vm744_vm0, %v1918_v0, %v1920_v48  ;;  %v6348_v42 = vmul.f32 %v5071_v15, %v5956_v32 }
 0x133   : > { %v687_v47 = vmul.f32 %v5073_v16, %v5953_v2  ;;  %v6352_v29 = vand.u32 4294901760, %v2076_v4  ;;  %v1194_v56 = vadd.f32 %v1121_v62, %v950_v25  ;;  %v565_v60 = vrot.slane %v442_v46, 2 }
 0x134   : > { %4442 = vmatmul.mubr.f32.gmra.mrb[22].mxu1 %v2402_v1  ;;  %v6356_v7 = vmul.f32 %v5073_v16, %v5956_v32  ;;  %v566_v61 = vrot.slane %v6348_v42, 2  ;;  %v919_v0 = vmul.f32 %v5078_v20, %v6142_v26  ;;  %v1000_v8 = vmul.f32 %v5080_v21, %v6142_v26 }
 0x135   : > { %v810_v58 = vrot.slane %v687_v47, 4  ;;  %v6364_v2 = vsub.f32 %v2076_v4, %v6352_v29  ;;  %v1438_v53 = vadd.f32 %v1365_v51, %v1194_v56  ;;  %v1001_v10 = vmul.f32 %v5080_v21, %v6144_v13 }
 0x136   : > { %v811_v62 = vrot.slane %v6356_v7, 4  ;;  %v567_v40 = vsel %vm499_vm1, %v565_v60, %v566_v61  ;;  %v1122_v39 = vrot.slane %v1000_v8, 2  ;;  %v1244_v59 = vmul.f32 %v5082_v22, %v6142_v26  ;;  %v262_v8 = vld [vmem:[%s5067_s9 + $0x1a8] sm:$0xf] }
 0x137   : > { %7037 = vst [vmem:[#allocation43_spill] sm:$0xff] %v6364_v2  ;;  %v6374_v52 = vmul.f32 %v5082_v22, %v6144_v13  ;;  %v2410_v55 = vand.u32 4294901760, %v6364_v2  ;;  %v1506_v48 = vadd.f32 %v1474_v6, %v1438_v53  ;;  %v638_v51 = vadd.f32 %v567_v40, %v361_v37 }
 0x138   : > { %v812_v1 = vsel %vm744_vm0, %v810_v58, %v811_v62  ;;  %v1123_v25 = vrot.slane %v1001_v10, 2  ;;  %v1366_v46 = vrot.slane %v1244_v59, 4  ;;  %v1475_v42 = vmul.f32 %v5084_v23, %v6335_v11 }
 0x139   : > { %v1367_v4 = vrot.slane %v6374_v52, 4  ;;  %4594 = vmatprep.mubr.f32.mxu0 %v2410_v55  ;;  %v1750_v47 = vadd.f32 %v1677_v5, %v1506_v48  ;;  %v2411_v56 = vsub.f32 %v6364_v2, %v2410_v55  ;;  %v883_v60 = vadd.f32 %v812_v1, %v638_v51 }
 0x13a   : > { %v1556_v7 = vmul.f32 %v5091_v30, %v6335_v11  ;;  %v1124_v6 = vsel %vm499_vm1, %v1122_v39, %v1123_v25  ;;  %v1557_v58 = vmul.f32 %v5091_v30, %v6338_v41  ;;  %v1800_v53 = vmul.f32 %v6196_v54, %v6335_v11 }
 0x13b   : > { %v1368_v37 = vsel %vm744_vm0, %v1366_v46, %v1367_v4  ;;  %v1994_v10 = vadd.f32 %v1921_v24, %v1750_v47  ;;  %v2412_v40 = vand.u32 4294901760, %v2411_v56  ;;  %v951_v5 = vadd.f32 %v919_v0, %v883_v60 }
 0x13c   : > { %v1678_v59 = vrot.slane %v1556_v7, 2  ;;  %v1679_v52 = vrot.slane %v1557_v58, 2  ;;  %v1801_v55 = vmul.f32 %v6196_v54, %v6338_v41  ;;  %v1922_v48 = vrot.slane %v1800_v53, 4 }
 0x13d   : > { %v6393_v51 = vmax.f32 %v262_v8, 0.0  ;;  %v2079_v39 = vsel %vm2002_vm2, %v1994_v10, 0  ;;  %4444 = vmatprep.mubr.f32.mxu1 %v2412_v40  ;;  %v1195_v1 = vadd.f32 %v1124_v6, %v951_v5  ;;  %v362_v46 = vmul.f32 %v5069_v14, %v5956_v32 }
 0x13e   : > { %v444_v24 = vmul.f32 %v5071_v15, %v6011_v63  ;;  %v6400_v47 = vand.u32 4294901760, %v2079_v39  ;;  %v1680_v0 = vsel %vm499_vm1, %v1678_v59, %v1679_v52  ;;  %v1923_v56 = vrot.slane %v1801_v55, 4  ;;  %v263_v55 = vld [vmem:[%s5067_s9 + $0x1b0] sm:$0xff] }
 0x13f   : > { %v689_v60 = vmul.f32 %v5073_v16, %v6011_v63  ;;  %v1439_v7 = vadd.f32 %v1368_v37, %v1195_v1  ;;  %v920_v6 = vmul.f32 %v5078_v20, %v6144_v13  ;;  %v1002_v32 = vmul.f32 %v5080_v21, %v6203_v49 }
 0x140   : > { %7038 = vst [vmem:[#allocation44_spill] sm:$0xff] %v6400_v47  ;;  %v568_v8 = vrot.slane %v444_v24, 2  ;;  %v6410_v58 = vsub.f32 %v2079_v39, %v6400_v47  ;;  %v1924_v53 = vsel %vm744_vm0, %v1922_v48, %v1923_v56  ;;  %v1246_v40 = vmul.f32 %v5082_v22, %v6203_v49 }
 0x141   : > { %v813_v10 = vrot.slane %v689_v60, 4  ;;  %v1507_v5 = vadd.f32 %v1475_v42, %v1439_v7  ;;  %v1125_v37 = vrot.slane %v1002_v32, 2  ;;  %v1476_v59 = vmul.f32 %v5084_v23, %v6338_v41 }
 0x142   : > { %v569_v63 = vsel %vm499_vm1, %v566_v61, %v568_v8  ;;  %v2420_v1 = vand.u32 4294901760, %v6410_v58  ;;  %v1369_v2 = vrot.slane %v1246_v40, 4  ;;  %v1558_v42 = vmul.f32 %v5091_v30, %v6393_v51 }
 0x143   : > { %v639_v24 = vadd.f32 %v569_v63, %v362_v46  ;;  %v814_v39 = vsel %vm744_vm0, %v811_v62, %v813_v10  ;;  %v1751_v48 = vadd.f32 %v1680_v0, %v1507_v5  ;;  %v1126_v60 = vsel %vm499_vm1, %v1123_v25, %v1125_v37 }
 0x144   : > { %v1802_v61 = vmul.f32 %v6196_v54, %v6393_v51  ;;  %4595 = vmatmul.mubr.f32.gmra.mrb[24].mxu0 %v2420_v1  ;;  %v2421_v7 = vsub.f32 %v6410_v58, %v2420_v1  ;;  %v1370_v32 = vsel %vm744_vm0, %v1367_v4, %v1369_v2  ;;  %v323_v46 = vmax.f32 %v263_v55, 0.0 }
 0x145   : > { %v884_v8 = vadd.f32 %v814_v39, %v639_v24  ;;  %v1995_v63 = vadd.f32 %v1924_v53, %v1751_v48  ;;  %v1681_v62 = vrot.slane %v1558_v42, 2  ;;  %v6429_v40 = vmax.f32 %v264_v33, 0.0 }
 0x146   : > { %v1925_v10 = vrot.slane %v1802_v61, 4  ;;  %v2422_v0 = vand.u32 4294901760, %v2421_v7  ;;  %v363_v5 = vmul.f32 %v5069_v14, %v6047_v50  ;;  %v445_v37 = vmul.f32 %v5071_v15, %v6047_v50 }
 0x147   : > { %v952_v25 = vadd.f32 %v920_v6, %v884_v8  ;;  %v2082_v47 = vsel %vm2002_vm2, %v1995_v63, 0  ;;  %v1682_v1 = vsel %vm499_vm1, %v1679_v52, %v1681_v62  ;;  %v6440_v4 = vmul.f32 %v5071_v15, %v6049_v38 }
 0x148   : > { %v1926_v2 = vsel %vm744_vm0, %v1923_v56, %v1925_v10  ;;  %v6442_v33 = vand.u32 4294901760, %v2082_v47  ;;  %4445 = vmatmul.mubr.f32.gmra.mrb[24].mxu1 %v2422_v0  ;;  %v570_v53 = vrot.slane %v445_v37, 2  ;;  %v690_v55 = vmul.f32 %v5073_v16, %v6047_v50 }
 0x149   : > { %v1196_v6 = vadd.f32 %v1126_v60, %v952_v25  ;;  %v571_v24 = vrot.slane %v6440_v4, 2  ;;  %v6449_v39 = vmul.f32 %v5073_v16, %v6049_v38  ;;  %v921_v52 = vmul.f32 %v5078_v20, %v6241_v31 }
 0x14a   : > { %v1003_v56 = vmul.f32 %v5080_v21, %v6241_v31  ;;  %v6456_v48 = vsub.f32 %v2082_v47, %v6442_v33  ;;  %v815_v42 = vrot.slane %v690_v55, 4  ;;  %v6460_v50 = vmul.f32 %v5080_v21, %v6244_v9 }
 0x14b   : > { %v1440_v60 = vadd.f32 %v1370_v32, %v1196_v6  ;;  %v572_v61 = vsel %vm499_vm1, %v570_v53, %v571_v24  ;;  %v816_v7 = vrot.slane %v6449_v39, 4  ;;  %v1247_v63 = vmul.f32 %v5082_v22, %v6241_v31 }
 0x14c   : > { %7039 = vst [vmem:[#allocation45_spill] sm:$0xff] %v6456_v48  ;;  %v1127_v8 = vrot.slane %v1003_v56, 2  ;;  %v2430_v62 = vand.u32 4294901760, %v6456_v48  ;;  %v640_v47 = vadd.f32 %v572_v61, %v363_v5  ;;  %v1128_v32 = vrot.slane %v6460_v50, 2 }
 0x14d   : > { %v1508_v10 = vadd.f32 %v1476_v59, %v1440_v60  ;;  %v817_v0 = vsel %vm744_vm0, %v815_v42, %v816_v7  ;;  %v1248_v25 = vmul.f32 %v5082_v22, %v6244_v9  ;;  %v1371_v37 = vrot.slane %v1247_v63, 4  ;;  %v265_v60 = vld [vmem:[%s5067_s9 + $0x1c0] sm:$0xf] }
 0x14e   : > { %v1477_v4 = vmul.f32 %v5084_v23, %v323_v46  ;;  %4597 = vmatprep.mubr.f32.mxu0 %v2430_v62  ;;  %v2431_v53 = vsub.f32 %v6456_v48, %v2430_v62  ;;  %v885_v31 = vadd.f32 %v817_v0, %v640_v47  ;;  %v1129_v55 = vsel %vm499_vm1, %v1127_v8, %v1128_v32 }
 0x14f   : > { %v1752_v6 = vadd.f32 %v1682_v1, %v1508_v10  ;;  %v1372_v59 = vrot.slane %v1248_v25, 4  ;;  %v1559_v5 = vmul.f32 %v5091_v30, %v323_v46  ;;  %v1560_v39 = vmul.f32 %v5091_v30, %v6429_v40 }
 0x150   : > { %v1803_v56 = vmul.f32 %v6196_v54, %v323_v46  ;;  %v2432_v50 = vand.u32 4294901760, %v2431_v53  ;;  %v953_v61 = vadd.f32 %v921_v52, %v885_v31  ;;  %v6481_v1 = vmul.f32 %v6196_v54, %v6429_v40 }
 0x151   : > { %v1996_v42 = vadd.f32 %v1926_v2, %v1752_v6  ;;  %v1373_v63 = vsel %vm744_vm0, %v1371_v37, %v1372_v59  ;;  %v1683_v62 = vrot.slane %v1559_v5, 2  ;;  %v1684_v8 = vrot.slane %v1560_v39, 2 }
 0x152   : > { %v1927_v10 = vrot.slane %v1803_v56, 4  ;;  %4447 = vmatprep.mubr.f32.mxu1 %v2432_v50  ;;  %v1197_v0 = vadd.f32 %v1129_v55, %v953_v61  ;;  %v6995_v25 = vrot.slane %v6481_v1, 4  ;;  %v325_v46 = vmax.f32 %v265_v60, 0.0 }
 0x153   : > { %v2085_v47 = vsel %vm2002_vm2, %v1996_v42, 0  ;;  %v1685_v2 = vsel %vm499_vm1, %v1683_v62, %v1684_v8  ;;  %v447_v52 = vmul.f32 %v5071_v15, %v6106_v19  ;;  %v364_v53 = vmul.f32 %v5069_v14, %v6049_v38 }
 0x154   : > { %v6486_v48 = vand.u32 4294901760, %v2085_v47  ;;  %v1441_v6 = vadd.f32 %v1373_v63, %v1197_v0  ;;  %v1929_v37 = vsel %vm744_vm0, %v1927_v10, %v6995_v25  ;;  %v692_v31 = vmul.f32 %v5073_v16, %v6106_v19  ;;  %v266_v25 = vld [vmem:[%s5067_s9 + $0x1c8] sm:$0xff] }
 0x155   : > { %v573_v5 = vrot.slane %v447_v52, 2  ;;  %v1005_v39 = vmul.f32 %v5080_v21, %v6299_v17  ;;  %v1249_v56 = vmul.f32 %v5082_v22, %v6299_v17  ;;  %v922_v38 = vmul.f32 %v5078_v20, %v6244_v9  ;;  %v267_v17 = vld [vmem:[%s5067_s9 + $0x1d0] sm:$0xff] }
 0x156   : > { %v6499_v55 = vsub.f32 %v2085_v47, %v6486_v48  ;;  %v1509_v60 = vadd.f32 %v1477_v4, %v1441_v6  ;;  %v818_v42 = vrot.slane %v692_v31, 4  ;;  %v1561_v50 = vmul.f32 %v5091_v30, %v325_v46 }
 0x157   : > { %v574_v61 = vsel %vm499_vm1, %v571_v24, %v573_v5  ;;  %v1130_v63 = vrot.slane %v1005_v39, 2  ;;  %v1374_v62 = vrot.slane %v1249_v56, 4  ;;  %v1478_v6 = vmul.f32 %v5084_v23, %v6429_v40 }
 0x158   : > { %v2440_v19 = vand.u32 4294901760, %v6499_v55  ;;  %v1753_v10 = vadd.f32 %v1685_v2, %v1509_v60  ;;  %v641_v47 = vadd.f32 %v574_v61, %v364_v53  ;;  %v819_v0 = vsel %vm744_vm0, %v816_v7, %v818_v42 }
 0x159   : > { %v1686_v52 = vrot.slane %v1561_v50, 2  ;;  %v1131_v9 = vsel %vm499_vm1, %v1128_v32, %v1130_v63  ;;  %v1805_v31 = vmul.f32 %v6196_v54, %v325_v46  ;;  %v1375_v2 = vsel %vm744_vm0, %v1372_v59, %v1374_v62 }
 0x15a   : > { %4598 = vmatmul.mubr.f32.gmra.mrb[26].mxu0 %v2440_v19  ;;  %v2441_v4 = vsub.f32 %v6499_v55, %v2440_v19  ;;  %v1997_v24 = vadd.f32 %v1929_v37, %v1753_v10  ;;  %v886_v5 = vadd.f32 %v819_v0, %v641_v47  ;;  %v326_v56 = vmax.f32 %v266_v25, 0.0 }
 0x15b   : > { %v1687_v53 = vsel %vm499_vm1, %v1684_v8, %v1686_v52  ;;  %v1930_v39 = vrot.slane %v1805_v31, 4  ;;  %v6520_v60 = vmax.f32 %v267_v17, 0.0  ;;  %v448_v32 = vmul.f32 %v5071_v15, %v6142_v26 }
 0x15c   : > { %v2442_v7 = vand.u32 4294901760, %v2441_v4  ;;  %v2088_v42 = vsel %vm2002_vm2, %v1997_v24, 0  ;;  %v954_v50 = vadd.f32 %v922_v38, %v886_v5  ;;  %v6527_v40 = vmul.f32 %v5071_v15, %v6144_v13 }
 0x15d   : > { %v6529_v46 = vand.u32 4294901760, %v2088_v42  ;;  %v365_v59 = vmul.f32 %v5069_v14, %v6142_v26  ;;  %v693_v8 = vmul.f32 %v5073_v16, %v6142_v26  ;;  %v6537_v25 = vmul.f32 %v5073_v16, %v6144_v13 }
 0x15e   : > { %4448 = vmatmul.mubr.f32.gmra.mrb[26].mxu1 %v2442_v7  ;;  %v1198_v37 = vadd.f32 %v1131_v9, %v954_v50  ;;  %v575_v38 = vrot.slane %v448_v32, 2  ;;  %v576_v19 = vrot.slane %v6527_v40, 2  ;;  %v923_v61 = vmul.f32 %v5078_v20, %v6335_v11 }
 0x15f   : > { %v6543_v63 = vsub.f32 %v2088_v42, %v6529_v46  ;;  %v820_v62 = vrot.slane %v693_v8, 4  ;;  %v821_v10 = vrot.slane %v6537_v25, 4  ;;  %v1006_v26 = vmul.f32 %v5080_v21, %v6335_v11 }
 0x160   : > { %v1442_v47 = vadd.f32 %v1375_v2, %v1198_v37  ;;  %v577_v0 = vsel %vm499_vm1, %v575_v38, %v576_v19  ;;  %v6551_v52 = vmul.f32 %v5080_v21, %v6338_v41  ;;  %v1250_v17 = vmul.f32 %v5082_v22, %v6335_v11 }
 0x161   : > { %v2450_v4 = vand.u32 4294901760, %v6543_v63  ;;  %v642_v9 = vadd.f32 %v577_v0, %v365_v59  ;;  %v822_v31 = vsel %vm744_vm0, %v820_v62, %v821_v10  ;;  %v1132_v24 = vrot.slane %v1006_v26, 2 }
 0x162   : > { %v1510_v5 = vadd.f32 %v1478_v6, %v1442_v47  ;;  %v1133_v7 = vrot.slane %v6551_v52, 2  ;;  %v1251_v2 = vmul.f32 %v5082_v22, %v6338_v41  ;;  %v1376_v42 = vrot.slane %v1250_v17, 4 }
 0x163   : > { %4600 = vmatprep.mubr.f32.mxu0 %v2450_v4  ;;  %v7040_v50 = vrot.slane %v6481_v1, 4  ;;  %v2451_v11 = vsub.f32 %v6543_v63, %v2450_v4  ;;  %v887_v40 = vadd.f32 %v822_v31, %v642_v9  ;;  %v1562_v59 = vmul.f32 %v5091_v30, %v326_v56  ;;  %v268_v1 = vld [vmem:[%s5067_s9 + $0x1d8] sm:$0xf] }
 0x164   : > { %v1754_v8 = vadd.f32 %v1687_v53, %v1510_v5  ;;  %v1134_v6 = vsel %vm499_vm1, %v1132_v24, %v1133_v7  ;;  %v1377_v25 = vrot.slane %v1251_v2, 4  ;;  %v1563_v37 = vmul.f32 %v5091_v30, %v6520_v60 }
 0x165   : > { %v1931_v32 = vsel %vm744_vm0, %v7040_v50, %v1930_v39  ;;  %v2452_v38 = vand.u32 4294901760, %v2451_v11  ;;  %v955_v62 = vadd.f32 %v923_v61, %v887_v40  ;;  %v1688_v26 = vrot.slane %v1562_v59, 2 }
 0x166   : > { %v1806_v47 = vmul.f32 %v6196_v54, %v326_v56  ;;  %v1998_v0 = vadd.f32 %v1931_v32, %v1754_v8  ;;  %v1378_v39 = vsel %vm744_vm0, %v1376_v42, %v1377_v25  ;;  %v1689_v52 = vrot.slane %v1563_v37, 2 }
 0x167   : > { %v1807_v17 = vmul.f32 %v6196_v54, %v6520_v60  ;;  %4450 = vmatprep.mubr.f32.mxu1 %v2452_v38  ;;  %v1199_v53 = vadd.f32 %v1134_v6, %v955_v62  ;;  %v1479_v4 = vmul.f32 %v5084_v23, %v326_v56  ;;  %v328_v61 = vmax.f32 %v268_v1, 0.0 }
 0x168   : > { %v1932_v9 = vrot.slane %v1806_v47, 4  ;;  %v2091_v31 = vsel %vm2002_vm2, %v1998_v0, 0  ;;  %v450_v5 = vmul.f32 %v5071_v15, %v6203_v49  ;;  %v366_v42 = vmul.f32 %v5069_v14, %v6144_v13 }
 0x169   : > { %v1933_v24 = vrot.slane %v1807_v17, 4  ;;  %v6577_v2 = vand.u32 4294901760, %v2091_v31  ;;  %v1443_v50 = vadd.f32 %v1378_v39, %v1199_v53  ;;  %v695_v32 = vmul.f32 %v5073_v16, %v6203_v49 }
 0x16a   : > { %v1690_v11 = vsel %vm499_vm1, %v1688_v26, %v1689_v52  ;;  %v578_v56 = vrot.slane %v450_v5, 2  ;;  %v1008_v40 = vmul.f32 %v5080_v21, %v6393_v51  ;;  %v1252_v59 = vmul.f32 %v5082_v22, %v6393_v51 }
 0x16b   : > { %v6589_v15 = vsub.f32 %v2091_v31, %v6577_v2  ;;  %v1511_v8 = vadd.f32 %v1479_v4, %v1443_v50  ;;  %v823_v6 = vrot.slane %v695_v32, 4  ;;  %v1934_v37 = vsel %vm744_vm0, %v1932_v9, %v1933_v24 }
 0x16c   : > { %v579_v14 = vsel %vm499_vm1, %v576_v19, %v578_v56  ;;  %v924_v16 = vmul.f32 %v5078_v20, %v6338_v41  ;;  %v1135_v13 = vrot.slane %v1008_v40, 2  ;;  %v1379_v22 = vrot.slane %v1252_v59, 4  ;;  %v7043_v59 = vld [vmem:[#allocation18_spill] sm:$0xff] }
 0x16d   : > { %v2460_v49 = vand.u32 4294901760, %v6589_v15  ;;  %v1755_v38 = vadd.f32 %v1690_v11, %v1511_v8  ;;  %v643_v21 = vadd.f32 %v579_v14, %v366_v42  ;;  %v824_v62 = vsel %vm744_vm0, %v821_v10, %v823_v6  ;;  %v7044_v8 = vld [vmem:[#allocation20_spill] sm:$0xff]  ;;  %v7045_v6 = vld [vmem:[#allocation22_spill] sm:$0xff] }
 0x16e   : > { %v1564_v51 = vmul.f32 %v5091_v30, %v328_v61  ;;  %v1136_v19 = vsel %vm499_vm1, %v1133_v7, %v1135_v13  ;;  %v1808_v0 = vmul.f32 %v6196_v54, %v328_v61  ;;  %v1380_v10 = vsel %vm744_vm0, %v1377_v25, %v1379_v22  ;;  %v7047_v14 = vld [vmem:[#allocation26_spill] sm:$0xff]  ;;  %v7054_v22 = vld [vmem:[#allocation41_spill] sm:$0xff] }
 0x16f   : > { %4601 = vmatmul.mubr.f32.gmra.mrb[28].mxu0 %v2460_v49  ;;  %v1999_v26 = vadd.f32 %v1934_v37, %v1755_v38  ;;  %v2461_v47 = vsub.f32 %v6589_v15, %v2460_v49  ;;  %v888_v1 = vadd.f32 %v824_v62, %v643_v21  ;;  %v1480_v4 = vmul.f32 %v5084_v23, %v6520_v60  ;;  %v7046_v37 = vld [vmem:[#allocation24_spill] sm:$0xff]  ;;  %v7049_v13 = vld [vmem:[#allocation30_spill] sm:$0xff]  ;;  %v7052_v21 = vld [vmem:[#allocation37_spill] sm:$0xff] }
 0x170   : > { %v1691_v53 = vrot.slane %v1564_v51, 2  ;;  %v1935_v7 = vrot.slane %v1808_v0, 4  ;;  %v7050_v49 = vld [vmem:[#allocation32_spill] sm:$0xff]  ;;  %v7051_v38 = vld [vmem:[#allocation34_spill] sm:$0xff]  ;;  %v7053_v62 = vld [vmem:[#allocation39_spill] sm:$0xff] }
 0x171   : > { %v2094_v20 = vsel %vm2002_vm2, %v1999_v26, 0  ;;  %v2462_v41 = vand.u32 4294901760, %v2461_v47  ;;  %v956_v39 = vadd.f32 %v924_v16, %v888_v1  ;;  %v7048_v16 = vld [vmem:[#allocation28_spill] sm:$0xff]  ;;  %v7056_v26 = vld [vmem:[#allocation5_spill] sm:$0xff]  ;;  %v7057_v47 = vld [vmem:[#allocation6_spill] sm:$0xff] }
 0x172   : > { %v6602_v17 = vand.u32 4294901760, %v2094_v20  ;;  %v1692_v61 = vsel %vm499_vm1, %v1689_v52, %v1691_v53  ;;  %v1936_v50 = vsel %vm744_vm0, %v1933_v24, %v1935_v7  ;;  %v7055_v51 = vld [vmem:[#allocation44_spill] sm:$0xff]  ;;  %v7058_v1 = vld [vmem:[#allocation7_spill] sm:$0xff]  ;;  %v7074_v53 = vld [vmem:[#allocation33_spill] sm:$0xff] }
 0x173   : > { %4451 = vmatmul.mubr.f32.gmra.mrb[28].mxu1 %v2462_v41  ;;  %v1200_v30 = vadd.f32 %v1136_v19, %v956_v39  ;;  %v7059_v19 = vld [vmem:[#allocation8_spill] sm:$0xff]  ;;  %v7069_v0 = vld [vmem:[#allocation23_spill] sm:$0xff]  ;;  %v7072_v39 = vld [vmem:[#allocation29_spill] sm:$0xff] }
 0x174   : > { %v6608_v9 = vsub.f32 %v2094_v20, %v6602_v17  ;;  %v7070_v20 = vld [vmem:[#allocation25_spill] sm:$0xff]  ;;  %v7071_v41 = vld [vmem:[#allocation27_spill] sm:$0xff]  ;;  %v7077_v7 = vld [vmem:[#allocation38_spill] sm:$0xff] }
 0x175   : > { %v1444_v31 = vadd.f32 %v1380_v10, %v1200_v30  ;;  %v7073_v10 = vld [vmem:[#allocation31_spill] sm:$0xff] }
 0x176   : > { %v2470_v54 = vand.u32 4294901760, %v6608_v9  ;;  %v7075_v30 = vld [vmem:[#allocation35_spill] sm:$0xff] }
 0x177   : > { %v1512_v5 = vadd.f32 %v1480_v4, %v1444_v31  ;;  %v7076_v4 = vld [vmem:[#allocation36_spill] sm:$0xff] }
 0x178   : > { %4603 = vmatprep.mubr.f32.mxu0 %v2470_v54  ;;  %v2471_v25 = vsub.f32 %v6608_v9, %v2470_v54  ;;  %v7078_v31 = vld [vmem:[#allocation40_spill] sm:$0xff]  ;;  %v7079_v54 = vld [vmem:[#allocation42_spill] sm:$0xff] }
 0x179   : > { %v1756_v42 = vadd.f32 %v1692_v61, %v1512_v5  ;;  %v7081_v61 = vld [vmem:[#allocation45_spill] sm:$0xff] }
 0x17a   : > { %v2472_v32 = vand.u32 4294901760, %v2471_v25 }
 0x17b   : > { %v2000_v11 = vadd.f32 %v1936_v50, %v1756_v42 }
 0x17c   : > { %4453 = vmatprep.mubr.f32.mxu1 %v2472_v32 }
 0x17d   : > { %v2097_v23 = vsel %vm2002_vm2, %v2000_v11, 0 }
 0x17e   : > { %v6615_v60 = vand.u32 4294901760, %v2097_v23 }
 0x180   : > { %v6618_v56 = vsub.f32 %v2097_v23, %v6615_v60 }
 0x182   : > { %v2480_v40 = vand.u32 4294901760, %v6618_v56 }
 0x184   : > { %4604 = vmatmul.mubr.f32.gmra.mrb[30].mxu0 %v2480_v40  ;;  %v2481_v52 = vsub.f32 %v6618_v56, %v2480_v40 }
 0x185   : > { %4608 = vmatprep.mubr.f32.mxu0 %v5208_v36 }
 0x186   : > { %v2482_v24 = vand.u32 4294901760, %v2481_v52 }
 0x188   : > { %4454 = vmatmul.mubr.f32.gmra.mrb[30].mxu1 %v2482_v24  ;;  %4609 = vmatmul.mubr.f32.vlgmr.msra.gmra.mrb[0].mxu0 %v5250_v43 }
 0x189   : > { %4458 = vmatprep.mubr.f32.mxu1 %v5208_v36  ;;  %4611 = vmatprep.mubr.f32.mxu0 %v5299_v44 }
 0x18a   : > { %4657 = vmatpush3.msra.mxu0 %v5051_v3  ;;  %v7041_v3 = vld [vmem:[#allocation14_spill] sm:$0xff] }
 0x18c   : > { %4459 = vmatmul.mubr.f32.vlgmr.msra.gmra.mrb[0].mxu1 %v5250_v43  ;;  %4612 = vmatmul.mubr.f32.gmra.mrb[2].mxu0 %v5361_v27 }
 0x18d   : > { %4507 = vmatpush3.msra.mxu1 %v5100_v34  ;;  %4461 = vmatprep.mubr.f32.mxu1 %v5299_v44  ;;  %v7042_v34 = vld [vmem:[#allocation16_spill] sm:$0xff] }
 0x18e   : > { %4614 = vmatprep.mubr.f32.mxu0 %v5401_v35 }
 0x190   : > { %4462 = vmatmul.mubr.f32.gmra.mrb[2].mxu1 %v5361_v27  ;;  %4615 = vmatmul.mubr.f32.gmra.mrb[4].mxu0 %v5453_v57 }
 0x191   : > { %4464 = vmatprep.mubr.f32.mxu1 %v5401_v35  ;;  %4617 = vmatprep.mubr.f32.mxu0 %v5491_v45 }
 0x194   : > { %4465 = vmatmul.mubr.f32.gmra.mrb[4].mxu1 %v5453_v57  ;;  %4618 = vmatmul.mubr.f32.gmra.mrb[6].mxu0 %v5546_v28 }
 0x195   : > { %4467 = vmatprep.mubr.f32.mxu1 %v5491_v45  ;;  %4620 = vmatprep.mubr.f32.mxu0 %v5592_v12 }
 0x198   : > { %4468 = vmatmul.mubr.f32.gmra.mrb[6].mxu1 %v5546_v28  ;;  %4621 = vmatmul.mubr.f32.gmra.mrb[8].mxu0 %v7041_v3 }
 0x199   : > { %4470 = vmatprep.mubr.f32.mxu1 %v5592_v12  ;;  %4623 = vmatprep.mubr.f32.mxu0 %v7042_v34 }
 0x19c   : > { %4471 = vmatmul.mubr.f32.gmra.mrb[8].mxu1 %v7041_v3  ;;  %4624 = vmatmul.mubr.f32.gmra.mrb[10].mxu0 %v7043_v59 }
 0x19d   : > { %4473 = vmatprep.mubr.f32.mxu1 %v7042_v34  ;;  %4626 = vmatprep.mubr.f32.mxu0 %v7044_v8 }
 0x1a0   : > { %4474 = vmatmul.mubr.f32.gmra.mrb[10].mxu1 %v7043_v59  ;;  %4627 = vmatmul.mubr.f32.gmra.mrb[12].mxu0 %v7045_v6 }
 0x1a1   : > { %4476 = vmatprep.mubr.f32.mxu1 %v7044_v8  ;;  %4629 = vmatprep.mubr.f32.mxu0 %v7046_v37 }
 0x1a4   : > { %4477 = vmatmul.mubr.f32.gmra.mrb[12].mxu1 %v7045_v6  ;;  %4630 = vmatmul.mubr.f32.gmra.mrb[14].mxu0 %v7047_v14 }
 0x1a5   : > { %4479 = vmatprep.mubr.f32.mxu1 %v7046_v37  ;;  %4632 = vmatprep.mubr.f32.mxu0 %v7048_v16 }
 0x1a8   : > { %4480 = vmatmul.mubr.f32.gmra.mrb[14].mxu1 %v7047_v14  ;;  %4633 = vmatmul.mubr.f32.gmra.mrb[16].mxu0 %v7049_v13 }
 0x1a9   : > { %4482 = vmatprep.mubr.f32.mxu1 %v7048_v16  ;;  %4635 = vmatprep.mubr.f32.mxu0 %v7050_v49 }
 0x1ac   : > { %4483 = vmatmul.mubr.f32.gmra.mrb[16].mxu1 %v7049_v13  ;;  %4636 = vmatmul.mubr.f32.gmra.mrb[18].mxu0 %v7051_v38 }
 0x1ad   : > { %4485 = vmatprep.mubr.f32.mxu1 %v7050_v49  ;;  %4638 = vmatprep.mubr.f32.mxu0 %v6155_v18 }
 0x1b0   : > { %4486 = vmatmul.mubr.f32.gmra.mrb[18].mxu1 %v7051_v38  ;;  %4639 = vmatmul.mubr.f32.gmra.mrb[20].mxu0 %v7052_v21 }
 0x1b1   : > { %4488 = vmatprep.mubr.f32.mxu1 %v6155_v18  ;;  %4641 = vmatprep.mubr.f32.mxu0 %v7053_v62 }
 0x1b4   : > { %4489 = vmatmul.mubr.f32.gmra.mrb[20].mxu1 %v7052_v21  ;;  %4642 = vmatmul.mubr.f32.gmra.mrb[22].mxu0 %v7054_v22 }
 0x1b5   : > { %4491 = vmatprep.mubr.f32.mxu1 %v7053_v62  ;;  %4644 = vmatprep.mubr.f32.mxu0 %v6352_v29 }
 0x1b8   : > { %4492 = vmatmul.mubr.f32.gmra.mrb[22].mxu1 %v7054_v22  ;;  %4645 = vmatmul.mubr.f32.gmra.mrb[24].mxu0 %v7055_v51 }
 0x1b9   : > { %4494 = vmatprep.mubr.f32.mxu1 %v6352_v29  ;;  %4647 = vmatprep.mubr.f32.mxu0 %v6442_v33 }
 0x1bc   : > { %4495 = vmatmul.mubr.f32.gmra.mrb[24].mxu1 %v7055_v51  ;;  %4648 = vmatmul.mubr.f32.gmra.mrb[26].mxu0 %v6486_v48 }
 0x1bd   : > { %4497 = vmatprep.mubr.f32.mxu1 %v6442_v33  ;;  %4650 = vmatprep.mubr.f32.mxu0 %v6529_v46 }
 0x1c0   : > { %4498 = vmatmul.mubr.f32.gmra.mrb[26].mxu1 %v6486_v48  ;;  %4651 = vmatmul.mubr.f32.gmra.mrb[28].mxu0 %v6577_v2 }
 0x1c1   : > { %4500 = vmatprep.mubr.f32.mxu1 %v6529_v46  ;;  %4653 = vmatprep.mubr.f32.mxu0 %v6602_v17 }
 0x1c4   : > { %4501 = vmatmul.mubr.f32.gmra.mrb[28].mxu1 %v6577_v2  ;;  %4654 = vmatmul.mubr.f32.gmra.mrb[30].mxu0 %v6615_v60 }
 0x1c5   : > { %4503 = vmatprep.mubr.f32.mxu1 %v6602_v17  ;;  %4658 = vmatprep.mubr.f32.mxu0 %v5208_v36  ;;  %v7060_v36 = vld [vmem:[#allocation9_spill] sm:$0xff] }
 0x1c8   : > { %4504 = vmatmul.mubr.f32.gmra.mrb[30].mxu1 %v6615_v60  ;;  %4659 = vmatmul.mubr.f32.vlgmr.msra.gmra.mrb[0].mxu0 %v5250_v43  ;;  %v7061_v43 = vld [vmem:[#allocation10_spill] sm:$0xff] }
 0x1c9   : > { %4508 = vmatprep.mubr.f32.mxu1 %v7056_v26  ;;  %4661 = vmatprep.mubr.f32.mxu0 %v5299_v44  ;;  %v7062_v44 = vld [vmem:[#allocation11_spill] sm:$0xff] }
 0x1cc   : > { %4509 = vmatmul.mubr.f32.vlgmr.msra.gmra.mrb[0].mxu1 %v7057_v47  ;;  %4662 = vmatmul.mubr.f32.gmra.mrb[2].mxu0 %v5361_v27  ;;  %v7063_v27 = vld [vmem:[#allocation12_spill] sm:$0xff] }
 0x1cd   : > { %4511 = vmatprep.mubr.f32.mxu1 %v7058_v1  ;;  %4664 = vmatprep.mubr.f32.mxu0 %v5401_v35  ;;  %v7064_v35 = vld [vmem:[#allocation13_spill] sm:$0xff] }
 0x1d0   : > { %4512 = vmatmul.mubr.f32.gmra.mrb[2].mxu1 %v7059_v19  ;;  %4665 = vmatmul.mubr.f32.gmra.mrb[4].mxu0 %v5453_v57  ;;  %v7065_v57 = vld [vmem:[#allocation15_spill] sm:$0xff] }
 0x1d1   : > { %4514 = vmatprep.mubr.f32.mxu1 %v7060_v36  ;;  %4667 = vmatprep.mubr.f32.mxu0 %v5491_v45  ;;  %v7066_v45 = vld [vmem:[#allocation17_spill] sm:$0xff] }
 0x1d4   : > { %4515 = vmatmul.mubr.f32.gmra.mrb[4].mxu1 %v7061_v43  ;;  %4668 = vmatmul.mubr.f32.gmra.mrb[6].mxu0 %v5546_v28  ;;  %v7067_v28 = vld [vmem:[#allocation19_spill] sm:$0xff] }
 0x1d5   : > { %4517 = vmatprep.mubr.f32.mxu1 %v7062_v44  ;;  %4670 = vmatprep.mubr.f32.mxu0 %v5592_v12  ;;  %v7068_v12 = vld [vmem:[#allocation21_spill] sm:$0xff] }
 0x1d8   : > { %4518 = vmatmul.mubr.f32.gmra.mrb[6].mxu1 %v7063_v27  ;;  %4671 = vmatmul.mubr.f32.gmra.mrb[8].mxu0 %v7041_v3 }
 0x1d9   : > { %4520 = vmatprep.mubr.f32.mxu1 %v7064_v35  ;;  %4673 = vmatprep.mubr.f32.mxu0 %v7042_v34 }
 0x1dc   : > { %4521 = vmatmul.mubr.f32.gmra.mrb[8].mxu1 %v7065_v57  ;;  %4674 = vmatmul.mubr.f32.gmra.mrb[10].mxu0 %v7043_v59 }
 0x1dd   : > { %4523 = vmatprep.mubr.f32.mxu1 %v7066_v45  ;;  %4676 = vmatprep.mubr.f32.mxu0 %v7044_v8 }
 0x1e0   : > { %4524 = vmatmul.mubr.f32.gmra.mrb[10].mxu1 %v7067_v28  ;;  %4677 = vmatmul.mubr.f32.gmra.mrb[12].mxu0 %v7045_v6 }
 0x1e1   : > { %4526 = vmatprep.mubr.f32.mxu1 %v7068_v12  ;;  %4679 = vmatprep.mubr.f32.mxu0 %v7046_v37 }
 0x1e4   : > { %4527 = vmatmul.mubr.f32.gmra.mrb[12].mxu1 %v7069_v0  ;;  %4680 = vmatmul.mubr.f32.gmra.mrb[14].mxu0 %v7047_v14 }
 0x1e5   : > { %4529 = vmatprep.mubr.f32.mxu1 %v7070_v20  ;;  %4682 = vmatprep.mubr.f32.mxu0 %v7048_v16 }
 0x1e8   : > { %4530 = vmatmul.mubr.f32.gmra.mrb[14].mxu1 %v7071_v41  ;;  %4683 = vmatmul.mubr.f32.gmra.mrb[16].mxu0 %v7049_v13 }
 0x1e9   : > { %4532 = vmatprep.mubr.f32.mxu1 %v7072_v39  ;;  %4685 = vmatprep.mubr.f32.mxu0 %v7050_v49 }
 0x1ec   : > { %4533 = vmatmul.mubr.f32.gmra.mrb[16].mxu1 %v7073_v10  ;;  %4686 = vmatmul.mubr.f32.gmra.mrb[18].mxu0 %v7051_v38 }
 0x1ed   : > { %4535 = vmatprep.mubr.f32.mxu1 %v7074_v53  ;;  %4688 = vmatprep.mubr.f32.mxu0 %v6155_v18  ;;  %v7080_v18 = vld [vmem:[#allocation43_spill] sm:$0xff] }
 0x1f0   : > { %4536 = vmatmul.mubr.f32.gmra.mrb[18].mxu1 %v7075_v30  ;;  %4689 = vmatmul.mubr.f32.gmra.mrb[20].mxu0 %v7052_v21 }
 0x1f1   : > { %4538 = vmatprep.mubr.f32.mxu1 %v7076_v4  ;;  %4691 = vmatprep.mubr.f32.mxu0 %v7053_v62 }
 0x1f4   : > { %4539 = vmatmul.mubr.f32.gmra.mrb[20].mxu1 %v7077_v7  ;;  %4692 = vmatmul.mubr.f32.gmra.mrb[22].mxu0 %v7054_v22 }
 0x1f5   : > { %4541 = vmatprep.mubr.f32.mxu1 %v7078_v31  ;;  %4694 = vmatprep.mubr.f32.mxu0 %v6352_v29 }
 0x1f8   : > { %4542 = vmatmul.mubr.f32.gmra.mrb[22].mxu1 %v7079_v54  ;;  %4695 = vmatmul.mubr.f32.gmra.mrb[24].mxu0 %v7055_v51 }
 0x1f9   : > { %4544 = vmatprep.mubr.f32.mxu1 %v7080_v18  ;;  %4697 = vmatprep.mubr.f32.mxu0 %v6442_v33 }
 0x1fc   : > { %4545 = vmatmul.mubr.f32.gmra.mrb[24].mxu1 %v6410_v58  ;;  %4698 = vmatmul.mubr.f32.gmra.mrb[26].mxu0 %v6486_v48 }
 0x1fd   : > { %4547 = vmatprep.mubr.f32.mxu1 %v7081_v61  ;;  %4700 = vmatprep.mubr.f32.mxu0 %v6529_v46 }
 0x200   : > { %4548 = vmatmul.mubr.f32.gmra.mrb[26].mxu1 %v6499_v55  ;;  %4701 = vmatmul.mubr.f32.gmra.mrb[28].mxu0 %v6577_v2 }
 0x201   : > { %4550 = vmatprep.mubr.f32.mxu1 %v6543_v63  ;;  %4703 = vmatprep.mubr.f32.mxu0 %v6602_v17 }
 0x204   : > { %4551 = vmatmul.mubr.f32.gmra.mrb[28].mxu1 %v6589_v15  ;;  %4704 = vmatmul.mubr.f32.gmra.mrb[30].mxu0 %v6615_v60 }
 0x205   : > { %4553 = vmatprep.mubr.f32.mxu1 %v6608_v9 }
 0x208   : > { %4554 = vmatmul.mubr.f32.gmra.mrb[30].mxu1 %v6618_v56 }
 0x29b   : > { %v4660_v29 = vpop.f32.mrb[0].mxu0 }
 0x29c   : > { %v3691_v58 = vpop.f32.mrb[1].mxu0 }
 0x29f   : > { %v4510_v33 = vpop.f32.mrb[0].mxu1  ;;  %v4663_v48 = vpop.f32.mrb[2].mxu0 }
 0x2a0   : > { %v4706_v55 = vadd.f32 %v4660_v29, %v4510_v33  ;;  %v2820_v46 = vpop.f32.mrb[1].mxu1  ;;  %v3703_v63 = vpop.f32.mrb[3].mxu0 }
 0x2a1   : > { %v4707_v2 = vadd.f32 %v3691_v58, %v2820_v46 }
 0x2a2   : > { %3883 = vst.msk [vmem:[%s6756_s28 + $0x8] sm:$0xff] %vm3881_vm3, %v4706_v55  ;;  %v3915_v15 = vsel %vm3881_vm3, %v4706_v55, 0.0  ;;  %v3984_v17 = vmul.f32 %v4706_v55, %v4706_v55 }
 0x2a3   : > { %3882 = vst.msk [vmem:[%s6756_s28] sm:$0xff] %vm3881_vm3, %v4707_v2  ;;  %v3914_v9 = vsel %vm3881_vm3, %v4707_v2, 0.0  ;;  %v3983_v5 = vmul.f32 %v4707_v2, %v4707_v2  ;;  %v4513_v50 = vpop.f32.mrb[2].mxu1  ;;  %v4666_v25 = vpop.f32.mrb[4].mxu0 }
 0x2a4   : > { %v4016_v42 = vsel %vm3881_vm3, %v3984_v17, 0.0  ;;  %v3916_v32 = vadd.f32 %v3915_v15, %v3914_v9  ;;  %v4708_v11 = vadd.f32 %v4663_v48, %v4513_v50  ;;  %v2834_v23 = vpop.f32.mrb[3].mxu1  ;;  %v3715_v60 = vpop.f32.mrb[5].mxu0 }
 0x2a5   : > { %v4015_v56 = vsel %vm3881_vm3, %v3983_v5, 0.0  ;;  %v4709_v40 = vadd.f32 %v3703_v63, %v2834_v23 }
 0x2a6   : > { %v4017_v52 = vadd.f32 %v4016_v42, %v4015_v56  ;;  %3885 = vst.msk [vmem:[%s6756_s28 + $0x18] sm:$0xff] %vm3881_vm3, %v4708_v11  ;;  %v3986_v24 = vmul.f32 %v4708_v11, %v4708_v11  ;;  %v3919_v13 = vsel %vm3881_vm3, %v4708_v11, 0.0 }
 0x2a7   : > { %3884 = vst.msk [vmem:[%s6756_s28 + $0x10] sm:$0xff] %vm3881_vm3, %v4709_v40  ;;  %v3917_v3 = vsel %vm3881_vm3, %v4709_v40, 0.0  ;;  %v3985_v34 = vmul.f32 %v4709_v40, %v4709_v40  ;;  %v4516_v59 = vpop.f32.mrb[4].mxu1  ;;  %v4669_v8 = vpop.f32.mrb[6].mxu0 }
 0x2a8   : > { %v3918_v6 = vadd.f32 %v3917_v3, %v3916_v32  ;;  %v4710_v37 = vadd.f32 %v4666_v25, %v4516_v59  ;;  %v2848_v14 = vpop.f32.mrb[5].mxu1  ;;  %v3727_v16 = vpop.f32.mrb[7].mxu0  ;;  %v4020_v22 = vsel %vm3881_vm3, %v3986_v24, 0.0 }
 0x2a9   : > { %v4018_v49 = vsel %vm3881_vm3, %v3985_v34, 0.0  ;;  %v4711_v38 = vadd.f32 %v3715_v60, %v2848_v14 }
 0x2aa   : > { %v4019_v21 = vadd.f32 %v4018_v49, %v4017_v52  ;;  %3887 = vst.msk [vmem:[%s6756_s28 + $0x28] sm:$0xff] %vm3881_vm3, %v4710_v37  ;;  %v3920_v62 = vadd.f32 %v3919_v13, %v3918_v6  ;;  %v3988_v51 = vmul.f32 %v4710_v37, %v4710_v37  ;;  %v3923_v57 = vsel %vm3881_vm3, %v4710_v37, 0.0 }
 0x2ab   : > { %3886 = vst.msk [vmem:[%s6756_s28 + $0x20] sm:$0xff] %vm3881_vm3, %v4711_v38  ;;  %v3921_v26 = vsel %vm3881_vm3, %v4711_v38, 0.0  ;;  %v3987_v47 = vmul.f32 %v4711_v38, %v4711_v38  ;;  %v4519_v1 = vpop.f32.mrb[6].mxu1  ;;  %v4672_v19 = vpop.f32.mrb[8].mxu0 }
 0x2ac   : > { %v3922_v36 = vadd.f32 %v3921_v26, %v3920_v62  ;;  %v4021_v43 = vadd.f32 %v4020_v22, %v4019_v21  ;;  %v4712_v44 = vadd.f32 %v4669_v8, %v4519_v1  ;;  %v2862_v27 = vpop.f32.mrb[7].mxu1  ;;  %v3739_v35 = vpop.f32.mrb[9].mxu0  ;;  %v4024_v20 = vsel %vm3881_vm3, %v3988_v51, 0.0 }
 0x2ad   : > { %v4022_v45 = vsel %vm3881_vm3, %v3987_v47, 0.0  ;;  %v4713_v28 = vadd.f32 %v3727_v16, %v2862_v27 }
 0x2ae   : > { %v4023_v12 = vadd.f32 %v4022_v45, %v4021_v43  ;;  %3889 = vst.msk [vmem:[%s6756_s28 + $0x38] sm:$0xff] %vm3881_vm3, %v4712_v44  ;;  %v3924_v0 = vadd.f32 %v3923_v57, %v3922_v36  ;;  %v3990_v41 = vmul.f32 %v4712_v44, %v4712_v44  ;;  %v3927_v61 = vsel %vm3881_vm3, %v4712_v44, 0.0 }
 0x2af   : > { %3888 = vst.msk [vmem:[%s6756_s28 + $0x30] sm:$0xff] %vm3881_vm3, %v4713_v28  ;;  %v3925_v39 = vsel %vm3881_vm3, %v4713_v28, 0.0  ;;  %v3989_v10 = vmul.f32 %v4713_v28, %v4713_v28  ;;  %v4522_v53 = vpop.f32.mrb[8].mxu1  ;;  %v4675_v30 = vpop.f32.mrb[10].mxu0 }
 0x2b0   : > { %v3926_v4 = vadd.f32 %v3925_v39, %v3924_v0  ;;  %v4025_v7 = vadd.f32 %v4024_v20, %v4023_v12  ;;  %v4714_v31 = vadd.f32 %v4672_v19, %v4522_v53  ;;  %v2876_v54 = vpop.f32.mrb[9].mxu1  ;;  %v3751_v18 = vpop.f32.mrb[11].mxu0  ;;  %v4028_v55 = vsel %vm3881_vm3, %v3990_v41, 0.0 }
 0x2b1   : > { %v4026_v29 = vsel %vm3881_vm3, %v3989_v10, 0.0  ;;  %v4715_v58 = vadd.f32 %v3739_v35, %v2876_v54 }
 0x2b2   : > { %v4027_v33 = vadd.f32 %v4026_v29, %v4025_v7  ;;  %3891 = vst.msk [vmem:[%s6756_s28 + $0x48] sm:$0xff] %vm3881_vm3, %v4714_v31  ;;  %v3928_v48 = vadd.f32 %v3927_v61, %v3926_v4  ;;  %v3992_v46 = vmul.f32 %v4714_v31, %v4714_v31  ;;  %v3931_v32 = vsel %vm3881_vm3, %v4714_v31, 0.0 }
 0x2b3   : > { %3890 = vst.msk [vmem:[%s6756_s28 + $0x40] sm:$0xff] %vm3881_vm3, %v4715_v58  ;;  %v3929_v63 = vsel %vm3881_vm3, %v4715_v58, 0.0  ;;  %v3991_v2 = vmul.f32 %v4715_v58, %v4715_v58  ;;  %v4525_v15 = vpop.f32.mrb[10].mxu1  ;;  %v4678_v17 = vpop.f32.mrb[12].mxu0 }
 0x2b4   : > { %v3930_v9 = vadd.f32 %v3929_v63, %v3928_v48  ;;  %v4029_v5 = vadd.f32 %v4028_v55, %v4027_v33  ;;  %v4716_v50 = vadd.f32 %v4675_v30, %v4525_v15  ;;  %v2890_v25 = vpop.f32.mrb[11].mxu1  ;;  %v3763_v42 = vpop.f32.mrb[13].mxu0  ;;  %v4032_v40 = vsel %vm3881_vm3, %v3992_v46, 0.0 }
 0x2b5   : > { %v4030_v11 = vsel %vm3881_vm3, %v3991_v2, 0.0  ;;  %v4717_v23 = vadd.f32 %v3751_v18, %v2890_v25 }
 0x2b6   : > { %v4031_v60 = vadd.f32 %v4030_v11, %v4029_v5  ;;  %3893 = vst.msk [vmem:[%s6756_s28 + $0x58] sm:$0xff] %vm3881_vm3, %v4716_v50  ;;  %v3932_v56 = vadd.f32 %v3931_v32, %v3930_v9  ;;  %v3994_v52 = vmul.f32 %v4716_v50, %v4716_v50  ;;  %v3935_v13 = vsel %vm3881_vm3, %v4716_v50, 0.0 }
 0x2b7   : > { %3892 = vst.msk [vmem:[%s6756_s28 + $0x50] sm:$0xff] %vm3881_vm3, %v4717_v23  ;;  %v3933_v24 = vsel %vm3881_vm3, %v4717_v23, 0.0  ;;  %v3993_v3 = vmul.f32 %v4717_v23, %v4717_v23  ;;  %v4528_v34 = vpop.f32.mrb[12].mxu1  ;;  %v4681_v59 = vpop.f32.mrb[14].mxu0 }
 0x2b8   : > { %v3934_v8 = vadd.f32 %v3933_v24, %v3932_v56  ;;  %v4033_v6 = vadd.f32 %v4032_v40, %v4031_v60  ;;  %v4718_v37 = vadd.f32 %v4678_v17, %v4528_v34  ;;  %v2904_v14 = vpop.f32.mrb[13].mxu1  ;;  %v3775_v16 = vpop.f32.mrb[15].mxu0  ;;  %v4036_v22 = vsel %vm3881_vm3, %v3994_v52, 0.0 }
 0x2b9   : > { %v4034_v49 = vsel %vm3881_vm3, %v3993_v3, 0.0  ;;  %v4719_v38 = vadd.f32 %v3763_v42, %v2904_v14 }
 0x2ba   : > { %v4035_v21 = vadd.f32 %v4034_v49, %v4033_v6  ;;  %3895 = vst.msk [vmem:[%s6756_s28 + $0x68] sm:$0xff] %vm3881_vm3, %v4718_v37  ;;  %v3936_v62 = vadd.f32 %v3935_v13, %v3934_v8  ;;  %v3996_v51 = vmul.f32 %v4718_v37, %v4718_v37  ;;  %v3939_v57 = vsel %vm3881_vm3, %v4718_v37, 0.0 }
 0x2bb   : > { %3894 = vst.msk [vmem:[%s6756_s28 + $0x60] sm:$0xff] %vm3881_vm3, %v4719_v38  ;;  %v3937_v26 = vsel %vm3881_vm3, %v4719_v38, 0.0  ;;  %v3995_v47 = vmul.f32 %v4719_v38, %v4719_v38  ;;  %v4531_v1 = vpop.f32.mrb[14].mxu1  ;;  %v4684_v19 = vpop.f32.mrb[16].mxu0 }
 0x2bc   : > { %v3938_v36 = vadd.f32 %v3937_v26, %v3936_v62  ;;  %v4037_v43 = vadd.f32 %v4036_v22, %v4035_v21  ;;  %v4720_v44 = vadd.f32 %v4681_v59, %v4531_v1  ;;  %v2918_v27 = vpop.f32.mrb[15].mxu1  ;;  %v3787_v35 = vpop.f32.mrb[17].mxu0  ;;  %v4040_v20 = vsel %vm3881_vm3, %v3996_v51, 0.0 }
 0x2bd   : > { %v4038_v45 = vsel %vm3881_vm3, %v3995_v47, 0.0  ;;  %v4721_v28 = vadd.f32 %v3775_v16, %v2918_v27 }
 0x2be   : > { %v4039_v12 = vadd.f32 %v4038_v45, %v4037_v43  ;;  %3897 = vst.msk [vmem:[%s6756_s28 + $0x78] sm:$0xff] %vm3881_vm3, %v4720_v44  ;;  %v3940_v0 = vadd.f32 %v3939_v57, %v3938_v36  ;;  %v3998_v41 = vmul.f32 %v4720_v44, %v4720_v44  ;;  %v3943_v61 = vsel %vm3881_vm3, %v4720_v44, 0.0 }
 0x2bf   : > { %3896 = vst.msk [vmem:[%s6756_s28 + $0x70] sm:$0xff] %vm3881_vm3, %v4721_v28  ;;  %v3941_v39 = vsel %vm3881_vm3, %v4721_v28, 0.0  ;;  %v3997_v10 = vmul.f32 %v4721_v28, %v4721_v28  ;;  %v4534_v53 = vpop.f32.mrb[16].mxu1  ;;  %v4687_v30 = vpop.f32.mrb[18].mxu0 }
 0x2c0   : > { %v3942_v4 = vadd.f32 %v3941_v39, %v3940_v0  ;;  %v4041_v7 = vadd.f32 %v4040_v20, %v4039_v12  ;;  %v4722_v31 = vadd.f32 %v4684_v19, %v4534_v53  ;;  %v2932_v54 = vpop.f32.mrb[17].mxu1  ;;  %v3799_v18 = vpop.f32.mrb[19].mxu0  ;;  %v4044_v55 = vsel %vm3881_vm3, %v3998_v41, 0.0 }
 0x2c1   : > { %v4042_v29 = vsel %vm3881_vm3, %v3997_v10, 0.0  ;;  %v4723_v58 = vadd.f32 %v3787_v35, %v2932_v54 }
 0x2c2   : > { %v4043_v33 = vadd.f32 %v4042_v29, %v4041_v7  ;;  %3899 = vst.msk [vmem:[%s6756_s28 + $0x88] sm:$0xff] %vm3881_vm3, %v4722_v31  ;;  %v3944_v48 = vadd.f32 %v3943_v61, %v3942_v4  ;;  %v4000_v46 = vmul.f32 %v4722_v31, %v4722_v31  ;;  %v3947_v32 = vsel %vm3881_vm3, %v4722_v31, 0.0 }
 0x2c3   : > { %3898 = vst.msk [vmem:[%s6756_s28 + $0x80] sm:$0xff] %vm3881_vm3, %v4723_v58  ;;  %v3945_v63 = vsel %vm3881_vm3, %v4723_v58, 0.0  ;;  %v3999_v2 = vmul.f32 %v4723_v58, %v4723_v58  ;;  %v4537_v15 = vpop.f32.mrb[18].mxu1  ;;  %v4690_v17 = vpop.f32.mrb[20].mxu0 }
 0x2c4   : > { %v3946_v9 = vadd.f32 %v3945_v63, %v3944_v48  ;;  %v4045_v5 = vadd.f32 %v4044_v55, %v4043_v33  ;;  %v4724_v50 = vadd.f32 %v4687_v30, %v4537_v15  ;;  %v2946_v25 = vpop.f32.mrb[19].mxu1  ;;  %v3811_v42 = vpop.f32.mrb[21].mxu0  ;;  %v4048_v40 = vsel %vm3881_vm3, %v4000_v46, 0.0 }
 0x2c5   : > { %v4046_v11 = vsel %vm3881_vm3, %v3999_v2, 0.0  ;;  %v4725_v23 = vadd.f32 %v3799_v18, %v2946_v25 }
 0x2c6   : > { %v4047_v60 = vadd.f32 %v4046_v11, %v4045_v5  ;;  %3901 = vst.msk [vmem:[%s6756_s28 + $0x98] sm:$0xff] %vm3881_vm3, %v4724_v50  ;;  %v3948_v56 = vadd.f32 %v3947_v32, %v3946_v9  ;;  %v4002_v52 = vmul.f32 %v4724_v50, %v4724_v50  ;;  %v3951_v13 = vsel %vm3881_vm3, %v4724_v50, 0.0 }
 0x2c7   : > { %3900 = vst.msk [vmem:[%s6756_s28 + $0x90] sm:$0xff] %vm3881_vm3, %v4725_v23  ;;  %v3949_v24 = vsel %vm3881_vm3, %v4725_v23, 0.0  ;;  %v4001_v3 = vmul.f32 %v4725_v23, %v4725_v23  ;;  %v4540_v34 = vpop.f32.mrb[20].mxu1  ;;  %v4693_v59 = vpop.f32.mrb[22].mxu0 }
 0x2c8   : > { %v3950_v8 = vadd.f32 %v3949_v24, %v3948_v56  ;;  %v4049_v6 = vadd.f32 %v4048_v40, %v4047_v60  ;;  %v4726_v37 = vadd.f32 %v4690_v17, %v4540_v34  ;;  %v2960_v14 = vpop.f32.mrb[21].mxu1  ;;  %v3823_v16 = vpop.f32.mrb[23].mxu0  ;;  %v4052_v22 = vsel %vm3881_vm3, %v4002_v52, 0.0 }
 0x2c9   : > { %v4050_v49 = vsel %vm3881_vm3, %v4001_v3, 0.0  ;;  %v4727_v38 = vadd.f32 %v3811_v42, %v2960_v14 }
 0x2ca   : > { %v4051_v21 = vadd.f32 %v4050_v49, %v4049_v6  ;;  %3903 = vst.msk [vmem:[%s6756_s28 + $0xa8] sm:$0xff] %vm3881_vm3, %v4726_v37  ;;  %v3952_v62 = vadd.f32 %v3951_v13, %v3950_v8  ;;  %v4004_v51 = vmul.f32 %v4726_v37, %v4726_v37  ;;  %v3955_v57 = vsel %vm3881_vm3, %v4726_v37, 0.0 }
 0x2cb   : > { %3902 = vst.msk [vmem:[%s6756_s28 + $0xa0] sm:$0xff] %vm3881_vm3, %v4727_v38  ;;  %v3953_v26 = vsel %vm3881_vm3, %v4727_v38, 0.0  ;;  %v4003_v47 = vmul.f32 %v4727_v38, %v4727_v38  ;;  %v4543_v1 = vpop.f32.mrb[22].mxu1  ;;  %v4696_v19 = vpop.f32.mrb[24].mxu0 }
 0x2cc   : > { %v3954_v36 = vadd.f32 %v3953_v26, %v3952_v62  ;;  %v4053_v43 = vadd.f32 %v4052_v22, %v4051_v21  ;;  %v4728_v44 = vadd.f32 %v4693_v59, %v4543_v1  ;;  %v2974_v27 = vpop.f32.mrb[23].mxu1  ;;  %v3835_v35 = vpop.f32.mrb[25].mxu0  ;;  %v4056_v20 = vsel %vm3881_vm3, %v4004_v51, 0.0 }
 0x2cd   : > { %v4054_v45 = vsel %vm3881_vm3, %v4003_v47, 0.0  ;;  %v4729_v28 = vadd.f32 %v3823_v16, %v2974_v27 }
 0x2ce   : > { %v4055_v12 = vadd.f32 %v4054_v45, %v4053_v43  ;;  %3905 = vst.msk [vmem:[%s6756_s28 + $0xb8] sm:$0xff] %vm3881_vm3, %v4728_v44  ;;  %v3956_v0 = vadd.f32 %v3955_v57, %v3954_v36  ;;  %v4006_v41 = vmul.f32 %v4728_v44, %v4728_v44  ;;  %v3959_v61 = vsel %vm3881_vm3, %v4728_v44, 0.0 }
 0x2cf   : > { %3904 = vst.msk [vmem:[%s6756_s28 + $0xb0] sm:$0xff] %vm3881_vm3, %v4729_v28  ;;  %v3957_v39 = vsel %vm3881_vm3, %v4729_v28, 0.0  ;;  %v4005_v10 = vmul.f32 %v4729_v28, %v4729_v28  ;;  %v4546_v53 = vpop.f32.mrb[24].mxu1  ;;  %v4699_v30 = vpop.f32.mrb[26].mxu0 }
 0x2d0   : > { %v3958_v4 = vadd.f32 %v3957_v39, %v3956_v0  ;;  %v4057_v7 = vadd.f32 %v4056_v20, %v4055_v12  ;;  %v4730_v31 = vadd.f32 %v4696_v19, %v4546_v53  ;;  %v2988_v54 = vpop.f32.mrb[25].mxu1  ;;  %v3847_v18 = vpop.f32.mrb[27].mxu0  ;;  %v4060_v55 = vsel %vm3881_vm3, %v4006_v41, 0.0 }
 0x2d1   : > { %v4058_v29 = vsel %vm3881_vm3, %v4005_v10, 0.0  ;;  %v4731_v58 = vadd.f32 %v3835_v35, %v2988_v54 }
 0x2d2   : > { %v4059_v33 = vadd.f32 %v4058_v29, %v4057_v7  ;;  %3907 = vst.msk [vmem:[%s6756_s28 + $0xc8] sm:$0xff] %vm3881_vm3, %v4730_v31  ;;  %v3960_v48 = vadd.f32 %v3959_v61, %v3958_v4  ;;  %v4008_v46 = vmul.f32 %v4730_v31, %v4730_v31  ;;  %v3963_v32 = vsel %vm3881_vm3, %v4730_v31, 0.0 }
 0x2d3   : > { %3906 = vst.msk [vmem:[%s6756_s28 + $0xc0] sm:$0xff] %vm3881_vm3, %v4731_v58  ;;  %v3961_v63 = vsel %vm3881_vm3, %v4731_v58, 0.0  ;;  %v4007_v2 = vmul.f32 %v4731_v58, %v4731_v58  ;;  %v4549_v15 = vpop.f32.mrb[26].mxu1  ;;  %v4702_v17 = vpop.f32.mrb[28].mxu0 }
 0x2d4   : > { %v3962_v9 = vadd.f32 %v3961_v63, %v3960_v48  ;;  %v4061_v5 = vadd.f32 %v4060_v55, %v4059_v33  ;;  %v4732_v50 = vadd.f32 %v4699_v30, %v4549_v15  ;;  %v3002_v25 = vpop.f32.mrb[27].mxu1  ;;  %v3859_v42 = vpop.f32.mrb[29].mxu0  ;;  %v4064_v40 = vsel %vm3881_vm3, %v4008_v46, 0.0 }
 0x2d5   : > { %v4062_v11 = vsel %vm3881_vm3, %v4007_v2, 0.0  ;;  %v4733_v23 = vadd.f32 %v3847_v18, %v3002_v25 }
 0x2d6   : > { %v4063_v60 = vadd.f32 %v4062_v11, %v4061_v5  ;;  %3909 = vst.msk [vmem:[%s6756_s28 + $0xd8] sm:$0xff] %vm3881_vm3, %v4732_v50  ;;  %v3964_v56 = vadd.f32 %v3963_v32, %v3962_v9  ;;  %v4010_v52 = vmul.f32 %v4732_v50, %v4732_v50  ;;  %v3967_v13 = vsel %vm3881_vm3, %v4732_v50, 0.0 }
 0x2d7   : > { %3908 = vst.msk [vmem:[%s6756_s28 + $0xd0] sm:$0xff] %vm3881_vm3, %v4733_v23  ;;  %v3965_v24 = vsel %vm3881_vm3, %v4733_v23, 0.0  ;;  %v4009_v3 = vmul.f32 %v4733_v23, %v4733_v23  ;;  %v4552_v34 = vpop.f32.mrb[28].mxu1  ;;  %v4705_v59 = vpop.f32.mrb[30].mxu0 }
 0x2d8   : > { %v3966_v8 = vadd.f32 %v3965_v24, %v3964_v56  ;;  %v4065_v6 = vadd.f32 %v4064_v40, %v4063_v60  ;;  %v4734_v37 = vadd.f32 %v4702_v17, %v4552_v34  ;;  %v3016_v14 = vpop.f32.mrb[29].mxu1  ;;  %v3871_v16 = vpop.f32.mrb[31].mxu0  ;;  %v4068_v22 = vsel %vm3881_vm3, %v4010_v52, 0.0 }
 0x2d9   : > { %v4066_v49 = vsel %vm3881_vm3, %v4009_v3, 0.0  ;;  %v4735_v38 = vadd.f32 %v3859_v42, %v3016_v14 }
 0x2da   : > { %v4067_v21 = vadd.f32 %v4066_v49, %v4065_v6  ;;  %3911 = vst.msk [vmem:[%s6756_s28 + $0xe8] sm:$0xff] %vm3881_vm3, %v4734_v37  ;;  %v3968_v62 = vadd.f32 %v3967_v13, %v3966_v8  ;;  %v4012_v51 = vmul.f32 %v4734_v37, %v4734_v37  ;;  %v3971_v27 = vsel %vm3881_vm3, %v4734_v37, 0.0 }
 0x2db   : > { %3910 = vst.msk [vmem:[%s6756_s28 + $0xe0] sm:$0xff] %vm3881_vm3, %v4735_v38  ;;  %v3969_v26 = vsel %vm3881_vm3, %v4735_v38, 0.0  ;;  %v4011_v47 = vmul.f32 %v4735_v38, %v4735_v38  ;;  %v4555_v1 = vpop.f32.mrb[30].mxu1 }
 0x2dc   : > { %v3970_v19 = vadd.f32 %v3969_v26, %v3968_v62  ;;  %v4069_v36 = vadd.f32 %v4068_v22, %v4067_v21  ;;  %v4736_v43 = vadd.f32 %v4705_v59, %v4555_v1  ;;  %v3030_v44 = vpop.f32.mrb[31].mxu1  ;;  %v4072_v20 = vsel %vm3881_vm3, %v4012_v51, 0.0 }
 0x2dd   : > { %v4070_v35 = vsel %vm3881_vm3, %v4011_v47, 0.0  ;;  %v4737_v57 = vadd.f32 %v3871_v16, %v3030_v44 }
 0x2de   : > { %v4071_v45 = vadd.f32 %v4070_v35, %v4069_v36  ;;  %3913 = vst.msk [vmem:[%s6756_s28 + $0xf8] sm:$0xff] %vm3881_vm3, %v4736_v43  ;;  %v3975_v28 = vsel %vm3881_vm3, %v4736_v43, 0.0  ;;  %v4014_v12 = vmul.f32 %v4736_v43, %v4736_v43  ;;  %v3972_v0 = vadd.f32 %v3971_v27, %v3970_v19 }
 0x2df   : > { %3912 = vst.msk [vmem:[%s6756_s28 + $0xf0] sm:$0xff] %vm3881_vm3, %v4737_v57  ;;  %v3973_v41 = vsel %vm3881_vm3, %v4737_v57, 0.0  ;;  %v4013_v39 = vmul.f32 %v4737_v57, %v4737_v57 }
 0x2e0   : > { %v4076_v10 = vsel %vm3881_vm3, %v4014_v12, 0.0  ;;  %v3974_v53 = vadd.f32 %v3973_v41, %v3972_v0  ;;  %v4073_v30 = vadd.f32 %v4072_v20, %v4071_v45 }
 0x2e1   : > { %v4074_v4 = vsel %vm3881_vm3, %v4013_v39, 0.0 }
 0x2e2   : > { %v3976_v7 = vadd.f32 %v3975_v28, %v3974_v53  ;;  %v4075_v31 = vadd.f32 %v4074_v4, %v4073_v30 }
 0x2e4   : > { %v3977_v54 = vrot.slane %v3976_v7, 4  ;;  %v4077_v18 = vadd.f32 %v4076_v10, %v4075_v31 }
 0x2e6   : > { %v3978_v61 = vadd.f32 %v3977_v54, %v3976_v7  ;;  %v4078_v29 = vrot.slane %v4077_v18, 4 }
 0x2e8   : > { %v3979_v58 = vrot.slane %v3978_v61, 2  ;;  %v4079_v33 = vadd.f32 %v4078_v29, %v4077_v18 }
 0x2ea   : > { %v3980_v48 = vadd.f32 %v3979_v58, %v3978_v61  ;;  %v4080_v55 = vrot.slane %v4079_v33, 2 }
 0x2ec   : > { %v3981_v46 = vrot.slane %v3980_v48, 1  ;;  %v4081_v63 = vadd.f32 %v4080_v55, %v4079_v33 }
 0x2ee   : > { %v4082_v2 = vrot.slane %v4081_v63, 1  ;;  %v3982_v15 = vadd.f32 %v3981_v46, %v3980_v48 }
 0x2f0   : > { %v4083_v17 = vadd.f32 %v4082_v2, %v4081_v63 }
 0x2f2   : > { %v4085_v9 = vsel %vm4084_vm4, %v3982_v15, %v4083_v17 }
 0x2f3   : > { %4087 = vst.msk [vmem:[%s198_s6] sm:$0x3] %vm4086_vm5, %v4085_v9 }
 0x2f4   : > { %4921 = shalt.err (!%p4918_p3)
}
 0x2f5   : > { %s4922_s20 = scalar_lea.hbm %s6891_s10, 32  ;;  %s4926_s27 = scalar_lea.hbm %s6937_s4, 64 }
 0x2f6   : > { %p4923_p4 = scmp.ne.s32.totalorder %s6891_s10, %s4922_s20  ;;  %p4927_p9 = scmp.lt.u32.totalorder %s6891_s10, %s6937_s4 }
 0x2f7   : > { %p4928_p10 = scmp.lt.u32.totalorder %s4926_s27, %s4922_s20  ;;  %p4930_p12 = scmp.lt.u32.totalorder %s4922_s20, %s6891_s10 }
 0x2f8   : > { %p4924_p7 = pnand %p4923_p4, %p5036_p5 }
 0x2f9   : > { %p4929_p11 = por %p4928_p10, %p4927_p9 }
 0x2fa   : > { %p4925_p8 = pneg %p4924_p7 }
 0x2fb   : > { %p4931_p13 = por %p4930_p12, %p4929_p11 }
 0x2fd   : > { %p4932_p0 = pnand %p4931_p13, %p4925_p8 }
 0x2ff   : > { %4935 = shalt.err (!%p4932_p0)
}
 0x300   : > { %4867 = dma.vmem_to_hbm [thread:$0]  (%p5036_p5), %s6893_s7, 32, %s6891_s10, %s4094_s11  }
 0x301 PF: > { %p4873_p1 = scmp.ge.s32.totalorder %s4970_s18, 2  ;;  %s4130_s30 = sand.u32 1, %s4958_s15  }
 0x302   : > { %s4131_s5 = scalar_lea.sflag [#allocation3], %s4130_s30 }
 0x303   : > { %p4870_p2 = pnand %p4873_p1, %p5040_p6 }
 0x305   : > { %4953 = dma.done.wait (!%p4870_p2), %s4131_s5, 32  }
 0x306   : > { %4955 = vsyncadd (!%p4870_p2), %s4131_s5, 4294967264  ;;  %p15_p3 = scmp.ge.s32.totalorder %s5023_s21, 4   ;;  %s7082_s15 = smov %s4962_s16 }
 0x307   : > { %s7083_s16 = smov %s4966_s17  ;;  %s7084_s17 = smov %s5034_s24 }
 0x308   : > { %s7085_s18 = smov %s5023_s21  ;;  %17 = sbr.rel (!%p15_p3) target bundleno = 3 (0x3), region = 79 }
 0x30f   :  { %4136 = vsyncpa [#allocation3], 1 }
 0x310   :  { %4138 = vsyncpa [#allocation3 + $0x1], 1 }

</bundles_post_ra>
